<compile_context>
chip_gen: v6e
topology: v6e:2x2x1
jax: 0.10.0
libtpu: 0.0.40
codegen_flags: <defaults>
</compile_context>

<pallas_src>
import functools

import numpy as np
import jax
import jax.numpy as jnp
from jax import lax
from jax.experimental import pallas as pl
from jax.experimental.pallas import tpu as pltpu


# ---------------------------------------------------------------------------
# In-kernel building blocks
# ---------------------------------------------------------------------------
def _conv_bn_relu_pool(s_ref, wk_ref, sc_ref, sh_ref, *, h, w, cout):
    """3x3 SAME conv + folded bias/BN + ReLU + 2x2 maxpool.

    s_ref:  (h+2, (w+2)*cin) zero-padded VMEM slab (lanes = x-major, channel-minor;
            stage 1 uses channel-major lanes and a matching weight layout).
    wk_ref: (3, (w+2)*cin, w*cout) block-Toeplitz weights, one slice per row tap kh.
    Returns a (h//2, (w//2)*cout) value, lanes = (x, channel): exactly the layout the
    next stage's slab store expects.
    """
    acc = None
    for kh in range(3):                                    # 3 row taps, unrolled
        patch = s_ref[kh:kh + h, :]                        # (h, (w+2)*cin)
        d = jnp.dot(patch, wk_ref[kh], preferred_element_type=jnp.float32)
        acc = d if acc is None else acc + d                # (h, w*cout) f32
    y = jnp.maximum(acc * sc_ref[...] + sh_ref[...], 0.0)  # folded bias/BN + ReLU
    # 2x2 maxpool: pair rows (sublanes), then pair x lane-blocks.
    rows = [jnp.maximum(y[2 * i:2 * i + 1, :], y[2 * i + 1:2 * i + 2, :])
            for i in range(h // 2)]
    y = jnp.concatenate(rows, axis=0)                      # (h/2, w*cout)
    cols = [jnp.maximum(y[:, (2 * j) * cout:(2 * j + 1) * cout],
                        y[:, (2 * j + 1) * cout:(2 * j + 2) * cout])
            for j in range(w // 2)]
    return jnp.concatenate(cols, axis=1)                   # (h/2, (w/2)*cout)


def _upconv2x2(v, w_ref, b_ref, *, w_in, cin, cout, relu):
    """ConvTranspose2d(kernel=2, stride=2) on a raster (rows, w_in*cin) value.

    Dense per-column matmuls (no block-diagonal zero padding); the kh phase is moved
    into the row dimension, the kw phase stays in lanes, so the result is again a
    raster (2*rows, 2*w_in*cout) image value.
    """
    rows = v.shape[0]
    wmat = w_ref[...]                                      # (cin, 4*cout), lanes (kh,kw,co)
    bias = b_ref[...]                                      # (1, 4*cout)
    blocks = []
    for xb in range(w_in):
        px = v[:, xb * cin:(xb + 1) * cin]                 # (rows, cin)
        z = jnp.dot(px, wmat, preferred_element_type=jnp.float32) + bias
        if relu:
            z = jnp.maximum(z, 0.0)
        blocks.append(z)                                   # (rows, 4*cout)
    halves = []
    for kh in range(2):                                    # peel kh out of the lanes
        parts = [blocks[xb][:, kh * 2 * cout:(kh + 1) * 2 * cout]
                 for xb in range(w_in)]
        halves.append(jnp.concatenate(parts, axis=1))      # (rows, 2*w_in*cout)
    inter = []
    for r in range(rows):                                  # out row = 2*r + kh
        inter.append(halves[0][r:r + 1, :])
        inter.append(halves[1][r:r + 1, :])
    return jnp.concatenate(inter, axis=0)                  # (2*rows, 2*w_in*cout)


def _fused_forward_kernel(x_ref,
                          w1_ref, sc1_ref, sh1_ref,
                          w2_ref, sc2_ref, sh2_ref,
                          w3_ref, sc3_ref, sh3_ref,
                          uw1_ref, ub1_ref, uw2_ref, ub2_ref, uw3_ref, ub3_ref,
                          o_ref,
                          s1, s2, s3,
                          *, hw, n_classes):
    h1, h2, h3 = hw, hw // 2, hw // 4

    # Zero the padded slabs: provides the conv zero border, interiors are overwritten.
    s1[...] = jnp.zeros(s1.shape, jnp.float32)
    s2[...] = jnp.zeros(s2.shape, jnp.float32)
    s3[...] = jnp.zeros(s3.shape, jnp.float32)

    # Stage-1 input glue (NCHW -> channel-major padded slab), done in-kernel.
    for c in range(3):
        base = c * (h1 + 2)
        s1[1:h1 + 1, base + 1:base + 1 + h1] = x_ref[0, c].astype(jnp.float32)

    p1 = _conv_bn_relu_pool(s1, w1_ref, sc1_ref, sh1_ref, h=h1, w=h1, cout=16)
    s2[1:h2 + 1, 16:(h2 + 1) * 16] = p1                    # pooled -> next padded slab

    p2 = _conv_bn_relu_pool(s2, w2_ref, sc2_ref, sh2_ref, h=h2, w=h2, cout=32)
    s3[1:h3 + 1, 32:(h3 + 1) * 32] = p2

    p3 = _conv_bn_relu_pool(s3, w3_ref, sc3_ref, sh3_ref, h=h3, w=h3, cout=64)
    # TODO(synk): nn.Dropout treated as inference-mode identity (eval semantics).

    d = _upconv2x2(p3, uw1_ref, ub1_ref, w_in=h3 // 2, cin=64, cout=32, relu=True)
    d = _upconv2x2(d, uw2_ref, ub2_ref, w_in=h3, cin=32, cout=16, relu=True)
    d = _upconv2x2(d, uw3_ref, ub3_ref, w_in=h2, cin=16, cout=n_classes, relu=False)
    o_ref[0] = d.astype(o_ref.dtype)                       # (hw, hw*n_classes) lane-dense


# ---------------------------------------------------------------------------
# Host-side, one-time weight packing (numpy; done OUTSIDE jit, once per model)
# ---------------------------------------------------------------------------
def _pack_conv_stage(k_oihw, bias, gamma, beta, mean, var, *, w, channel_major,
                     eps=1e-5):
    k = np.asarray(k_oihw, np.float32)
    cout, cin = k.shape[0], k.shape[1]
    wp = w + 2
    wk = np.zeros((3, wp * cin, w * cout), np.float32)
    for kh in range(3):
        for x in range(w):
            for kw in range(3):
                xi = x + kw
                blk = k[:, :, kh, kw].T                    # (cin, cout)
                if channel_major:                          # lanes = c*(w+2) + x
                    for ci in range(cin):
                        wk[kh, ci * wp + xi, x * cout:(x + 1) * cout] = blk[ci]
                else:                                      # lanes = x*cin + c
                    wk[kh, xi * cin:(xi + 1) * cin, x * cout:(x + 1) * cout] = blk
    s = np.asarray(gamma, np.float32) / np.sqrt(np.asarray(var, np.float32) + eps)
    sh = (np.asarray(bias, np.float32) - np.asarray(mean, np.float32)) * s \
        + np.asarray(beta, np.float32)
    return wk, np.tile(s, w)[None, :], np.tile(sh, w)[None, :]


def _pack_upconv(w_iokk, b):
    wt = np.asarray(w_iokk, np.float32)
    cin, cout = wt.shape[0], wt.shape[1]
    w = np.transpose(wt, (0, 2, 3, 1)).reshape(cin, 4 * cout)   # lanes (kh, kw, co)
    bt = np.tile(np.asarray(b, np.float32), 4)[None, :]
    return w, bt


def prepare_params(p, *, hw):
    h1, h2, h3 = hw, hw // 2, hw // 4
    w1, sc1, sh1 = _pack_conv_stage(p["w1"], p["b1"], *p["bn1"], w=h1, channel_major=True)
    w2, sc2, sh2 = _pack_conv_stage(p["w2"], p["b2"], *p["bn2"], w=h2, channel_major=False)
    w3, sc3, sh3 = _pack_conv_stage(p["w3"], p["b3"], *p["bn3"], w=h3, channel_major=False)
    uw1, ub1 = _pack_upconv(p["uw1"], p["ub1"])
    uw2, ub2 = _pack_upconv(p["uw2"], p["ub2"])
    uw3, ub3 = _pack_upconv(p["uw3"], p["ub3"])
    return tuple(jnp.asarray(a) for a in (w1, sc1, sh1, w2, sc2, sh2, w3, sc3, sh3,
                                          uw1, ub1, uw2, ub2, uw3, ub3))


# ---------------------------------------------------------------------------
# Full forward (one pallas_call)
# ---------------------------------------------------------------------------
def fo_intern_net_forward(x_nchw, packed):
    n, cin, hw, hw2 = x_nchw.shape
    assert cin == 3 and hw == hw2 and hw % 8 == 0
    h1, h2, h3 = hw, hw // 2, hw // 4
    (w1, sc1, sh1, w2, sc2, sh2, w3, sc3, sh3,
     uw1, ub1, uw2, ub2, uw3, ub3) = packed
    n_classes = ub3.shape[1] // 4                          # static shape, not a tracer

    kern = functools.partial(_fused_forward_kernel, hw=hw, n_classes=n_classes)

    enc_flops = 2 * 3 * (h1 * w1.shape[1] * w1.shape[2]
                         + h2 * w2.shape[1] * w2.shape[2]
                         + h3 * w3.shape[1] * w3.shape[2])
    dec_flops = 2 * ((h3 // 2) ** 2 * 64 * 4 * 32
                     + h3 ** 2 * 32 * 4 * 16
                     + h2 ** 2 * 16 * 4 * n_classes)
    weight_bytes = sum(int(a.size) * 4 for a in packed)
    cost = pl.CostEstimate(
        flops=int(n * (enc_flops + dec_flops)),
        transcendentals=0,
        bytes_accessed=int(x_nchw.size * 4 + weight_bytes
                           + n * hw * hw * n_classes * 4))

    bcast2 = lambda i: (0, 0)
    bcast3 = lambda i: (0, 0, 0)

    out = pl.pallas_call(
        kern,
        out_shape=jax.ShapeDtypeStruct((n, hw, hw * n_classes), jnp.float32),
        grid_spec=pltpu.PrefetchScalarGridSpec(
            num_scalar_prefetch=0,
            grid=(n,),
            in_specs=[
                pl.BlockSpec((1, 3, hw, hw), lambda i: (i, 0, 0, 0)),
                pl.BlockSpec(tuple(w1.shape), bcast3),
                pl.BlockSpec(tuple(sc1.shape), bcast2),
                pl.BlockSpec(tuple(sh1.shape), bcast2),
                pl.BlockSpec(tuple(w2.shape), bcast3),
                pl.BlockSpec(tuple(sc2.shape), bcast2),
                pl.BlockSpec(tuple(sh2.shape), bcast2),
                pl.BlockSpec(tuple(w3.shape), bcast3),
                pl.BlockSpec(tuple(sc3.shape), bcast2),
                pl.BlockSpec(tuple(sh3.shape), bcast2),
                pl.BlockSpec(tuple(uw1.shape), bcast2),
                pl.BlockSpec(tuple(ub1.shape), bcast2),
                pl.BlockSpec(tuple(uw2.shape), bcast2),
                pl.BlockSpec(tuple(ub2.shape), bcast2),
                pl.BlockSpec(tuple(uw3.shape), bcast2),
                pl.BlockSpec(tuple(ub3.shape), bcast2),
            ],
            out_specs=pl.BlockSpec((1, hw, hw * n_classes), lambda i: (i, 0, 0)),
            scratch_shapes=[
                pltpu.VMEM((h1 + 2, 3 * (h1 + 2)), jnp.float32),
                pltpu.VMEM((h2 + 2, (h2 + 2) * 16), jnp.float32),
                pltpu.VMEM((h3 + 2, (h3 + 2) * 32), jnp.float32),
            ],
        ),
        compiler_params=pltpu.CompilerParams(
            dimension_semantics=("parallel",)),
        cost_estimate=cost,
    )(x_nchw.astype(jnp.float32), w1, sc1, sh1, w2, sc2, sh2, w3, sc3, sh3,
      uw1, ub1, uw2, ub2, uw3, ub3)

    # Only remaining XLA glue: one fused reshape+transpose of the final 16 KB output
    # from the lane-dense (n, H, W*ncls) store layout to the module's NCHW layout.
    return out.reshape(n, hw, hw, n_classes).transpose(0, 3, 1, 2)


# ---------------------------------------------------------------------------
# Pure-JAX reference (correctness check)
# ---------------------------------------------------------------------------
def _ref_conv3x3(x, w_oikk, b):
    w_hwio = jnp.transpose(w_oikk, (2, 3, 1, 0))
    y = lax.conv_general_dilated(
        x, w_hwio, (1, 1), "SAME", dimension_numbers=("NHWC", "HWIO", "NHWC"))
    return y + b


def _ref_bn(x, gamma, beta, mean, var, eps=1e-5):
    return (x - mean) / jnp.sqrt(var + eps) * gamma + beta


def _ref_pool(x):
    n, h, w, c = x.shape
    return jnp.max(x.reshape(n, h // 2, 2, w // 2, 2, c), axis=(2, 4))


def _ref_convt(x, w_iokk, b):
    n, h, wd, cin = x.shape
    cout = w_iokk.shape[1]
    y = jnp.einsum("nhwi,iokl->nhwklo", x, w_iokk)
    y = y.transpose(0, 1, 3, 2, 4, 5).reshape(n, 2 * h, 2 * wd, cout)
    return y + b


def reference_forward(x_nchw, p):
    x = jnp.transpose(x_nchw, (0, 2, 3, 1))
    x = _ref_pool(jax.nn.relu(_ref_bn(_ref_conv3x3(x, p["w1"], p["b1"]), *p["bn1"])))
    x = _ref_pool(jax.nn.relu(_ref_bn(_ref_conv3x3(x, p["w2"], p["b2"]), *p["bn2"])))
    x = _ref_pool(jax.nn.relu(_ref_bn(_ref_conv3x3(x, p["w3"], p["b3"]), *p["bn3"])))
    x = jax.nn.relu(_ref_convt(x, p["uw1"], p["ub1"]))
    x = jax.nn.relu(_ref_convt(x, p["uw2"], p["ub2"]))
    x = _ref_convt(x, p["uw3"], p["ub3"])
    return jnp.transpose(x, (0, 3, 1, 2))


# ---------------------------------------------------------------------------
# Deterministic parameter construction
# ---------------------------------------------------------------------------
def make_params(key, n_classes):
    keys = jax.random.split(key, 24)
    ki = iter(keys)

    def nrm(shape, s=0.1):
        return (s * jax.random.normal(next(ki), shape)).astype(jnp.float32)

    def bn(c):
        gamma = 1.0 + nrm((c,), 0.05)
        beta = nrm((c,), 0.05)
        mean = nrm((c,), 0.05)
        var = 0.5 + jax.random.uniform(next(ki), (c,), jnp.float32)
        return (gamma, beta, mean, var)

    p = {}
    p["w1"], p["b1"], p["bn1"] = nrm((16, 3, 3, 3)), nrm((16,)), bn(16)
    p["w2"], p["b2"], p["bn2"] = nrm((32, 16, 3, 3)), nrm((32,)), bn(32)
    p["w3"], p["b3"], p["bn3"] = nrm((64, 32, 3, 3)), nrm((64,)), bn(64)
    p["uw1"], p["ub1"] = nrm((64, 32, 2, 2)), nrm((32,))
    p["uw2"], p["ub2"] = nrm((32, 16, 2, 2)), nrm((16,))
    p["uw3"], p["ub3"] = nrm((16, n_classes, 2, 2)), nrm((n_classes,))
    return p


# ---------------------------------------------------------------------------
if __name__ == "__main__":
    key = jax.random.PRNGKey(0)
    kx, kp = jax.random.split(key)

    n_classes = 8
    hw = 16
    x = jax.random.normal(kx, (2, 3, hw, hw), jnp.float32)    # NCHW, 3-channel input
    params = make_params(kp, n_classes)

    packed = prepare_params(params, hw=hw)                    # host-side, once per model

    fwd = jax.jit(fo_intern_net_forward)
    out = jax.block_until_ready(fwd(x, packed))
    assert out.shape == (2, n_classes, hw, hw), out.shape

    ref = jax.block_until_ready(jax.jit(reference_forward)(x, params))
    err = float(jnp.max(jnp.abs(out - ref)))
    assert jnp.allclose(out, ref, atol=2e-4, rtol=2e-4), err

    print("KERNEL_OK")
</pallas_src>

<mosaic_0001>
module attributes {stable_mosaic.version = 11 : i64} {
  func.func @_fused_forward_kernel(%arg0: i32, %arg1: memref<1x3x16x16xf32, #tpu.memory_space<vmem>>, %arg2: memref<3x54x256xf32, #tpu.memory_space<vmem>>, %arg3: memref<1x256xf32, #tpu.memory_space<vmem>>, %arg4: memref<1x256xf32, #tpu.memory_space<vmem>>, %arg5: memref<3x160x256xf32, #tpu.memory_space<vmem>>, %arg6: memref<1x256xf32, #tpu.memory_space<vmem>>, %arg7: memref<1x256xf32, #tpu.memory_space<vmem>>, %arg8: memref<3x192x256xf32, #tpu.memory_space<vmem>>, %arg9: memref<1x256xf32, #tpu.memory_space<vmem>>, %arg10: memref<1x256xf32, #tpu.memory_space<vmem>>, %arg11: memref<64x128xf32, #tpu.memory_space<vmem>>, %arg12: memref<1x128xf32, #tpu.memory_space<vmem>>, %arg13: memref<32x64xf32, #tpu.memory_space<vmem>>, %arg14: memref<1x64xf32, #tpu.memory_space<vmem>>, %arg15: memref<16x32xf32, #tpu.memory_space<vmem>>, %arg16: memref<1x32xf32, #tpu.memory_space<vmem>>, %arg17: memref<1x16x128xf32, #tpu.memory_space<vmem>>, %arg18: memref<18x54xf32, #tpu.memory_space<vmem>>, %arg19: memref<10x160xf32, #tpu.memory_space<vmem>>, %arg20: memref<6x192xf32, #tpu.memory_space<vmem>>) attributes {dimension_semantics = [#tpu.dimension_semantics<parallel>], iteration_bounds = array<i64: 2>, scalar_prefetch = 0 : i64, scratch_operands = 3 : i64, tpu.core_type = #tpu.core_type<tc>, window_params = [{transform_indices = @transform_0, window_bounds = array<i64: 1, 3, 16, 16>}, {pipeline_mode = #tpu.pipeline_mode<synchronous>, transform_indices = @transform_1, window_bounds = array<i64: 3, 54, 256>}, {pipeline_mode = #tpu.pipeline_mode<synchronous>, transform_indices = @transform_2, window_bounds = array<i64: 1, 256>}, {pipeline_mode = #tpu.pipeline_mode<synchronous>, transform_indices = @transform_3, window_bounds = array<i64: 1, 256>}, {pipeline_mode = #tpu.pipeline_mode<synchronous>, transform_indices = @transform_4, window_bounds = array<i64: 3, 160, 256>}, {pipeline_mode = #tpu.pipeline_mode<synchronous>, transform_indices = @transform_5, window_bounds = array<i64: 1, 256>}, {pipeline_mode = #tpu.pipeline_mode<synchronous>, transform_indices = @transform_6, window_bounds = array<i64: 1, 256>}, {pipeline_mode = #tpu.pipeline_mode<synchronous>, transform_indices = @transform_7, window_bounds = array<i64: 3, 192, 256>}, {pipeline_mode = #tpu.pipeline_mode<synchronous>, transform_indices = @transform_8, window_bounds = array<i64: 1, 256>}, {pipeline_mode = #tpu.pipeline_mode<synchronous>, transform_indices = @transform_9, window_bounds = array<i64: 1, 256>}, {pipeline_mode = #tpu.pipeline_mode<synchronous>, transform_indices = @transform_10, window_bounds = array<i64: 64, 128>}, {pipeline_mode = #tpu.pipeline_mode<synchronous>, transform_indices = @transform_11, window_bounds = array<i64: 1, 128>}, {pipeline_mode = #tpu.pipeline_mode<synchronous>, transform_indices = @transform_12, window_bounds = array<i64: 32, 64>}, {pipeline_mode = #tpu.pipeline_mode<synchronous>, transform_indices = @transform_13, window_bounds = array<i64: 1, 64>}, {pipeline_mode = #tpu.pipeline_mode<synchronous>, transform_indices = @transform_14, window_bounds = array<i64: 16, 32>}, {pipeline_mode = #tpu.pipeline_mode<synchronous>, transform_indices = @transform_15, window_bounds = array<i64: 1, 32>}, {transform_indices = @transform_16, window_bounds = array<i64: 1, 16, 128>}]} {
    %cst = arith.constant 0.000000e+00 : f32
    %0 = vector.broadcast %cst : f32 to vector<18x54xf32>
    %c0 = arith.constant 0 : index
    %c0_0 = arith.constant 0 : index
    %1 = vector.load %arg18[%c0, %c0_0] : memref<18x54xf32, #tpu.memory_space<vmem>>, vector<18x54xf32>
    tpu.vector_store %arg18[%c0, %c0_0], %0 {strides = array<i32>} : memref<18x54xf32, #tpu.memory_space<vmem>>, vector<18x54xf32>,
    %cst_1 = arith.constant 0.000000e+00 : f32
    %2 = vector.broadcast %cst_1 : f32 to vector<10x160xf32>
    %c0_2 = arith.constant 0 : index
    %c0_3 = arith.constant 0 : index
    %3 = vector.load %arg19[%c0_2, %c0_3] : memref<10x160xf32, #tpu.memory_space<vmem>>, vector<10x160xf32>
    tpu.vector_store %arg19[%c0_2, %c0_3], %2 {strides = array<i32>} : memref<10x160xf32, #tpu.memory_space<vmem>>, vector<10x160xf32>,
    %cst_4 = arith.constant 0.000000e+00 : f32
    %4 = vector.broadcast %cst_4 : f32 to vector<6x192xf32>
    %c0_5 = arith.constant 0 : index
    %c0_6 = arith.constant 0 : index
    %5 = vector.load %arg20[%c0_5, %c0_6] : memref<6x192xf32, #tpu.memory_space<vmem>>, vector<6x192xf32>
    tpu.vector_store %arg20[%c0_5, %c0_6], %4 {strides = array<i32>} : memref<6x192xf32, #tpu.memory_space<vmem>>, vector<6x192xf32>,
    %c0_7 = arith.constant 0 : index
    %c0_8 = arith.constant 0 : index
    %c0_9 = arith.constant 0 : index
    %c0_10 = arith.constant 0 : index
    %6 = vector.load %arg1[%c0_7, %c0_8, %c0_9, %c0_10] : memref<1x3x16x16xf32, #tpu.memory_space<vmem>>, vector<1x1x16x16xf32>
    %7 = vector.shape_cast %6 : vector<1x1x16x16xf32> to vector<16x16xf32>
    %c1 = arith.constant 1 : index
    %c1_11 = arith.constant 1 : index
    %8 = vector.load %arg18[%c1, %c1_11] : memref<18x54xf32, #tpu.memory_space<vmem>>, vector<16x16xf32>
    tpu.vector_store %arg18[%c1, %c1_11], %7 {strides = array<i32>} : memref<18x54xf32, #tpu.memory_space<vmem>>, vector<16x16xf32>,
    %c0_12 = arith.constant 0 : index
    %c1_13 = arith.constant 1 : index
    %c0_14 = arith.constant 0 : index
    %c0_15 = arith.constant 0 : index
    %9 = vector.load %arg1[%c0_12, %c1_13, %c0_14, %c0_15] : memref<1x3x16x16xf32, #tpu.memory_space<vmem>>, vector<1x1x16x16xf32>
    %10 = vector.shape_cast %9 : vector<1x1x16x16xf32> to vector<16x16xf32>
    %c1_16 = arith.constant 1 : index
    %c19 = arith.constant 19 : index
    %11 = vector.load %arg18[%c1_16, %c19] : memref<18x54xf32, #tpu.memory_space<vmem>>, vector<16x16xf32>
    tpu.vector_store %arg18[%c1_16, %c19], %10 {strides = array<i32>} : memref<18x54xf32, #tpu.memory_space<vmem>>, vector<16x16xf32>,
    %c0_17 = arith.constant 0 : index
    %c2 = arith.constant 2 : index
    %c0_18 = arith.constant 0 : index
    %c0_19 = arith.constant 0 : index
    %12 = vector.load %arg1[%c0_17, %c2, %c0_18, %c0_19] : memref<1x3x16x16xf32, #tpu.memory_space<vmem>>, vector<1x1x16x16xf32>
    %13 = vector.shape_cast %12 : vector<1x1x16x16xf32> to vector<16x16xf32>
    %c1_20 = arith.constant 1 : index
    %c37 = arith.constant 37 : index
    %14 = vector.load %arg18[%c1_20, %c37] : memref<18x54xf32, #tpu.memory_space<vmem>>, vector<16x16xf32>
    tpu.vector_store %arg18[%c1_20, %c37], %13 {strides = array<i32>} : memref<18x54xf32, #tpu.memory_space<vmem>>, vector<16x16xf32>,
    %c0_21 = arith.constant 0 : index
    %c0_22 = arith.constant 0 : index
    %15 = vector.load %arg18[%c0_21, %c0_22] : memref<18x54xf32, #tpu.memory_space<vmem>>, vector<16x54xf32>
    %c0_23 = arith.constant 0 : index
    %c0_24 = arith.constant 0 : index
    %c0_25 = arith.constant 0 : index
    %16 = vector.load %arg2[%c0_23, %c0_24, %c0_25] : memref<3x54x256xf32, #tpu.memory_space<vmem>>, vector<1x54x256xf32>
    %17 = vector.shape_cast %16 : vector<1x54x256xf32> to vector<54x256xf32>
    %cst_26 = arith.constant dense<0.000000e+00> : vector<16x256xf32>
    %18 = tpu.matmul %15, %17, %cst_26 {dimension_numbers = #tpu.dot_dimension_numbers<[1], [0], [0], [1], [0, 0, 1, 1], [], []>} : vector<16x54xf32>, vector<54x256xf32>, vector<16x256xf32> -> vector<16x256xf32>
    %c1_27 = arith.constant 1 : index
    %c0_28 = arith.constant 0 : index
    %19 = vector.load %arg18[%c1_27, %c0_28] : memref<18x54xf32, #tpu.memory_space<vmem>>, vector<16x54xf32>
    %c1_29 = arith.constant 1 : index
    %c0_30 = arith.constant 0 : index
    %c0_31 = arith.constant 0 : index
    %20 = vector.load %arg2[%c1_29, %c0_30, %c0_31] : memref<3x54x256xf32, #tpu.memory_space<vmem>>, vector<1x54x256xf32>
    %21 = vector.shape_cast %20 : vector<1x54x256xf32> to vector<54x256xf32>
    %cst_32 = arith.constant dense<0.000000e+00> : vector<16x256xf32>
    %22 = tpu.matmul %19, %21, %cst_32 {dimension_numbers = #tpu.dot_dimension_numbers<[1], [0], [0], [1], [0, 0, 1, 1], [], []>} : vector<16x54xf32>, vector<54x256xf32>, vector<16x256xf32> -> vector<16x256xf32>
    %23 = arith.addf %18, %22 : vector<16x256xf32>
    %c2_33 = arith.constant 2 : index
    %c0_34 = arith.constant 0 : index
    %24 = vector.load %arg18[%c2_33, %c0_34] : memref<18x54xf32, #tpu.memory_space<vmem>>, vector<16x54xf32>
    %c2_35 = arith.constant 2 : index
    %c0_36 = arith.constant 0 : index
    %c0_37 = arith.constant 0 : index
    %25 = vector.load %arg2[%c2_35, %c0_36, %c0_37] : memref<3x54x256xf32, #tpu.memory_space<vmem>>, vector<1x54x256xf32>
    %26 = vector.shape_cast %25 : vector<1x54x256xf32> to vector<54x256xf32>
    %cst_38 = arith.constant dense<0.000000e+00> : vector<16x256xf32>
    %27 = tpu.matmul %24, %26, %cst_38 {dimension_numbers = #tpu.dot_dimension_numbers<[1], [0], [0], [1], [0, 0, 1, 1], [], []>} : vector<16x54xf32>, vector<54x256xf32>, vector<16x256xf32> -> vector<16x256xf32>
    %28 = arith.addf %23, %27 : vector<16x256xf32>
    %c0_39 = arith.constant 0 : index
    %c0_40 = arith.constant 0 : index
    %29 = vector.load %arg3[%c0_39, %c0_40] : memref<1x256xf32, #tpu.memory_space<vmem>>, vector<1x256xf32>
    %30 = vector.broadcast %29 : vector<1x256xf32> to vector<16x256xf32>
    %31 = arith.mulf %28, %30 : vector<16x256xf32>
    %c0_41 = arith.constant 0 : index
    %c0_42 = arith.constant 0 : index
    %32 = vector.load %arg4[%c0_41, %c0_42] : memref<1x256xf32, #tpu.memory_space<vmem>>, vector<1x256xf32>
    %33 = vector.broadcast %32 : vector<1x256xf32> to vector<16x256xf32>
    %34 = arith.addf %31, %33 : vector<16x256xf32>
    %cst_43 = arith.constant 0.000000e+00 : f32
    %35 = vector.broadcast %cst_43 : f32 to vector<16x256xf32>
    %36 = arith.maximumf %34, %35 : vector<16x256xf32>
    %37 = vector.extract_strided_slice %36 {offsets = [0, 0], sizes = [1, 256], strides = [1, 1]} : vector<16x256xf32> to vector<1x256xf32>
    %38 = vector.extract_strided_slice %36 {offsets = [1, 0], sizes = [1, 256], strides = [1, 1]} : vector<16x256xf32> to vector<1x256xf32>
    %39 = arith.maximumf %37, %38 : vector<1x256xf32>
    %40 = vector.extract_strided_slice %36 {offsets = [2, 0], sizes = [1, 256], strides = [1, 1]} : vector<16x256xf32> to vector<1x256xf32>
    %41 = vector.extract_strided_slice %36 {offsets = [3, 0], sizes = [1, 256], strides = [1, 1]} : vector<16x256xf32> to vector<1x256xf32>
    %42 = arith.maximumf %40, %41 : vector<1x256xf32>
    %43 = vector.extract_strided_slice %36 {offsets = [4, 0], sizes = [1, 256], strides = [1, 1]} : vector<16x256xf32> to vector<1x256xf32>
    %44 = vector.extract_strided_slice %36 {offsets = [5, 0], sizes = [1, 256], strides = [1, 1]} : vector<16x256xf32> to vector<1x256xf32>
    %45 = arith.maximumf %43, %44 : vector<1x256xf32>
    %46 = vector.extract_strided_slice %36 {offsets = [6, 0], sizes = [1, 256], strides = [1, 1]} : vector<16x256xf32> to vector<1x256xf32>
    %47 = vector.extract_strided_slice %36 {offsets = [7, 0], sizes = [1, 256], strides = [1, 1]} : vector<16x256xf32> to vector<1x256xf32>
    %48 = arith.maximumf %46, %47 : vector<1x256xf32>
    %49 = vector.extract_strided_slice %36 {offsets = [8, 0], sizes = [1, 256], strides = [1, 1]} : vector<16x256xf32> to vector<1x256xf32>
    %50 = vector.extract_strided_slice %36 {offsets = [9, 0], sizes = [1, 256], strides = [1, 1]} : vector<16x256xf32> to vector<1x256xf32>
    %51 = arith.maximumf %49, %50 : vector<1x256xf32>
    %52 = vector.extract_strided_slice %36 {offsets = [10, 0], sizes = [1, 256], strides = [1, 1]} : vector<16x256xf32> to vector<1x256xf32>
    %53 = vector.extract_strided_slice %36 {offsets = [11, 0], sizes = [1, 256], strides = [1, 1]} : vector<16x256xf32> to vector<1x256xf32>
    %54 = arith.maximumf %52, %53 : vector<1x256xf32>
    %55 = vector.extract_strided_slice %36 {offsets = [12, 0], sizes = [1, 256], strides = [1, 1]} : vector<16x256xf32> to vector<1x256xf32>
    %56 = vector.extract_strided_slice %36 {offsets = [13, 0], sizes = [1, 256], strides = [1, 1]} : vector<16x256xf32> to vector<1x256xf32>
    %57 = arith.maximumf %55, %56 : vector<1x256xf32>
    %58 = vector.extract_strided_slice %36 {offsets = [14, 0], sizes = [1, 256], strides = [1, 1]} : vector<16x256xf32> to vector<1x256xf32>
    %59 = vector.extract_strided_slice %36 {offsets = [15, 0], sizes = [1, 256], strides = [1, 1]} : vector<16x256xf32> to vector<1x256xf32>
    %60 = arith.maximumf %58, %59 : vector<1x256xf32>
    %61 = tpu.concatenate %39, %42, %45, %48, %51, %54, %57, %60 in 0 : vector<1x256xf32>, vector<1x256xf32>, vector<1x256xf32>, vector<1x256xf32>, vector<1x256xf32>, vector<1x256xf32>, vector<1x256xf32>, vector<1x256xf32> -> vector<8x256xf32>
    %62 = vector.extract_strided_slice %61 {offsets = [0, 0], sizes = [8, 16], strides = [1, 1]} : vector<8x256xf32> to vector<8x16xf32>
    %63 = vector.extract_strided_slice %61 {offsets = [0, 16], sizes = [8, 16], strides = [1, 1]} : vector<8x256xf32> to vector<8x16xf32>
    %64 = arith.maximumf %62, %63 : vector<8x16xf32>
    %65 = vector.extract_strided_slice %61 {offsets = [0, 32], sizes = [8, 16], strides = [1, 1]} : vector<8x256xf32> to vector<8x16xf32>
    %66 = vector.extract_strided_slice %61 {offsets = [0, 48], sizes = [8, 16], strides = [1, 1]} : vector<8x256xf32> to vector<8x16xf32>
    %67 = arith.maximumf %65, %66 : vector<8x16xf32>
    %68 = vector.extract_strided_slice %61 {offsets = [0, 64], sizes = [8, 16], strides = [1, 1]} : vector<8x256xf32> to vector<8x16xf32>
    %69 = vector.extract_strided_slice %61 {offsets = [0, 80], sizes = [8, 16], strides = [1, 1]} : vector<8x256xf32> to vector<8x16xf32>
    %70 = arith.maximumf %68, %69 : vector<8x16xf32>
    %71 = vector.extract_strided_slice %61 {offsets = [0, 96], sizes = [8, 16], strides = [1, 1]} : vector<8x256xf32> to vector<8x16xf32>
    %72 = vector.extract_strided_slice %61 {offsets = [0, 112], sizes = [8, 16], strides = [1, 1]} : vector<8x256xf32> to vector<8x16xf32>
    %73 = arith.maximumf %71, %72 : vector<8x16xf32>
    %74 = vector.extract_strided_slice %61 {offsets = [0, 128], sizes = [8, 16], strides = [1, 1]} : vector<8x256xf32> to vector<8x16xf32>
    %75 = vector.extract_strided_slice %61 {offsets = [0, 144], sizes = [8, 16], strides = [1, 1]} : vector<8x256xf32> to vector<8x16xf32>
    %76 = arith.maximumf %74, %75 : vector<8x16xf32>
    %77 = vector.extract_strided_slice %61 {offsets = [0, 160], sizes = [8, 16], strides = [1, 1]} : vector<8x256xf32> to vector<8x16xf32>
    %78 = vector.extract_strided_slice %61 {offsets = [0, 176], sizes = [8, 16], strides = [1, 1]} : vector<8x256xf32> to vector<8x16xf32>
    %79 = arith.maximumf %77, %78 : vector<8x16xf32>
    %80 = vector.extract_strided_slice %61 {offsets = [0, 192], sizes = [8, 16], strides = [1, 1]} : vector<8x256xf32> to vector<8x16xf32>
    %81 = vector.extract_strided_slice %61 {offsets = [0, 208], sizes = [8, 16], strides = [1, 1]} : vector<8x256xf32> to vector<8x16xf32>
    %82 = arith.maximumf %80, %81 : vector<8x16xf32>
    %83 = vector.extract_strided_slice %61 {offsets = [0, 224], sizes = [8, 16], strides = [1, 1]} : vector<8x256xf32> to vector<8x16xf32>
    %84 = vector.extract_strided_slice %61 {offsets = [0, 240], sizes = [8, 16], strides = [1, 1]} : vector<8x256xf32> to vector<8x16xf32>
    %85 = arith.maximumf %83, %84 : vector<8x16xf32>
    %86 = tpu.concatenate %64, %67, %70, %73, %76, %79, %82, %85 in 1 : vector<8x16xf32>, vector<8x16xf32>, vector<8x16xf32>, vector<8x16xf32>, vector<8x16xf32>, vector<8x16xf32>, vector<8x16xf32>, vector<8x16xf32> -> vector<8x128xf32>
    %c1_44 = arith.constant 1 : index
    %c16 = arith.constant 16 : index
    %87 = vector.load %arg19[%c1_44, %c16] : memref<10x160xf32, #tpu.memory_space<vmem>>, vector<8x128xf32>
    tpu.vector_store %arg19[%c1_44, %c16], %86 {strides = array<i32>} : memref<10x160xf32, #tpu.memory_space<vmem>>, vector<8x128xf32>,
    %c0_45 = arith.constant 0 : index
    %c0_46 = arith.constant 0 : index
    %88 = vector.load %arg19[%c0_45, %c0_46] : memref<10x160xf32, #tpu.memory_space<vmem>>, vector<8x160xf32>
    %c0_47 = arith.constant 0 : index
    %c0_48 = arith.constant 0 : index
    %c0_49 = arith.constant 0 : index
    %89 = vector.load %arg5[%c0_47, %c0_48, %c0_49] : memref<3x160x256xf32, #tpu.memory_space<vmem>>, vector<1x160x256xf32>
    %90 = vector.shape_cast %89 : vector<1x160x256xf32> to vector<160x256xf32>
    %cst_50 = arith.constant dense<0.000000e+00> : vector<8x256xf32>
    %91 = tpu.matmul %88, %90, %cst_50 {dimension_numbers = #tpu.dot_dimension_numbers<[1], [0], [0], [1], [0, 0, 1, 1], [], []>} : vector<8x160xf32>, vector<160x256xf32>, vector<8x256xf32> -> vector<8x256xf32>
    %c1_51 = arith.constant 1 : index
    %c0_52 = arith.constant 0 : index
    %92 = vector.load %arg19[%c1_51, %c0_52] : memref<10x160xf32, #tpu.memory_space<vmem>>, vector<8x160xf32>
    %c1_53 = arith.constant 1 : index
    %c0_54 = arith.constant 0 : index
    %c0_55 = arith.constant 0 : index
    %93 = vector.load %arg5[%c1_53, %c0_54, %c0_55] : memref<3x160x256xf32, #tpu.memory_space<vmem>>, vector<1x160x256xf32>
    %94 = vector.shape_cast %93 : vector<1x160x256xf32> to vector<160x256xf32>
    %cst_56 = arith.constant dense<0.000000e+00> : vector<8x256xf32>
    %95 = tpu.matmul %92, %94, %cst_56 {dimension_numbers = #tpu.dot_dimension_numbers<[1], [0], [0], [1], [0, 0, 1, 1], [], []>} : vector<8x160xf32>, vector<160x256xf32>, vector<8x256xf32> -> vector<8x256xf32>
    %96 = arith.addf %91, %95 : vector<8x256xf32>
    %c2_57 = arith.constant 2 : index
    %c0_58 = arith.constant 0 : index
    %97 = vector.load %arg19[%c2_57, %c0_58] : memref<10x160xf32, #tpu.memory_space<vmem>>, vector<8x160xf32>
    %c2_59 = arith.constant 2 : index
    %c0_60 = arith.constant 0 : index
    %c0_61 = arith.constant 0 : index
    %98 = vector.load %arg5[%c2_59, %c0_60, %c0_61] : memref<3x160x256xf32, #tpu.memory_space<vmem>>, vector<1x160x256xf32>
    %99 = vector.shape_cast %98 : vector<1x160x256xf32> to vector<160x256xf32>
    %cst_62 = arith.constant dense<0.000000e+00> : vector<8x256xf32>
    %100 = tpu.matmul %97, %99, %cst_62 {dimension_numbers = #tpu.dot_dimension_numbers<[1], [0], [0], [1], [0, 0, 1, 1], [], []>} : vector<8x160xf32>, vector<160x256xf32>, vector<8x256xf32> -> vector<8x256xf32>
    %101 = arith.addf %96, %100 : vector<8x256xf32>
    %c0_63 = arith.constant 0 : index
    %c0_64 = arith.constant 0 : index
    %102 = vector.load %arg6[%c0_63, %c0_64] : memref<1x256xf32, #tpu.memory_space<vmem>>, vector<1x256xf32>
    %103 = vector.broadcast %102 : vector<1x256xf32> to vector<8x256xf32>
    %104 = arith.mulf %101, %103 : vector<8x256xf32>
    %c0_65 = arith.constant 0 : index
    %c0_66 = arith.constant 0 : index
    %105 = vector.load %arg7[%c0_65, %c0_66] : memref<1x256xf32, #tpu.memory_space<vmem>>, vector<1x256xf32>
    %106 = vector.broadcast %105 : vector<1x256xf32> to vector<8x256xf32>
    %107 = arith.addf %104, %106 : vector<8x256xf32>
    %cst_67 = arith.constant 0.000000e+00 : f32
    %108 = vector.broadcast %cst_67 : f32 to vector<8x256xf32>
    %109 = arith.maximumf %107, %108 : vector<8x256xf32>
    %110 = vector.extract_strided_slice %109 {offsets = [0, 0], sizes = [1, 256], strides = [1, 1]} : vector<8x256xf32> to vector<1x256xf32>
    %111 = vector.extract_strided_slice %109 {offsets = [1, 0], sizes = [1, 256], strides = [1, 1]} : vector<8x256xf32> to vector<1x256xf32>
    %112 = arith.maximumf %110, %111 : vector<1x256xf32>
    %113 = vector.extract_strided_slice %109 {offsets = [2, 0], sizes = [1, 256], strides = [1, 1]} : vector<8x256xf32> to vector<1x256xf32>
    %114 = vector.extract_strided_slice %109 {offsets = [3, 0], sizes = [1, 256], strides = [1, 1]} : vector<8x256xf32> to vector<1x256xf32>
    %115 = arith.maximumf %113, %114 : vector<1x256xf32>
    %116 = vector.extract_strided_slice %109 {offsets = [4, 0], sizes = [1, 256], strides = [1, 1]} : vector<8x256xf32> to vector<1x256xf32>
    %117 = vector.extract_strided_slice %109 {offsets = [5, 0], sizes = [1, 256], strides = [1, 1]} : vector<8x256xf32> to vector<1x256xf32>
    %118 = arith.maximumf %116, %117 : vector<1x256xf32>
    %119 = vector.extract_strided_slice %109 {offsets = [6, 0], sizes = [1, 256], strides = [1, 1]} : vector<8x256xf32> to vector<1x256xf32>
    %120 = vector.extract_strided_slice %109 {offsets = [7, 0], sizes = [1, 256], strides = [1, 1]} : vector<8x256xf32> to vector<1x256xf32>
    %121 = arith.maximumf %119, %120 : vector<1x256xf32>
    %122 = tpu.concatenate %112, %115, %118, %121 in 0 : vector<1x256xf32>, vector<1x256xf32>, vector<1x256xf32>, vector<1x256xf32> -> vector<4x256xf32>
    %123 = vector.extract_strided_slice %122 {offsets = [0, 0], sizes = [4, 32], strides = [1, 1]} : vector<4x256xf32> to vector<4x32xf32>
    %124 = vector.extract_strided_slice %122 {offsets = [0, 32], sizes = [4, 32], strides = [1, 1]} : vector<4x256xf32> to vector<4x32xf32>
    %125 = arith.maximumf %123, %124 : vector<4x32xf32>
    %126 = vector.extract_strided_slice %122 {offsets = [0, 64], sizes = [4, 32], strides = [1, 1]} : vector<4x256xf32> to vector<4x32xf32>
    %127 = vector.extract_strided_slice %122 {offsets = [0, 96], sizes = [4, 32], strides = [1, 1]} : vector<4x256xf32> to vector<4x32xf32>
    %128 = arith.maximumf %126, %127 : vector<4x32xf32>
    %129 = vector.extract_strided_slice %122 {offsets = [0, 128], sizes = [4, 32], strides = [1, 1]} : vector<4x256xf32> to vector<4x32xf32>
    %130 = vector.extract_strided_slice %122 {offsets = [0, 160], sizes = [4, 32], strides = [1, 1]} : vector<4x256xf32> to vector<4x32xf32>
    %131 = arith.maximumf %129, %130 : vector<4x32xf32>
    %132 = vector.extract_strided_slice %122 {offsets = [0, 192], sizes = [4, 32], strides = [1, 1]} : vector<4x256xf32> to vector<4x32xf32>
    %133 = vector.extract_strided_slice %122 {offsets = [0, 224], sizes = [4, 32], strides = [1, 1]} : vector<4x256xf32> to vector<4x32xf32>
    %134 = arith.maximumf %132, %133 : vector<4x32xf32>
    %135 = tpu.concatenate %125, %128, %131, %134 in 1 : vector<4x32xf32>, vector<4x32xf32>, vector<4x32xf32>, vector<4x32xf32> -> vector<4x128xf32>
    %c1_68 = arith.constant 1 : index
    %c32 = arith.constant 32 : index
    %136 = vector.load %arg20[%c1_68, %c32] : memref<6x192xf32, #tpu.memory_space<vmem>>, vector<4x128xf32>
    tpu.vector_store %arg20[%c1_68, %c32], %135 {strides = array<i32>} : memref<6x192xf32, #tpu.memory_space<vmem>>, vector<4x128xf32>,
    %c0_69 = arith.constant 0 : index
    %c0_70 = arith.constant 0 : index
    %137 = vector.load %arg20[%c0_69, %c0_70] : memref<6x192xf32, #tpu.memory_space<vmem>>, vector<4x192xf32>
    %c0_71 = arith.constant 0 : index
    %c0_72 = arith.constant 0 : index
    %c0_73 = arith.constant 0 : index
    %138 = vector.load %arg8[%c0_71, %c0_72, %c0_73] : memref<3x192x256xf32, #tpu.memory_space<vmem>>, vector<1x192x256xf32>
    %139 = vector.shape_cast %138 : vector<1x192x256xf32> to vector<192x256xf32>
    %cst_74 = arith.constant dense<0.000000e+00> : vector<4x256xf32>
    %140 = tpu.matmul %137, %139, %cst_74 {dimension_numbers = #tpu.dot_dimension_numbers<[1], [0], [0], [1], [0, 0, 1, 1], [], []>} : vector<4x192xf32>, vector<192x256xf32>, vector<4x256xf32> -> vector<4x256xf32>
    %c1_75 = arith.constant 1 : index
    %c0_76 = arith.constant 0 : index
    %141 = vector.load %arg20[%c1_75, %c0_76] : memref<6x192xf32, #tpu.memory_space<vmem>>, vector<4x192xf32>
    %c1_77 = arith.constant 1 : index
    %c0_78 = arith.constant 0 : index
    %c0_79 = arith.constant 0 : index
    %142 = vector.load %arg8[%c1_77, %c0_78, %c0_79] : memref<3x192x256xf32, #tpu.memory_space<vmem>>, vector<1x192x256xf32>
    %143 = vector.shape_cast %142 : vector<1x192x256xf32> to vector<192x256xf32>
    %cst_80 = arith.constant dense<0.000000e+00> : vector<4x256xf32>
    %144 = tpu.matmul %141, %143, %cst_80 {dimension_numbers = #tpu.dot_dimension_numbers<[1], [0], [0], [1], [0, 0, 1, 1], [], []>} : vector<4x192xf32>, vector<192x256xf32>, vector<4x256xf32> -> vector<4x256xf32>
    %145 = arith.addf %140, %144 : vector<4x256xf32>
    %c2_81 = arith.constant 2 : index
    %c0_82 = arith.constant 0 : index
    %146 = vector.load %arg20[%c2_81, %c0_82] : memref<6x192xf32, #tpu.memory_space<vmem>>, vector<4x192xf32>
    %c2_83 = arith.constant 2 : index
    %c0_84 = arith.constant 0 : index
    %c0_85 = arith.constant 0 : index
    %147 = vector.load %arg8[%c2_83, %c0_84, %c0_85] : memref<3x192x256xf32, #tpu.memory_space<vmem>>, vector<1x192x256xf32>
    %148 = vector.shape_cast %147 : vector<1x192x256xf32> to vector<192x256xf32>
    %cst_86 = arith.constant dense<0.000000e+00> : vector<4x256xf32>
    %149 = tpu.matmul %146, %148, %cst_86 {dimension_numbers = #tpu.dot_dimension_numbers<[1], [0], [0], [1], [0, 0, 1, 1], [], []>} : vector<4x192xf32>, vector<192x256xf32>, vector<4x256xf32> -> vector<4x256xf32>
    %150 = arith.addf %145, %149 : vector<4x256xf32>
    %c0_87 = arith.constant 0 : index
    %c0_88 = arith.constant 0 : index
    %151 = vector.load %arg9[%c0_87, %c0_88] : memref<1x256xf32, #tpu.memory_space<vmem>>, vector<1x256xf32>
    %152 = vector.broadcast %151 : vector<1x256xf32> to vector<4x256xf32>
    %153 = arith.mulf %150, %152 : vector<4x256xf32>
    %c0_89 = arith.constant 0 : index
    %c0_90 = arith.constant 0 : index
    %154 = vector.load %arg10[%c0_89, %c0_90] : memref<1x256xf32, #tpu.memory_space<vmem>>, vector<1x256xf32>
    %155 = vector.broadcast %154 : vector<1x256xf32> to vector<4x256xf32>
    %156 = arith.addf %153, %155 : vector<4x256xf32>
    %cst_91 = arith.constant 0.000000e+00 : f32
    %157 = vector.broadcast %cst_91 : f32 to vector<4x256xf32>
    %158 = arith.maximumf %156, %157 : vector<4x256xf32>
    %159 = vector.extract_strided_slice %158 {offsets = [0, 0], sizes = [1, 256], strides = [1, 1]} : vector<4x256xf32> to vector<1x256xf32>
    %160 = vector.extract_strided_slice %158 {offsets = [1, 0], sizes = [1, 256], strides = [1, 1]} : vector<4x256xf32> to vector<1x256xf32>
    %161 = arith.maximumf %159, %160 : vector<1x256xf32>
    %162 = vector.extract_strided_slice %158 {offsets = [2, 0], sizes = [1, 256], strides = [1, 1]} : vector<4x256xf32> to vector<1x256xf32>
    %163 = vector.extract_strided_slice %158 {offsets = [3, 0], sizes = [1, 256], strides = [1, 1]} : vector<4x256xf32> to vector<1x256xf32>
    %164 = arith.maximumf %162, %163 : vector<1x256xf32>
    %165 = tpu.concatenate %161, %164 in 0 : vector<1x256xf32>, vector<1x256xf32> -> vector<2x256xf32>
    %166 = vector.extract_strided_slice %165 {offsets = [0, 0], sizes = [2, 64], strides = [1, 1]} : vector<2x256xf32> to vector<2x64xf32>
    %167 = vector.extract_strided_slice %165 {offsets = [0, 64], sizes = [2, 64], strides = [1, 1]} : vector<2x256xf32> to vector<2x64xf32>
    %168 = arith.maximumf %166, %167 : vector<2x64xf32>
    %169 = vector.extract_strided_slice %165 {offsets = [0, 128], sizes = [2, 64], strides = [1, 1]} : vector<2x256xf32> to vector<2x64xf32>
    %170 = vector.extract_strided_slice %165 {offsets = [0, 192], sizes = [2, 64], strides = [1, 1]} : vector<2x256xf32> to vector<2x64xf32>
    %171 = arith.maximumf %169, %170 : vector<2x64xf32>
    %172 = tpu.concatenate %168, %171 in 1 : vector<2x64xf32>, vector<2x64xf32> -> vector<2x128xf32>
    %c0_92 = arith.constant 0 : index
    %c0_93 = arith.constant 0 : index
    %173 = vector.load %arg11[%c0_92, %c0_93] : memref<64x128xf32, #tpu.memory_space<vmem>>, vector<64x128xf32>
    %c0_94 = arith.constant 0 : index
    %c0_95 = arith.constant 0 : index
    %174 = vector.load %arg12[%c0_94, %c0_95] : memref<1x128xf32, #tpu.memory_space<vmem>>, vector<1x128xf32>
    %175 = vector.extract_strided_slice %172 {offsets = [0, 0], sizes = [2, 64], strides = [1, 1]} : vector<2x128xf32> to vector<2x64xf32>
    %cst_96 = arith.constant dense<0.000000e+00> : vector<2x128xf32>
    %176 = tpu.matmul %175, %173, %cst_96 {dimension_numbers = #tpu.dot_dimension_numbers<[1], [0], [0], [1], [0, 0, 1, 1], [], []>} : vector<2x64xf32>, vector<64x128xf32>, vector<2x128xf32> -> vector<2x128xf32>
    %177 = vector.broadcast %174 : vector<1x128xf32> to vector<2x128xf32>
    %178 = arith.addf %176, %177 : vector<2x128xf32>
    %cst_97 = arith.constant 0.000000e+00 : f32
    %179 = vector.broadcast %cst_97 : f32 to vector<2x128xf32>
    %180 = arith.maximumf %178, %179 : vector<2x128xf32>
    %181 = vector.extract_strided_slice %172 {offsets = [0, 64], sizes = [2, 64], strides = [1, 1]} : vector<2x128xf32> to vector<2x64xf32>
    %cst_98 = arith.constant dense<0.000000e+00> : vector<2x128xf32>
    %182 = tpu.matmul %181, %173, %cst_98 {dimension_numbers = #tpu.dot_dimension_numbers<[1], [0], [0], [1], [0, 0, 1, 1], [], []>} : vector<2x64xf32>, vector<64x128xf32>, vector<2x128xf32> -> vector<2x128xf32>
    %183 = vector.broadcast %174 : vector<1x128xf32> to vector<2x128xf32>
    %184 = arith.addf %182, %183 : vector<2x128xf32>
    %cst_99 = arith.constant 0.000000e+00 : f32
    %185 = vector.broadcast %cst_99 : f32 to vector<2x128xf32>
    %186 = arith.maximumf %184, %185 : vector<2x128xf32>
    %187 = vector.extract_strided_slice %180 {offsets = [0, 0], sizes = [2, 64], strides = [1, 1]} : vector<2x128xf32> to vector<2x64xf32>
    %188 = vector.extract_strided_slice %186 {offsets = [0, 0], sizes = [2, 64], strides = [1, 1]} : vector<2x128xf32> to vector<2x64xf32>
    %189 = tpu.concatenate %187, %188 in 1 : vector<2x64xf32>, vector<2x64xf32> -> vector<2x128xf32>
    %190 = vector.extract_strided_slice %180 {offsets = [0, 64], sizes = [2, 64], strides = [1, 1]} : vector<2x128xf32> to vector<2x64xf32>
    %191 = vector.extract_strided_slice %186 {offsets = [0, 64], sizes = [2, 64], strides = [1, 1]} : vector<2x128xf32> to vector<2x64xf32>
    %192 = tpu.concatenate %190, %191 in 1 : vector<2x64xf32>, vector<2x64xf32> -> vector<2x128xf32>
    %193 = vector.extract_strided_slice %189 {offsets = [0, 0], sizes = [1, 128], strides = [1, 1]} : vector<2x128xf32> to vector<1x128xf32>
    %194 = vector.extract_strided_slice %192 {offsets = [0, 0], sizes = [1, 128], strides = [1, 1]} : vector<2x128xf32> to vector<1x128xf32>
    %195 = vector.extract_strided_slice %189 {offsets = [1, 0], sizes = [1, 128], strides = [1, 1]} : vector<2x128xf32> to vector<1x128xf32>
    %196 = vector.extract_strided_slice %192 {offsets = [1, 0], sizes = [1, 128], strides = [1, 1]} : vector<2x128xf32> to vector<1x128xf32>
    %197 = tpu.concatenate %193, %194, %195, %196 in 0 : vector<1x128xf32>, vector<1x128xf32>, vector<1x128xf32>, vector<1x128xf32> -> vector<4x128xf32>
    %c0_100 = arith.constant 0 : index
    %c0_101 = arith.constant 0 : index
    %198 = vector.load %arg13[%c0_100, %c0_101] : memref<32x64xf32, #tpu.memory_space<vmem>>, vector<32x64xf32>
    %c0_102 = arith.constant 0 : index
    %c0_103 = arith.constant 0 : index
    %199 = vector.load %arg14[%c0_102, %c0_103] : memref<1x64xf32, #tpu.memory_space<vmem>>, vector<1x64xf32>
    %200 = vector.extract_strided_slice %197 {offsets = [0, 0], sizes = [4, 32], strides = [1, 1]} : vector<4x128xf32> to vector<4x32xf32>
    %cst_104 = arith.constant dense<0.000000e+00> : vector<4x64xf32>
    %201 = tpu.matmul %200, %198, %cst_104 {dimension_numbers = #tpu.dot_dimension_numbers<[1], [0], [0], [1], [0, 0, 1, 1], [], []>} : vector<4x32xf32>, vector<32x64xf32>, vector<4x64xf32> -> vector<4x64xf32>
    %202 = vector.broadcast %199 : vector<1x64xf32> to vector<4x64xf32>
    %203 = arith.addf %201, %202 : vector<4x64xf32>
    %cst_105 = arith.constant 0.000000e+00 : f32
    %204 = vector.broadcast %cst_105 : f32 to vector<4x64xf32>
    %205 = arith.maximumf %203, %204 : vector<4x64xf32>
    %206 = vector.extract_strided_slice %197 {offsets = [0, 32], sizes = [4, 32], strides = [1, 1]} : vector<4x128xf32> to vector<4x32xf32>
    %cst_106 = arith.constant dense<0.000000e+00> : vector<4x64xf32>
    %207 = tpu.matmul %206, %198, %cst_106 {dimension_numbers = #tpu.dot_dimension_numbers<[1], [0], [0], [1], [0, 0, 1, 1], [], []>} : vector<4x32xf32>, vector<32x64xf32>, vector<4x64xf32> -> vector<4x64xf32>
    %208 = vector.broadcast %199 : vector<1x64xf32> to vector<4x64xf32>
    %209 = arith.addf %207, %208 : vector<4x64xf32>
    %cst_107 = arith.constant 0.000000e+00 : f32
    %210 = vector.broadcast %cst_107 : f32 to vector<4x64xf32>
    %211 = arith.maximumf %209, %210 : vector<4x64xf32>
    %212 = vector.extract_strided_slice %197 {offsets = [0, 64], sizes = [4, 32], strides = [1, 1]} : vector<4x128xf32> to vector<4x32xf32>
    %cst_108 = arith.constant dense<0.000000e+00> : vector<4x64xf32>
    %213 = tpu.matmul %212, %198, %cst_108 {dimension_numbers = #tpu.dot_dimension_numbers<[1], [0], [0], [1], [0, 0, 1, 1], [], []>} : vector<4x32xf32>, vector<32x64xf32>, vector<4x64xf32> -> vector<4x64xf32>
    %214 = vector.broadcast %199 : vector<1x64xf32> to vector<4x64xf32>
    %215 = arith.addf %213, %214 : vector<4x64xf32>
    %cst_109 = arith.constant 0.000000e+00 : f32
    %216 = vector.broadcast %cst_109 : f32 to vector<4x64xf32>
    %217 = arith.maximumf %215, %216 : vector<4x64xf32>
    %218 = vector.extract_strided_slice %197 {offsets = [0, 96], sizes = [4, 32], strides = [1, 1]} : vector<4x128xf32> to vector<4x32xf32>
    %cst_110 = arith.constant dense<0.000000e+00> : vector<4x64xf32>
    %219 = tpu.matmul %218, %198, %cst_110 {dimension_numbers = #tpu.dot_dimension_numbers<[1], [0], [0], [1], [0, 0, 1, 1], [], []>} : vector<4x32xf32>, vector<32x64xf32>, vector<4x64xf32> -> vector<4x64xf32>
    %220 = vector.broadcast %199 : vector<1x64xf32> to vector<4x64xf32>
    %221 = arith.addf %219, %220 : vector<4x64xf32>
    %cst_111 = arith.constant 0.000000e+00 : f32
    %222 = vector.broadcast %cst_111 : f32 to vector<4x64xf32>
    %223 = arith.maximumf %221, %222 : vector<4x64xf32>
    %224 = vector.extract_strided_slice %205 {offsets = [0, 0], sizes = [4, 32], strides = [1, 1]} : vector<4x64xf32> to vector<4x32xf32>
    %225 = vector.extract_strided_slice %211 {offsets = [0, 0], sizes = [4, 32], strides = [1, 1]} : vector<4x64xf32> to vector<4x32xf32>
    %226 = vector.extract_strided_slice %217 {offsets = [0, 0], sizes = [4, 32], strides = [1, 1]} : vector<4x64xf32> to vector<4x32xf32>
    %227 = vector.extract_strided_slice %223 {offsets = [0, 0], sizes = [4, 32], strides = [1, 1]} : vector<4x64xf32> to vector<4x32xf32>
    %228 = tpu.concatenate %224, %225, %226, %227 in 1 : vector<4x32xf32>, vector<4x32xf32>, vector<4x32xf32>, vector<4x32xf32> -> vector<4x128xf32>
    %229 = vector.extract_strided_slice %205 {offsets = [0, 32], sizes = [4, 32], strides = [1, 1]} : vector<4x64xf32> to vector<4x32xf32>
    %230 = vector.extract_strided_slice %211 {offsets = [0, 32], sizes = [4, 32], strides = [1, 1]} : vector<4x64xf32> to vector<4x32xf32>
    %231 = vector.extract_strided_slice %217 {offsets = [0, 32], sizes = [4, 32], strides = [1, 1]} : vector<4x64xf32> to vector<4x32xf32>
    %232 = vector.extract_strided_slice %223 {offsets = [0, 32], sizes = [4, 32], strides = [1, 1]} : vector<4x64xf32> to vector<4x32xf32>
    %233 = tpu.concatenate %229, %230, %231, %232 in 1 : vector<4x32xf32>, vector<4x32xf32>, vector<4x32xf32>, vector<4x32xf32> -> vector<4x128xf32>
    %234 = vector.extract_strided_slice %228 {offsets = [0, 0], sizes = [1, 128], strides = [1, 1]} : vector<4x128xf32> to vector<1x128xf32>
    %235 = vector.extract_strided_slice %233 {offsets = [0, 0], sizes = [1, 128], strides = [1, 1]} : vector<4x128xf32> to vector<1x128xf32>
    %236 = vector.extract_strided_slice %228 {offsets = [1, 0], sizes = [1, 128], strides = [1, 1]} : vector<4x128xf32> to vector<1x128xf32>
    %237 = vector.extract_strided_slice %233 {offsets = [1, 0], sizes = [1, 128], strides = [1, 1]} : vector<4x128xf32> to vector<1x128xf32>
    %238 = vector.extract_strided_slice %228 {offsets = [2, 0], sizes = [1, 128], strides = [1, 1]} : vector<4x128xf32> to vector<1x128xf32>
    %239 = vector.extract_strided_slice %233 {offsets = [2, 0], sizes = [1, 128], strides = [1, 1]} : vector<4x128xf32> to vector<1x128xf32>
    %240 = vector.extract_strided_slice %228 {offsets = [3, 0], sizes = [1, 128], strides = [1, 1]} : vector<4x128xf32> to vector<1x128xf32>
    %241 = vector.extract_strided_slice %233 {offsets = [3, 0], sizes = [1, 128], strides = [1, 1]} : vector<4x128xf32> to vector<1x128xf32>
    %242 = tpu.concatenate %234, %235, %236, %237, %238, %239, %240, %241 in 0 : vector<1x128xf32>, vector<1x128xf32>, vector<1x128xf32>, vector<1x128xf32>, vector<1x128xf32>, vector<1x128xf32>, vector<1x128xf32>, vector<1x128xf32> -> vector<8x128xf32>
    %c0_112 = arith.constant 0 : index
    %c0_113 = arith.constant 0 : index
    %243 = vector.load %arg15[%c0_112, %c0_113] : memref<16x32xf32, #tpu.memory_space<vmem>>, vector<16x32xf32>
    %c0_114 = arith.constant 0 : index
    %c0_115 = arith.constant 0 : index
    %244 = vector.load %arg16[%c0_114, %c0_115] : memref<1x32xf32, #tpu.memory_space<vmem>>, vector<1x32xf32>
    %245 = vector.extract_strided_slice %242 {offsets = [0, 0], sizes = [8, 16], strides = [1, 1]} : vector<8x128xf32> to vector<8x16xf32>
    %cst_116 = arith.constant dense<0.000000e+00> : vector<8x32xf32>
    %246 = tpu.matmul %245, %243, %cst_116 {dimension_numbers = #tpu.dot_dimension_numbers<[1], [0], [0], [1], [0, 0, 1, 1], [], []>} : vector<8x16xf32>, vector<16x32xf32>, vector<8x32xf32> -> vector<8x32xf32>
    %247 = vector.broadcast %244 : vector<1x32xf32> to vector<8x32xf32>
    %248 = arith.addf %246, %247 : vector<8x32xf32>
    %249 = vector.extract_strided_slice %242 {offsets = [0, 16], sizes = [8, 16], strides = [1, 1]} : vector<8x128xf32> to vector<8x16xf32>
    %cst_117 = arith.constant dense<0.000000e+00> : vector<8x32xf32>
    %250 = tpu.matmul %249, %243, %cst_117 {dimension_numbers = #tpu.dot_dimension_numbers<[1], [0], [0], [1], [0, 0, 1, 1], [], []>} : vector<8x16xf32>, vector<16x32xf32>, vector<8x32xf32> -> vector<8x32xf32>
    %251 = vector.broadcast %244 : vector<1x32xf32> to vector<8x32xf32>
    %252 = arith.addf %250, %251 : vector<8x32xf32>
    %253 = vector.extract_strided_slice %242 {offsets = [0, 32], sizes = [8, 16], strides = [1, 1]} : vector<8x128xf32> to vector<8x16xf32>
    %cst_118 = arith.constant dense<0.000000e+00> : vector<8x32xf32>
    %254 = tpu.matmul %253, %243, %cst_118 {dimension_numbers = #tpu.dot_dimension_numbers<[1], [0], [0], [1], [0, 0, 1, 1], [], []>} : vector<8x16xf32>, vector<16x32xf32>, vector<8x32xf32> -> vector<8x32xf32>
    %255 = vector.broadcast %244 : vector<1x32xf32> to vector<8x32xf32>
    %256 = arith.addf %254, %255 : vector<8x32xf32>
    %257 = vector.extract_strided_slice %242 {offsets = [0, 48], sizes = [8, 16], strides = [1, 1]} : vector<8x128xf32> to vector<8x16xf32>
    %cst_119 = arith.constant dense<0.000000e+00> : vector<8x32xf32>
    %258 = tpu.matmul %257, %243, %cst_119 {dimension_numbers = #tpu.dot_dimension_numbers<[1], [0], [0], [1], [0, 0, 1, 1], [], []>} : vector<8x16xf32>, vector<16x32xf32>, vector<8x32xf32> -> vector<8x32xf32>
    %259 = vector.broadcast %244 : vector<1x32xf32> to vector<8x32xf32>
    %260 = arith.addf %258, %259 : vector<8x32xf32>
    %261 = vector.extract_strided_slice %242 {offsets = [0, 64], sizes = [8, 16], strides = [1, 1]} : vector<8x128xf32> to vector<8x16xf32>
    %cst_120 = arith.constant dense<0.000000e+00> : vector<8x32xf32>
    %262 = tpu.matmul %261, %243, %cst_120 {dimension_numbers = #tpu.dot_dimension_numbers<[1], [0], [0], [1], [0, 0, 1, 1], [], []>} : vector<8x16xf32>, vector<16x32xf32>, vector<8x32xf32> -> vector<8x32xf32>
    %263 = vector.broadcast %244 : vector<1x32xf32> to vector<8x32xf32>
    %264 = arith.addf %262, %263 : vector<8x32xf32>
    %265 = vector.extract_strided_slice %242 {offsets = [0, 80], sizes = [8, 16], strides = [1, 1]} : vector<8x128xf32> to vector<8x16xf32>
    %cst_121 = arith.constant dense<0.000000e+00> : vector<8x32xf32>
    %266 = tpu.matmul %265, %243, %cst_121 {dimension_numbers = #tpu.dot_dimension_numbers<[1], [0], [0], [1], [0, 0, 1, 1], [], []>} : vector<8x16xf32>, vector<16x32xf32>, vector<8x32xf32> -> vector<8x32xf32>
    %267 = vector.broadcast %244 : vector<1x32xf32> to vector<8x32xf32>
    %268 = arith.addf %266, %267 : vector<8x32xf32>
    %269 = vector.extract_strided_slice %242 {offsets = [0, 96], sizes = [8, 16], strides = [1, 1]} : vector<8x128xf32> to vector<8x16xf32>
    %cst_122 = arith.constant dense<0.000000e+00> : vector<8x32xf32>
    %270 = tpu.matmul %269, %243, %cst_122 {dimension_numbers = #tpu.dot_dimension_numbers<[1], [0], [0], [1], [0, 0, 1, 1], [], []>} : vector<8x16xf32>, vector<16x32xf32>, vector<8x32xf32> -> vector<8x32xf32>
    %271 = vector.broadcast %244 : vector<1x32xf32> to vector<8x32xf32>
    %272 = arith.addf %270, %271 : vector<8x32xf32>
    %273 = vector.extract_strided_slice %242 {offsets = [0, 112], sizes = [8, 16], strides = [1, 1]} : vector<8x128xf32> to vector<8x16xf32>
    %cst_123 = arith.constant dense<0.000000e+00> : vector<8x32xf32>
    %274 = tpu.matmul %273, %243, %cst_123 {dimension_numbers = #tpu.dot_dimension_numbers<[1], [0], [0], [1], [0, 0, 1, 1], [], []>} : vector<8x16xf32>, vector<16x32xf32>, vector<8x32xf32> -> vector<8x32xf32>
    %275 = vector.broadcast %244 : vector<1x32xf32> to vector<8x32xf32>
    %276 = arith.addf %274, %275 : vector<8x32xf32>
    %277 = vector.extract_strided_slice %248 {offsets = [0, 0], sizes = [8, 16], strides = [1, 1]} : vector<8x32xf32> to vector<8x16xf32>
    %278 = vector.extract_strided_slice %252 {offsets = [0, 0], sizes = [8, 16], strides = [1, 1]} : vector<8x32xf32> to vector<8x16xf32>
    %279 = vector.extract_strided_slice %256 {offsets = [0, 0], sizes = [8, 16], strides = [1, 1]} : vector<8x32xf32> to vector<8x16xf32>
    %280 = vector.extract_strided_slice %260 {offsets = [0, 0], sizes = [8, 16], strides = [1, 1]} : vector<8x32xf32> to vector<8x16xf32>
    %281 = vector.extract_strided_slice %264 {offsets = [0, 0], sizes = [8, 16], strides = [1, 1]} : vector<8x32xf32> to vector<8x16xf32>
    %282 = vector.extract_strided_slice %268 {offsets = [0, 0], sizes = [8, 16], strides = [1, 1]} : vector<8x32xf32> to vector<8x16xf32>
    %283 = vector.extract_strided_slice %272 {offsets = [0, 0], sizes = [8, 16], strides = [1, 1]} : vector<8x32xf32> to vector<8x16xf32>
    %284 = vector.extract_strided_slice %276 {offsets = [0, 0], sizes = [8, 16], strides = [1, 1]} : vector<8x32xf32> to vector<8x16xf32>
    %285 = tpu.concatenate %277, %278, %279, %280, %281, %282, %283, %284 in 1 : vector<8x16xf32>, vector<8x16xf32>, vector<8x16xf32>, vector<8x16xf32>, vector<8x16xf32>, vector<8x16xf32>, vector<8x16xf32>, vector<8x16xf32> -> vector<8x128xf32>
    %286 = vector.extract_strided_slice %248 {offsets = [0, 16], sizes = [8, 16], strides = [1, 1]} : vector<8x32xf32> to vector<8x16xf32>
    %287 = vector.extract_strided_slice %252 {offsets = [0, 16], sizes = [8, 16], strides = [1, 1]} : vector<8x32xf32> to vector<8x16xf32>
    %288 = vector.extract_strided_slice %256 {offsets = [0, 16], sizes = [8, 16], strides = [1, 1]} : vector<8x32xf32> to vector<8x16xf32>
    %289 = vector.extract_strided_slice %260 {offsets = [0, 16], sizes = [8, 16], strides = [1, 1]} : vector<8x32xf32> to vector<8x16xf32>
    %290 = vector.extract_strided_slice %264 {offsets = [0, 16], sizes = [8, 16], strides = [1, 1]} : vector<8x32xf32> to vector<8x16xf32>
    %291 = vector.extract_strided_slice %268 {offsets = [0, 16], sizes = [8, 16], strides = [1, 1]} : vector<8x32xf32> to vector<8x16xf32>
    %292 = vector.extract_strided_slice %272 {offsets = [0, 16], sizes = [8, 16], strides = [1, 1]} : vector<8x32xf32> to vector<8x16xf32>
    %293 = vector.extract_strided_slice %276 {offsets = [0, 16], sizes = [8, 16], strides = [1, 1]} : vector<8x32xf32> to vector<8x16xf32>
    %294 = tpu.concatenate %286, %287, %288, %289, %290, %291, %292, %293 in 1 : vector<8x16xf32>, vector<8x16xf32>, vector<8x16xf32>, vector<8x16xf32>, vector<8x16xf32>, vector<8x16xf32>, vector<8x16xf32>, vector<8x16xf32> -> vector<8x128xf32>
    %295 = vector.extract_strided_slice %285 {offsets = [0, 0], sizes = [1, 128], strides = [1, 1]} : vector<8x128xf32> to vector<1x128xf32>
    %296 = vector.extract_strided_slice %294 {offsets = [0, 0], sizes = [1, 128], strides = [1, 1]} : vector<8x128xf32> to vector<1x128xf32>
    %297 = vector.extract_strided_slice %285 {offsets = [1, 0], sizes = [1, 128], strides = [1, 1]} : vector<8x128xf32> to vector<1x128xf32>
    %298 = vector.extract_strided_slice %294 {offsets = [1, 0], sizes = [1, 128], strides = [1, 1]} : vector<8x128xf32> to vector<1x128xf32>
    %299 = vector.extract_strided_slice %285 {offsets = [2, 0], sizes = [1, 128], strides = [1, 1]} : vector<8x128xf32> to vector<1x128xf32>
    %300 = vector.extract_strided_slice %294 {offsets = [2, 0], sizes = [1, 128], strides = [1, 1]} : vector<8x128xf32> to vector<1x128xf32>
    %301 = vector.extract_strided_slice %285 {offsets = [3, 0], sizes = [1, 128], strides = [1, 1]} : vector<8x128xf32> to vector<1x128xf32>
    %302 = vector.extract_strided_slice %294 {offsets = [3, 0], sizes = [1, 128], strides = [1, 1]} : vector<8x128xf32> to vector<1x128xf32>
    %303 = vector.extract_strided_slice %285 {offsets = [4, 0], sizes = [1, 128], strides = [1, 1]} : vector<8x128xf32> to vector<1x128xf32>
    %304 = vector.extract_strided_slice %294 {offsets = [4, 0], sizes = [1, 128], strides = [1, 1]} : vector<8x128xf32> to vector<1x128xf32>
    %305 = vector.extract_strided_slice %285 {offsets = [5, 0], sizes = [1, 128], strides = [1, 1]} : vector<8x128xf32> to vector<1x128xf32>
    %306 = vector.extract_strided_slice %294 {offsets = [5, 0], sizes = [1, 128], strides = [1, 1]} : vector<8x128xf32> to vector<1x128xf32>
    %307 = vector.extract_strided_slice %285 {offsets = [6, 0], sizes = [1, 128], strides = [1, 1]} : vector<8x128xf32> to vector<1x128xf32>
    %308 = vector.extract_strided_slice %294 {offsets = [6, 0], sizes = [1, 128], strides = [1, 1]} : vector<8x128xf32> to vector<1x128xf32>
    %309 = vector.extract_strided_slice %285 {offsets = [7, 0], sizes = [1, 128], strides = [1, 1]} : vector<8x128xf32> to vector<1x128xf32>
    %310 = vector.extract_strided_slice %294 {offsets = [7, 0], sizes = [1, 128], strides = [1, 1]} : vector<8x128xf32> to vector<1x128xf32>
    %311 = tpu.concatenate %295, %296, %297, %298, %299, %300, %301, %302, %303, %304, %305, %306, %307, %308, %309, %310 in 0 : vector<1x128xf32>, vector<1x128xf32>, vector<1x128xf32>, vector<1x128xf32>, vector<1x128xf32>, vector<1x128xf32>, vector<1x128xf32>, vector<1x128xf32>, vector<1x128xf32>, vector<1x128xf32>, vector<1x128xf32>, vector<1x128xf32>, vector<1x128xf32>, vector<1x128xf32>, vector<1x128xf32>, vector<1x128xf32> -> vector<16x128xf32>
    %c0_124 = arith.constant 0 : index
    %c0_125 = arith.constant 0 : index
    %c0_126 = arith.constant 0 : index
    %312 = vector.load %arg17[%c0_124, %c0_125, %c0_126] : memref<1x16x128xf32, #tpu.memory_space<vmem>>, vector<1x16x128xf32>
    %313 = vector.shape_cast %312 : vector<1x16x128xf32> to vector<16x128xf32>
    %314 = vector.shape_cast %311 : vector<16x128xf32> to vector<1x16x128xf32>
    tpu.vector_store %arg17[%c0_124, %c0_125, %c0_126], %314 {strides = array<i32>} : memref<1x16x128xf32, #tpu.memory_space<vmem>>, vector<1x16x128xf32>,
    return
  }
  func.func @transform_0(%arg0: i32) -> (i32, i32, i32, i32) {
    %c0_i32 = arith.constant 0 : i32
    %c0_i32_0 = arith.constant 0 : i32
    %c0_i32_1 = arith.constant 0 : i32
    %c0_i32_2 = arith.constant 0 : i32
    return %arg0, %c0_i32, %c0_i32_0, %c0_i32_1 : i32, i32, i32, i32
  }
  func.func @transform_1(%arg0: i32) -> (i32, i32, i32) {
    %c0_i32 = arith.constant 0 : i32
    %c0_i32_0 = arith.constant 0 : i32
    %c0_i32_1 = arith.constant 0 : i32
    %c0_i32_2 = arith.constant 0 : i32
    return %c0_i32, %c0_i32_0, %c0_i32_1 : i32, i32, i32
  }
  func.func @transform_2(%arg0: i32) -> (i32, i32) {
    %c0_i32 = arith.constant 0 : i32
    %c0_i32_0 = arith.constant 0 : i32
    %c0_i32_1 = arith.constant 0 : i32
    return %c0_i32, %c0_i32_0 : i32, i32
  }
  func.func @transform_3(%arg0: i32) -> (i32, i32) {
    %c0_i32 = arith.constant 0 : i32
    %c0_i32_0 = arith.constant 0 : i32
    %c0_i32_1 = arith.constant 0 : i32
    return %c0_i32, %c0_i32_0 : i32, i32
  }
  func.func @transform_4(%arg0: i32) -> (i32, i32, i32) {
    %c0_i32 = arith.constant 0 : i32
    %c0_i32_0 = arith.constant 0 : i32
    %c0_i32_1 = arith.constant 0 : i32
    %c0_i32_2 = arith.constant 0 : i32
    return %c0_i32, %c0_i32_0, %c0_i32_1 : i32, i32, i32
  }
  func.func @transform_5(%arg0: i32) -> (i32, i32) {
    %c0_i32 = arith.constant 0 : i32
    %c0_i32_0 = arith.constant 0 : i32
    %c0_i32_1 = arith.constant 0 : i32
    return %c0_i32, %c0_i32_0 : i32, i32
  }
  func.func @transform_6(%arg0: i32) -> (i32, i32) {
    %c0_i32 = arith.constant 0 : i32
    %c0_i32_0 = arith.constant 0 : i32
    %c0_i32_1 = arith.constant 0 : i32
    return %c0_i32, %c0_i32_0 : i32, i32
  }
  func.func @transform_7(%arg0: i32) -> (i32, i32, i32) {
    %c0_i32 = arith.constant 0 : i32
    %c0_i32_0 = arith.constant 0 : i32
    %c0_i32_1 = arith.constant 0 : i32
    %c0_i32_2 = arith.constant 0 : i32
    return %c0_i32, %c0_i32_0, %c0_i32_1 : i32, i32, i32
  }
  func.func @transform_8(%arg0: i32) -> (i32, i32) {
    %c0_i32 = arith.constant 0 : i32
    %c0_i32_0 = arith.constant 0 : i32
    %c0_i32_1 = arith.constant 0 : i32
    return %c0_i32, %c0_i32_0 : i32, i32
  }
  func.func @transform_9(%arg0: i32) -> (i32, i32) {
    %c0_i32 = arith.constant 0 : i32
    %c0_i32_0 = arith.constant 0 : i32
    %c0_i32_1 = arith.constant 0 : i32
    return %c0_i32, %c0_i32_0 : i32, i32
  }
  func.func @transform_10(%arg0: i32) -> (i32, i32) {
    %c0_i32 = arith.constant 0 : i32
    %c0_i32_0 = arith.constant 0 : i32
    %c0_i32_1 = arith.constant 0 : i32
    return %c0_i32, %c0_i32_0 : i32, i32
  }
  func.func @transform_11(%arg0: i32) -> (i32, i32) {
    %c0_i32 = arith.constant 0 : i32
    %c0_i32_0 = arith.constant 0 : i32
    %c0_i32_1 = arith.constant 0 : i32
    return %c0_i32, %c0_i32_0 : i32, i32
  }
  func.func @transform_12(%arg0: i32) -> (i32, i32) {
    %c0_i32 = arith.constant 0 : i32
    %c0_i32_0 = arith.constant 0 : i32
    %c0_i32_1 = arith.constant 0 : i32
    return %c0_i32, %c0_i32_0 : i32, i32
  }
  func.func @transform_13(%arg0: i32) -> (i32, i32) {
    %c0_i32 = arith.constant 0 : i32
    %c0_i32_0 = arith.constant 0 : i32
    %c0_i32_1 = arith.constant 0 : i32
    return %c0_i32, %c0_i32_0 : i32, i32
  }
  func.func @transform_14(%arg0: i32) -> (i32, i32) {
    %c0_i32 = arith.constant 0 : i32
    %c0_i32_0 = arith.constant 0 : i32
    %c0_i32_1 = arith.constant 0 : i32
    return %c0_i32, %c0_i32_0 : i32, i32
  }
  func.func @transform_15(%arg0: i32) -> (i32, i32) {
    %c0_i32 = arith.constant 0 : i32
    %c0_i32_0 = arith.constant 0 : i32
    %c0_i32_1 = arith.constant 0 : i32
    return %c0_i32, %c0_i32_0 : i32, i32
  }
  func.func @transform_16(%arg0: i32) -> (i32, i32, i32) {
    %c0_i32 = arith.constant 0 : i32
    %c0_i32_0 = arith.constant 0 : i32
    %c0_i32_1 = arith.constant 0 : i32
    return %arg0, %c0_i32, %c0_i32_0 : i32, i32, i32
  }
}

</mosaic_0001>

<bundles_post_ra>
// kernel: fo_intern_net_forward.1
= control target key start
LH: loop header
LB: loop body
LE: loop exit
PB: predicated region body
PF: predicated region fallthrough
CT: control target
= control target key end

     0   :  { %s4874_s0 = inlined_call_operand.hbm [shape: f32[2,3,16,16], index: 0, kind: input, shape index: {}]   ;;  %s4875_s1 = inlined_call_operand.hbm [shape: f32[3,54,256], index: 1, kind: input, shape index: {}]   ;;  %s4876_s2 = inlined_call_operand.vmem [shape: f32[1,256], index: 2, kind: input, shape index: {}]   ;;  %s4877_s3 = inlined_call_operand.vmem [shape: f32[1,256], index: 3, kind: input, shape index: {}]   ;;  %s4878_s4 = inlined_call_operand.hbm [shape: f32[3,160,256], index: 4, kind: input, shape index: {}]   ;;  %s4879_s5 = inlined_call_operand.vmem [shape: f32[1,256], index: 5, kind: input, shape index: {}]   ;;  %s4880_s6 = inlined_call_operand.vmem [shape: f32[1,256], index: 6, kind: input, shape index: {}]   ;;  %s4881_s7 = inlined_call_operand.hbm [shape: f32[3,192,256], index: 7, kind: input, shape index: {}]   ;;  %s4882_s8 = inlined_call_operand.hbm [shape: f32[1,256], index: 8, kind: input, shape index: {}]   ;;  %s4883_s9 = inlined_call_operand.hbm [shape: f32[1,256], index: 9, kind: input, shape index: {}]   ;;  %s4884_s10 = inlined_call_operand.hbm [shape: f32[64,128], index: 10, kind: input, shape index: {}]   ;;  %s4885_s11 = inlined_call_operand.vmem [shape: f32[1,128], index: 11, kind: input, shape index: {}]   ;;  %s4886_s12 = inlined_call_operand.hbm [shape: f32[32,64], index: 12, kind: input, shape index: {}]   ;;  %s4887_s13 = inlined_call_operand.hbm [shape: f32[1,64], index: 13, kind: input, shape index: {}]   ;;  %s4888_s14 = inlined_call_operand.vmem [shape: f32[16,32], index: 14, kind: input, shape index: {}]   ;;  %s4889_s15 = inlined_call_operand.vmem [shape: f32[1,32], index: 15, kind: input, shape index: {}]   ;;  %s4890_s16 = inlined_call_operand.vmem [shape: f32[2,16,128], index: 16, kind: output, shape index: {}]  }
   0x1   :  { %4903 = sst [smem:[#allocation24_spill]] %s4874_s0 }
   0x2   :  { %4904 = sst [smem:[#allocation25_spill]] %s4875_s1 }
   0x3   :  { %4905 = sst [smem:[#allocation26_spill]] %s4878_s4 }
   0x4   :  { %4906 = sst [smem:[#allocation27_spill]] %s4881_s7 }
   0x5   :  { %4907 = sst [smem:[#allocation28_spill]] %s4882_s8 }
   0x6   :  { %4908 = sst [smem:[#allocation29_spill]] %s4883_s9 }
   0x7   :  { %4909 = sst [smem:[#allocation30_spill]] %s4884_s10 }
   0x8   :  { %4910 = sst [smem:[#allocation31_spill]] %s4889_s15 }
   0x9   :  { %4911 = sst [smem:[#allocation32_spill]] %s4890_s16 }
   0xa   :  { %21 = vsyncpa [#allocation6], 0 }
   0xb   :  { %23 = vsyncpa [#allocation6 + $0x1], 0 }
   0xc   :  { %24 = vsyncpa [#allocation8], 0 }
   0xd   :  { %25 = vsyncpa [#allocation11], 0 }
   0xe   :  { %26 = vsyncpa [#allocation14], 0 }
   0xf   :  { %27 = vsyncpa [#allocation17], 0  ;;  %s4305_s21 = smov 0   ;;  %s4307_s22 = smov 0  }
  0x10   :  { %s4309_s23 = smov 0   ;;  %s4311_s24 = smov 0  }
  0x11 LB: > { %s4195_s25 = smov [#allocation7]   ;;  %s4326_s27 = sadd.s32 4294967295, %s4193_s24   ;;  %s4193_s24 = sphi %s4311_s24, %s4948_s24   ;;  %s4189_s23 = sphi %s4309_s23, %s4947_s23   ;;  %s4185_s22 = sphi %s4307_s22, %s4946_s22   ;;  %s4181_s21 = sphi %s4305_s21, %s4945_s21  }
  0x12   : > { %s417_s26 = sshll.u32 %s4195_s25, 4  ;;  %p3504_p0 = scmp.ge.s32.totalorder %s4193_s24, 1  ;;  %s418_s26 = int_to_ptr.vmem [resolvable:$true] %s417_s26 }
  0x13   : > { %p4898_p1 = scmp.eq.s32.totalorder %s4326_s27, 0  ;;  %p405_p2 = scmp.lt.s32.totalorder %s4193_s24, 3 }
  0x14   : > { %s4196_s29 = smov [#allocation10]   ;;  %s4197_s17 = smov [#allocation13]  }
  0x15   : > { %p4331_p3 = pnand %p3504_p0, %p405_p2  ;;  %s455_s30 = sshll.u32 %s4196_s29, 4  ;;  %s4343_s30 = int_to_ptr.vmem [resolvable:$true] %s455_s30 }
  0x16   : > { %s480_s18 = sshll.u32 %s4197_s17, 4  ;;  %s3918_s20 = scalar_lea.vmem %s418_s26, 5376  ;;  %s4345_s18 = int_to_ptr.vmem [resolvable:$true] %s480_s18 }
  0x17   : > { %s4912_s28 = scalar_select %p4331_p3, 1, 0 }
  0x18   : > { %p3805_p4 = pneg %p4331_p3  ;;  %p3919_p7 = scmp.ne.s32.totalorder %s418_s26, %s3918_s20 }
  0x19   : > { %p3926_p10 = scmp.lt.s32.totalorder %s418_s26, %s418_s26  ;;  %p3927_p11 = scmp.lt.s32.totalorder %s3918_s20, %s3918_s20 }
  0x1a   : > { %p4339_p5 = pnand %p3805_p4, %p4898_p1 }
  0x1b   : > { %p3928_p12 = por %p3927_p11, %p3926_p10 }
  0x1c   : > { %p4349_p6 = pneg %p4339_p5 }
  0x1e   : > { %p3921_p8 = pnand %p3919_p7, %p4349_p6 }
  0x20   : > { %p3922_p9 = pneg %p3921_p8 }
  0x22   : > { %p3929_p13 = pnand %p3928_p12, %p3922_p9 }
  0x24   : > { %3932 = shalt.err (!%p3929_p13)
}
  0x25   : > { %s4892_s25 = smov 256   ;;  %s4893_s29 = smov 16  }
  0x26   : > { %s4915_s1 = sld [smem:[#allocation25_spill]]  ;;  %s3944_s15 = scalar_lea.vmem %s4343_s30, 18432 }
  0x27   : > { %p3945_p0 = scmp.ne.s32.totalorder %s4343_s30, %s3944_s15  ;;  %p3952_p7 = scmp.lt.s32.totalorder %s4343_s30, %s4343_s30 }
  0x28   : > { %p3953_p8 = scmp.lt.s32.totalorder %s3944_s15, %s3944_s15 }
  0x29   : > { %p3947_p2 = pnand %p3945_p0, %p4349_p6 }
  0x2a   : > { %p3954_p9 = por %p3953_p8, %p3952_p7 }
  0x2b   : > { %p3948_p4 = pneg %p3947_p2 }
  0x2c   : > { %3808 = dma.hbm_to_vmem [thread:$0]  (!%p4339_p5), %s4915_s1, 5376, %s418_s26, [#allocation8], %s4892_s25, %s4892_s25, %s4893_s29  }
  0x2d   : > { %p3955_p10 = pnand %p3954_p9, %p3948_p4 }
  0x2f   : > { %3958 = shalt.err (!%p3955_p10)
}
  0x30   : > { %s4916_s7 = sld [smem:[#allocation27_spill]]  ;;  %s3970_s26 = scalar_lea.vmem %s4345_s18, 32 }
  0x31   : > { %p3971_p11 = scmp.ne.s32.totalorder %s4345_s18, %s3970_s26  ;;  %p3978_p0 = scmp.lt.s32.totalorder %s4345_s18, %s4345_s18 }
  0x32   : > { %p3979_p2 = scmp.lt.s32.totalorder %s3970_s26, %s3970_s26 }
  0x33   : > { %p3973_p12 = pnand %p3971_p11, %p4349_p6 }
  0x34   : > { %p3980_p4 = por %p3979_p2, %p3978_p0 }
  0x35   : > { %p3974_p13 = pneg %p3973_p12 }
  0x36   : > { %3814 = dma.hbm_to_vmem [thread:$0]  (!%p4339_p5), %s4916_s7, 18432, %s4343_s30, [#allocation11], %s4892_s25, %s4892_s25, %s4893_s29  }
  0x37   : > { %p3981_p7 = pnand %p3980_p4, %p3974_p13 }
  0x39   : > { %3984 = shalt.err (!%p3981_p7)
}
  0x3a   : > { %s4917_s9 = sld [smem:[#allocation29_spill]]  ;;  %s4200_s30 = smov [#allocation16]  }
  0x3b   : > { %s506_s20 = sshll.u32 %s4200_s30, 4  ;;  %s4201_s16 = smov [#allocation9]   ;;  %s507_s20 = int_to_ptr.vmem [resolvable:$true] %s506_s20 }
  0x3c   : > { %s436_s25 = sshll.u32 %s4201_s16, 4  ;;  %s3996_s29 = scalar_lea.vmem %s507_s20, 512  ;;  %s437_s25 = int_to_ptr.vmem [resolvable:$true] %s436_s25 }
  0x3d   : > { %p3997_p8 = scmp.ne.s32.totalorder %s507_s20, %s3996_s29  ;;  %p4004_p11 = scmp.lt.s32.totalorder %s507_s20, %s507_s20 }
  0x3e   : > { %p4005_p12 = scmp.lt.s32.totalorder %s3996_s29, %s3996_s29 }
  0x3f   : > { %p3999_p9 = pnand %p3997_p8, %p4349_p6 }
  0x40   : > { %3820 = dma.hbm_to_vmem [thread:$0]  (!%p4339_p5), %s4917_s9, 32, %s4345_s18, [#allocation14]  }
  0x41   : > { %p4000_p10 = pneg %p3999_p9  ;;  %p4006_p13 = por %p4005_p12, %p4004_p11 }
  0x43   : > { %p4007_p0 = pnand %p4006_p13, %p4000_p10 }
  0x45   : > { %4010 = shalt.err (!%p4007_p0)
}
  0x46   : > { %s4894_s26 = smov 128   ;;  %s4896_s15 = smov 8  }
  0x47   : > { %3826 = dma.hbm_to_vmem [thread:$0]  (!%p4339_p5), %s4886_s12, 512, %s507_s20, [#allocation17], %s4894_s26, %s4894_s26, %s4896_s15  }
  0x48   : > { %s4022_s30 = scalar_lea.vmem %s437_s25, 15360  ;;  %p4030_p8 = scmp.lt.s32.totalorder %s437_s25, %s437_s25 }
  0x49   : > { %p4023_p2 = scmp.ne.s32.totalorder %s437_s25, %s4022_s30  ;;  %p4031_p9 = scmp.lt.s32.totalorder %s4022_s30, %s4022_s30 }
  0x4b   : > { %p4025_p4 = pnand %p4023_p2, %p4349_p6  ;;  %p4032_p10 = por %p4031_p9, %p4030_p8 }
  0x4d   : > { %p4026_p7 = pneg %p4025_p4 }
  0x4f   : > { %p4033_p11 = pnand %p4032_p10, %p4026_p7 }
  0x51   : > { %4036 = shalt.err (!%p4033_p11)
}
  0x52   : > { %s4918_s29 = smov 16   ;;  %s4919_s16 = smov 256  }
  0x53   : > { %s4920_s4 = sld [smem:[#allocation26_spill]]  ;;  %s4204_s20 = smov [#allocation12]  }
  0x54   : > { %s469_s18 = sshll.u32 %s4204_s20, 4  ;;  %s4205_s17 = smov [#allocation15]   ;;  %s470_s18 = int_to_ptr.vmem [resolvable:$true] %s469_s18 }
  0x55   : > { %s490_s26 = sshll.u32 %s4205_s17, 4  ;;  %s4048_s15 = scalar_lea.vmem %s470_s18, 32  ;;  %s491_s26 = int_to_ptr.vmem [resolvable:$true] %s490_s26 }
  0x56   : > { %p4049_p12 = scmp.ne.s32.totalorder %s470_s18, %s4048_s15  ;;  %p4056_p2 = scmp.lt.s32.totalorder %s470_s18, %s470_s18 }
  0x57   : > { %p4057_p4 = scmp.lt.s32.totalorder %s4048_s15, %s4048_s15 }
  0x58   : > { %p4051_p13 = pnand %p4049_p12, %p4349_p6 }
  0x59   : > { %3811 = dma.hbm_to_vmem [thread:$0]  (!%p4339_p5), %s4920_s4, 15360, %s437_s25, [#allocation8], %s4919_s16, %s4919_s16, %s4918_s29  }
  0x5a   : > { %p4052_p0 = pneg %p4051_p13  ;;  %p4058_p7 = por %p4057_p4, %p4056_p2 }
  0x5c   : > { %p4059_p8 = pnand %p4058_p7, %p4052_p0 }
  0x5e   : > { %4062 = shalt.err (!%p4059_p8)
}
  0x5f   : > { %s4921_s8 = sld [smem:[#allocation28_spill]]  ;;  %s4074_s25 = scalar_lea.vmem %s491_s26, 1024 }
  0x60   : > { %p4075_p9 = scmp.ne.s32.totalorder %s491_s26, %s4074_s25  ;;  %p4082_p12 = scmp.lt.s32.totalorder %s491_s26, %s491_s26 }
  0x61   : > { %p4083_p13 = scmp.lt.s32.totalorder %s4074_s25, %s4074_s25 }
  0x62   : > { %p4077_p10 = pnand %p4075_p9, %p4349_p6 }
  0x63   : > { %p4084_p1 = por %p4083_p13, %p4082_p12 }
  0x64   : > { %p4078_p11 = pneg %p4077_p10 }
  0x65   : > { %3817 = dma.hbm_to_vmem [thread:$0]  (!%p4339_p5), %s4921_s8, 32, %s470_s18, [#allocation11]  }
  0x66   : > { %p4085_p3 = pnand %p4084_p1, %p4078_p11 }
  0x68   : > { %4088 = shalt.err (!%p4085_p3)
}
  0x69   : > { %s4922_s15 = smov 8   ;;  %s4923_s30 = smov 128  }
  0x6a   : > { %s4924_s10 = sld [smem:[#allocation30_spill]]  ;;  %s4206_s20 = smov [#allocation18]  }
  0x6b   : > { %s520_s18 = sshll.u32 %s4206_s20, 4  ;;  %s521_s18 = int_to_ptr.vmem [resolvable:$true] %s520_s18 }
  0x6c   : > { %s4100_s17 = scalar_lea.vmem %s521_s18, 16  ;;  %s4107_s1 = scalar_lea.vmem %s521_s18, 32 }
  0x6d   : > { %p4101_p0 = scmp.ne.s32.totalorder %s521_s18, %s4100_s17  ;;  %p4108_p1 = scmp.lt.s32.totalorder %s521_s18, %s521_s18 }
  0x6e   : > { %p4109_p3 = scmp.lt.s32.totalorder %s4107_s1, %s4100_s17 }
  0x6f   : > { %p4103_p2 = pnand %p4101_p0, %p4349_p6 }
  0x70   : > { %3823 = dma.hbm_to_vmem [thread:$0]  (!%p4339_p5), %s4924_s10, 1024, %s491_s26, [#allocation14], %s4923_s30, %s4923_s30, %s4922_s15  }
  0x71   : > { %p4104_p4 = pneg %p4103_p2  ;;  %p4110_p7 = por %p4109_p3, %p4108_p1 }
  0x73   : > { %p4111_p8 = pnand %p4110_p7, %p4104_p4 }
  0x75   : > { %4114 = shalt.err (!%p4111_p8)
}
  0x76   : > { %3829 = dma.hbm_to_vmem [thread:$0]  (!%p4339_p5), %s4887_s13, 16, %s521_s18, [#allocation17]  }
  0x77   : > { %s4435_s19 = sadd.s32 1, %s4193_s24   ;;  %s40_s0 = sadd.s32 1, %s4189_s23 }
  0x78   : > { %s37_s26 = ssub.s32 %s4193_s24, %s4435_s19  ;;  %p47_p6 = scmp.ne.s32.totalorder %s4189_s23, %s4185_s22 }
  0x79   : > { %p38_p9 = scmp.eq.s32.totalorder %s37_s26, 0  ;;  %p48_p10 = scmp.eq.s32.totalorder %s4193_s24, 0 }
  0x7a   : > { %p53_p11 = scmp.ne.s32.totalorder %s4185_s22, %s4181_s21  ;;  %p3842_p12 = scmp.lt.s32.totalorder %s4193_s24, 2 }
  0x7b   : > { %s4447_s29 = scalar_select %p38_p9, %s4189_s23, %s40_s0  }
  0x7c   : > { %p49_p13 = por %p48_p10, %p47_p6  ;;  %p4925_p0 = scmp.eq.s32.totalorder %s4326_s27, 0 }
  0x7d   : > { %s537_s20 = sand.u32 1, %s4189_s23   ;;  %s3769_s18 = smul.u32 768, %s4193_s24 }
  0x7e   : > { %p4451_p2 = por %p4925_p0, %p53_p11  ;;  %s3768_s17 = smul.u32 48, %s537_s20 }
  0x7f   : > { %p4457_p5 = pnand %p3842_p12, %p49_p13  ;;  %s4928_s26 = sld [smem:[#allocation24_spill]] }
  0x80   : > { %s4926_s16 = scalar_select %p4451_p2, 1, 0 }
  0x81   : > { %s541_s0 = scalar_lea.vmem [#allocation5], %s3768_s17  ;;  %s4468_s8 = scalar_lea.sflag [#allocation6], %s537_s20 }
  0x82   : > { %s548_s4 = sshll.u32 %s541_s0, 4  ;;  %p4117_p1 = pneg %p4457_p5  ;;  %s4466_s4 = int_to_ptr.vmem [resolvable:$true] %s548_s4 }
  0x85   : > { %s4464_s21 = scalar_lea.hbm %s4928_s26, %s3769_s18  ;;  %s4120_s18 = scalar_lea.hbm %s4928_s26, 1536 }
  0x86   : > { %s4115_s24 = scalar_lea.hbm %s4464_s21, 768  ;;  %p4121_p8 = scmp.lt.s32.totalorder %s4464_s21, %s4928_s26 }
  0x87   : > { %p4116_p4 = scmp.ne.s32.totalorder %s4464_s21, %s4115_s24  ;;  %p4122_p6 = scmp.lt.s32.totalorder %s4120_s18, %s4115_s24 }
  0x89   : > { %p4118_p3 = pnand %p4117_p1, %p4116_p4  ;;  %p4123_p9 = por %p4122_p6, %p4121_p8 }
  0x8b   : > { %p4119_p7 = pneg %p4118_p3 }
  0x8d   : > { %p4124_p10 = pnand %p4123_p9, %p4119_p7 }
  0x8f   : > { %4127 = shalt.err (!%p4124_p10)
}
  0x90   : > { %s4128_s20 = scalar_lea.vmem %s4466_s4, 768  ;;  %s4207_s17 = smov [#allocation5]  }
  0x91   : > { %p4129_p11 = scmp.ne.s32.totalorder %s4466_s4, %s4128_s20  ;;  %s4133_s0 = sshll.u32 %s4207_s17, 4  ;;  %s4134_s0 = int_to_ptr.vmem [resolvable:$false] %s4133_s0 }
  0x92   : > { %s4135_s9 = scalar_lea.vmem %s4134_s0, 1536  ;;  %p4136_p0 = scmp.lt.s32.totalorder %s4466_s4, %s4134_s0 }
  0x93   : > { %p4131_p12 = pnand %p4129_p11, %p4117_p1  ;;  %p4137_p4 = scmp.lt.s32.totalorder %s4135_s9, %s4128_s20 }
  0x95   : > { %p4132_p13 = pneg %p4131_p12  ;;  %p4138_p3 = por %p4137_p4, %p4136_p0 }
  0x97   : > { %p4139_p2 = pnand %p4138_p3, %p4132_p13 }
  0x99   : > { %4142 = shalt.err (!%p4139_p2)
}
  0x9a   : > { %3833 = dma.hbm_to_vmem [thread:$0]  (!%p4457_p5), %s4464_s21, 768, %s4466_s4, %s4468_s8, %s4923_s30, %s4923_s30, %s4922_s15  }
  0x9b   : > { %p4929_p1 = scmp.ne.s32.totalorder %s4912_s28, 0 }
  0x9c   : > { %s562_s10 = sand.u32 (!%p4929_p1), 1, %s4185_s22   ;;  %p4930_p2 = scmp.ne.s32.totalorder (!%p4929_p1), %s4926_s16, 0 }
  0x9d   : > { %560 = sbr.rel (%p4929_p1) target bundleno = 3359 (0xd1f), region = 84  ;;  %s563_s7 = scalar_lea.sflag (!%p4929_p1), [#allocation6], %s562_s10 }
  0x9e   : > { %s3770_s24 = smul.u32 (!%p4929_p1), 48, %s562_s10 }
  0xa0   : > { %s4495_s18 = scalar_lea.vmem (!%p4929_p1), [#allocation5], %s3770_s24 }
  0xa2   : > { %4160 = dma.done.wait (%p4930_p2), %s563_s7, 768  }
  0xa3   : > { %4162 = vsyncadd (%p4930_p2), %s563_s7, 4294966528  ;;  %p4931_p7 = scmp.eq.s32.totalorder %s4326_s27, 0 }
  0xa5   : > { %4164 = dma.done.wait (%p4931_p7), [#allocation8], 20736   ;;  %p4932_p5 = pmov %p4931_p7 }
  0xa7   : > { %4166 = vsyncadd (%p4932_p5), [#allocation8], 4294946560  ;;  %p4933_p8 = pmov %p4932_p5 }
  0xa8   : > { %p4934_p6 = pmov %p4932_p5 }
  0xa9   : > { %4168 = dma.done.wait (%p4933_p8), [#allocation11], 18464  }
  0xaa   : > { %4170 = vsyncadd (%p4934_p6), [#allocation11], 4294948832  ;;  %p4935_p9 = pmov %p4932_p5 }
  0xab   : > { %p4936_p10 = pmov %p4932_p5 }
  0xac   : > { %4172 = dma.done.wait (%p4935_p9), [#allocation14], 1056  }
  0xad   : > { %4174 = vsyncadd (%p4936_p10), [#allocation14], 4294966240  ;;  %p4937_p11 = pmov %p4932_p5 }
  0xae   : > { %p4938_p12 = pmov %p4932_p5 }
  0xaf   : > { %4176 = dma.done.wait (%p4937_p11), [#allocation17], 528  }
  0xb0   : > { %4178 = vsyncadd (%p4938_p12), [#allocation17], 4294966768  ;;  %vm652_vm0 = vcmask 441344   ;;  %v4208_v0 = vmov 0.0   ;;  %vm655_vm1 = vcmask 435200   ;;  %vm746_vm2 = vcmask 1045504  }
  0xb1   : > { %653 = vst.msk [vmem:[#allocation2] sm:$0xff] %vm652_vm0, %v4208_v0  ;;  %654 = vst.msk [vmem:[#allocation2 + $0x8] sm:$0xff] %vm652_vm0, %v4208_v0  ;;  %817 = vmatprep.mubr.f32.mxu0 %v4208_v0  ;;  %906 = vmatprep.mubr.f32.mxu1 %v4208_v0  ;;  %v666_v1 = vld [vmem:[%s4495_s18] sm:$0xff]  ;;  %s4209_s4 = smov 1   ;;  %s4210_s8 = smov 37   ;;  %v3526_v3 = vld [vmem:[%s4495_s18 + $0x10] sm:$0xff]  ;;  %v1031_v62 = vlaneseq }
  0xb2   : > { %657 = vst [vmem:[#allocation3] sm:$0xff] %v4208_v0  ;;  %660 = vst [vmem:[#allocation3 + $0x10] sm:$0x3] %v4208_v0  ;;  %v3528_v2 = vld [vmem:[%s4495_s18 + $0x20] sm:$0xff]  ;;  %670 = vrot.lane.b32.xlu0 %v666_v1, %s4209_s4  ;;  %v739_v4 = vld [vmem:[#allocation7 + $0xd8] sm:$0x3f] }
  0xb3   : > { %663 = vst [vmem:[#allocation4] sm:$0x3f] %v4208_v0  ;;  %656 = vst.msk [vmem:[#allocation2 + $0x10] sm:$0x3] %vm655_vm1, %v4208_v0  ;;  %698 = vrot.lane.b32.xlu1 %v3528_v2, %s4210_s8  ;;  %v667_v5 = vld [vmem:[%s4495_s18 + $0x8] sm:$0xff]  ;;  %3530 = vmatprep.subr.msk.mxu0 %vm746_vm2, %v739_v4  ;;  %v736_v10 = vld [vmem:[#allocation7 + $0xc0] sm:$0xff] }
  0xb4   : > { %v738_v6 = vld [vmem:[#allocation7 + $0xd0] sm:$0x3f]  ;;  %v722_v7 = vld [vmem:[#allocation7 + $0x68] sm:$0x3f]  ;;  %v721_v9 = vld [vmem:[#allocation7 + $0x60] sm:$0x3f] }
  0xb5   : > { %3531 = vmatpush1.msk.msra.mxu0 %vm746_vm2, %v738_v6  ;;  %3534 = vmatprep.subr.msk.mxu1 %vm746_vm2, %v722_v7  ;;  %v737_v8 = vld [vmem:[#allocation7 + $0xc8] sm:$0xff]  ;;  %v720_v11 = vld [vmem:[#allocation7 + $0x58] sm:$0xff]  ;;  %v719_v13 = vld [vmem:[#allocation7 + $0x50] sm:$0xff]  ;;  %s4211_s28 = smov 19   ;;  %vm676_vm3 = vcmask 138248   ;;  %vm690_vm4 = vcmask 285848  }
  0xb6   : > { %773 = vmatprep.subr.mxu0 %v737_v8  ;;  %3535 = vmatpush1.msk.msra.mxu1 %vm746_vm2, %v721_v9  ;;  %v735_v12 = vld [vmem:[#allocation7 + $0xb8] sm:$0xff]  ;;  %v734_v14 = vld [vmem:[#allocation7 + $0xb0] sm:$0xff]  ;;  %v718_v15 = vld [vmem:[#allocation7 + $0x48] sm:$0xff]  ;;  %vm704_vm5 = vcmask 433448   ;;  %v1032_v2 = vshrl.u32 %v1031_v62, 7  ;;  %vm1113_vm6 = vcmask 1040384  }
  0xb7   : > { %684 = vrot.lane.b32.xlu0 %v3526_v3, %s4211_s28  ;;  %672 = vrot.lane.b32.xlu1 %v667_v5, %s4209_s4  ;;  %v3527_v16 = vld [vmem:[%s4495_s18 + $0x18] sm:$0xff]  ;;  %v3529_v17 = vld [vmem:[%s4495_s18 + $0x28] sm:$0xff]  ;;  %v717_v19 = vld [vmem:[#allocation7 + $0x40] sm:$0xff]  ;;  %vm1116_vm7 = vcmask 1041408   ;;  %vm1119_vm8 = vcmask 1042432   ;;  %vm1122_vm9 = vcmask 1043456  }
  0xb8   : > { %774 = vmatpush1.msra.mxu0 %v736_v10  ;;  %862 = vmatprep.subr.mxu1 %v720_v11  ;;  %v733_v18 = vld [vmem:[#allocation7 + $0xa8] sm:$0xff]  ;;  %v732_v20 = vld [vmem:[#allocation7 + $0xa0] sm:$0xff]  ;;  %v716_v21 = vld [vmem:[#allocation7 + $0x38] sm:$0xff]  ;;  %v4551_v5 = vsub.s32 0, %v1032_v2  ;;  %v4556_v7 = vsub.s32 1, %v1032_v2  ;;  %vm1125_vm10 = vcmask 1044480  }
  0xb9   : > { %775 = vmatprep.subr.mxu0 %v735_v12  ;;  %863 = vmatpush1.msra.mxu1 %v719_v13  ;;  %v731_v22 = vld [vmem:[#allocation7 + $0x98] sm:$0xff]  ;;  %v715_v23 = vld [vmem:[#allocation7 + $0x30] sm:$0xff]  ;;  %v714_v25 = vld [vmem:[#allocation7 + $0x28] sm:$0xff]  ;;  %vm1130_vm11 = vcmask 1046528   ;;  %s4212_s21 = smov 112   ;;  %vm658_vm12 = vcmask 261120  }
  0xba   : > { %776 = vmatpush1.msra.mxu0 %v734_v14  ;;  %864 = vmatprep.subr.mxu1 %v718_v15  ;;  %v730_v24 = vld [vmem:[#allocation7 + $0x90] sm:$0xff]  ;;  %v729_v26 = vld [vmem:[#allocation7 + $0x88] sm:$0xff]  ;;  %v713_v27 = vld [vmem:[#allocation7 + $0x20] sm:$0xff]  ;;  %659 = vst.msk [vmem:[#allocation3 + $0x8] sm:$0xff] %vm658_vm12, %v4208_v0  ;;  %s4213_s25 = smov 96   ;;  %vm661_vm13 = vcmask 254976  }
  0xbb   : > { %686 = vrot.lane.b32.xlu0 %v3527_v16, %s4211_s28  ;;  %700 = vrot.lane.b32.xlu1 %v3529_v17, %s4210_s8  ;;  %v728_v28 = vld [vmem:[#allocation7 + $0x80] sm:$0xff]  ;;  %v712_v29 = vld [vmem:[#allocation7 + $0x18] sm:$0xff]  ;;  %v711_v31 = vld [vmem:[#allocation7 + $0x10] sm:$0xff]  ;;  %662 = vst.msk [vmem:[#allocation3 + $0x18] sm:$0x3] %vm661_vm13, %v4208_v0  ;;  %s4214_s20 = smov 64  }
  0xbc   : > { %777 = vmatprep.subr.mxu0 %v733_v18  ;;  %865 = vmatpush1.msra.mxu1 %v717_v19  ;;  %v727_v30 = vld [vmem:[#allocation7 + $0x78] sm:$0xff]  ;;  %v726_v32 = vld [vmem:[#allocation7 + $0x70] sm:$0xff]  ;;  %v710_v33 = vld [vmem:[#allocation7 + $0x8] sm:$0xff]  ;;  %s4215_s17 = smov 80   ;;  %s4216_s0 = smov 32   ;;  %vm1166_vm14 = vcmask 130048  }
  0xbd   : > { %778 = vmatpush1.msra.mxu0 %v732_v20  ;;  %866 = vmatprep.subr.mxu1 %v716_v21  ;;  %v709_v34 = vld [vmem:[#allocation7] sm:$0xff]  ;;  %v935_v35 = vld [vmem:[#allocation7 + $0x148] sm:$0x3f]  ;;  %v933_v45 = vld [vmem:[#allocation7 + $0x138] sm:$0xff]  ;;  %s4217_s9 = smov 48   ;;  %s4218_s10 = smov 16  }
  0xbe   : > { %779 = vmatprep.subr.mxu0 %v731_v22  ;;  %867 = vmatpush1.msra.mxu1 %v715_v23  ;;  %v934_v42 = vld [vmem:[#allocation7 + $0x140] sm:$0x3f]  ;;  %v932_v46 = vld [vmem:[#allocation7 + $0x130] sm:$0xff]  ;;  %v931_v47 = vld [vmem:[#allocation7 + $0x128] sm:$0xff]  ;;  %vm4902_vm15 = vcmask 392192   ;;  %vm4901_vm1 = vcmask 654336  }
  0xbf   : > { %780 = vmatpush1.msra.mxu0 %v730_v24  ;;  %868 = vmatprep.subr.mxu1 %v714_v25  ;;  %v930_v48 = vld [vmem:[#allocation7 + $0x120] sm:$0xff]  ;;  %v929_v51 = vld [vmem:[#allocation7 + $0x118] sm:$0xff]  ;;  %v928_v52 = vld [vmem:[#allocation7 + $0x110] sm:$0xff]  ;;  %vm1186_vm13 = vcmask 130049   ;;  %s4939_s18 = sld [smem:[#allocation31_spill]]  ;;  %p647_p13 = scmp.lt.s32.totalorder %s4326_s27, 1 }
  0xc0   : > { %781 = vmatprep.subr.mxu0 %v729_v26  ;;  %869 = vmatpush1.msra.mxu1 %v713_v27  ;;  %v927_v53 = vld [vmem:[#allocation7 + $0x108] sm:$0xff]  ;;  %v926_v54 = vld [vmem:[#allocation7 + $0x100] sm:$0xff]  ;;  %v925_v55 = vld [vmem:[#allocation7 + $0xf8] sm:$0xff] }
  0xc1   : > { %782 = vmatpush1.msra.mxu0 %v728_v28  ;;  %870 = vmatprep.subr.mxu1 %v712_v29  ;;  %v924_v56 = vld [vmem:[#allocation7 + $0xf0] sm:$0xff]  ;;  %v923_v57 = vld [vmem:[#allocation7 + $0xe8] sm:$0xff]  ;;  %v922_v58 = vld [vmem:[#allocation7 + $0xe0] sm:$0xff]  ;;  %s4950_s27 = smov (!%p647_p13, %s4326_s27), 1 }
  0xc2   : > { %783 = vmatprep.subr.mxu0 %v727_v30  ;;  %871 = vmatpush1.msra.mxu1 %v711_v31  ;;  %v1029_v6 = vld [vmem:[%s4876_s2] sm:$0x3] }
  0xc3   : > { %784 = vmatpush1.msra.mxu0 %v726_v32  ;;  %872 = vmatprep.subr.mxu1 %v710_v33  ;;  %v1045_v10 = vld [vmem:[%s4877_s3] sm:$0x3]  ;;  %v1034_v12 = vrot.slane %v1029_v6, %v4551_v5  ;;  %v1038_v17 = vrot.slane %v1029_v6, %v4556_v7 }
  0xc4   : > { %873 = vmatpush1.msra.mxu1 %v709_v34  ;;  %3538 = vmatprep.subr.msk.mxu0 %vm746_vm2, %v935_v35  ;;  %v1050_v16 = vrot.slane %v1045_v10, %v4551_v5  ;;  %v1054_v23 = vrot.slane %v1045_v10, %v4556_v7 }
 0x124   : > { %v671_v36 = vpop.permute.xlu0 %670 }
 0x125   : > { %v699_v37 = vpop.permute.xlu1 %698  ;;  %677 = vst.msk [vmem:[#allocation2 + $0x1] sm:$0xff] %vm676_vm3, %v671_v36 }
 0x129   : > { %v685_v38 = vpop.permute.xlu0 %684  ;;  %v673_v39 = vpop.permute.xlu1 %672 }
 0x12a   : > { %691 = vst.msk [vmem:[#allocation2 + $0x1] sm:$0xff] %vm690_vm4, %v685_v38 }
 0x12b   : > { %678 = vst.msk [vmem:[#allocation2 + $0x9] sm:$0xff] %vm676_vm3, %v673_v39  ;;  %vm1175_vm3 = vcmask 785408  }
 0x12c   : > { %705 = vst.msk [vmem:[#allocation2 + $0x1] sm:$0xff] %vm704_vm5, %v699_v37 }
 0x12d   : > { %v687_v40 = vpop.permute.xlu0 %686  ;;  %v701_v41 = vpop.permute.xlu1 %700 }
 0x12e   : > { %692 = vst.msk [vmem:[#allocation2 + $0x9] sm:$0xff] %vm690_vm4, %v687_v40  ;;  %vm1177_vm4 = vcmask 916480  }
 0x12f   : > { %706 = vst.msk [vmem:[#allocation2 + $0x9] sm:$0xff] %vm704_vm5, %v701_v41  ;;  %vm1184_vm5 = vcmask 1047681  }
 0x133   : > { %v723_v43 = vld [vmem:[#allocation2 + $0x1] sm:$0xff] }
 0x134   : > { %v707_v44 = vld [vmem:[#allocation2] sm:$0xff]  ;;  %3532 = vmatmul.mubr.msk.f32.vlgmr.msra.gmra.mxu0 %vm652_vm0, %v723_v43 }
 0x135   : > { %3536 = vmatmul.mubr.msk.f32.vlgmr.msra.gmra.mxu1 %vm652_vm0, %v707_v44  ;;  %3539 = vmatpush1.msk.msra.mxu0 %vm746_vm2, %v934_v42 }
 0x136   : > { %823 = vmatprep.mubr.f32.mxu0 %v4208_v0  ;;  %968 = vmatprep.subr.mxu0 %v933_v45  ;;  %v724_v49 = vld [vmem:[#allocation2 + $0x9] sm:$0xff] }
 0x137   : > { %912 = vmatprep.mubr.f32.mxu1 %v4208_v0  ;;  %969 = vmatpush1.msra.mxu0 %v932_v46  ;;  %v708_v50 = vld [vmem:[#allocation2 + $0x8] sm:$0xff] }
 0x138   : > { %970 = vmatprep.subr.mxu0 %v931_v47  ;;  %3533 = vmatmul.mubr.msk.f32.gmra.mxu0 %vm652_vm0, %v724_v49  ;;  %v919_v59 = vld [vmem:[#allocation2 + $0x2] sm:$0xff]  ;;  %v920_v60 = vld [vmem:[#allocation2 + $0xa] sm:$0xff] }
 0x139   : > { %3537 = vmatmul.mubr.msk.f32.gmra.mxu1 %vm652_vm0, %v708_v50  ;;  %971 = vmatpush1.msra.mxu0 %v930_v48 }
 0x13a   : > { %972 = vmatprep.subr.mxu0 %v929_v51  ;;  %1012 = vmatprep.mubr.f32.mxu0 %v4208_v0 }
 0x13b   : > { %973 = vmatpush1.msra.mxu0 %v928_v52 }
 0x13c   : > { %974 = vmatprep.subr.mxu0 %v927_v53 }
 0x13d   : > { %975 = vmatpush1.msra.mxu0 %v926_v54 }
 0x13e   : > { %976 = vmatprep.subr.mxu0 %v925_v55 }
 0x13f   : > { %977 = vmatpush1.msra.mxu0 %v924_v56 }
 0x140   : > { %978 = vmatprep.subr.mxu0 %v923_v57 }
 0x141   : > { %979 = vmatpush1.msra.mxu0 %v922_v58 }
 0x142   : > { %3540 = vmatmul.mubr.msk.f32.vlgmr.msra.gmra.mxu0 %vm652_vm0, %v919_v59 }
 0x143   : > { %1018 = vmatprep.mubr.f32.mxu0 %v4208_v0 }
 0x146   : > { %3541 = vmatmul.mubr.msk.f32.gmra.mxu0 %vm652_vm0, %v920_v60  ;;  %vm1171_vm0 = vcmask 523264  }
 0x1f4   : > { %v819_v61 = vpop.f32.mrf.mxu0 }
 0x1f5   : > { %v908_v63 = vpop.f32.mrf.mxu1 }
 0x1f6   : > { %v821_v1 = vpop.f32.mrf.mxu0  ;;  %v909_v11 = vadd.f32 %v908_v63, %v819_v61 }
 0x1f7   : > { %v910_v3 = vpop.f32.mrf.mxu1 }
 0x1f8   : > { %v825_v4 = vpop.f32.mrf.mxu0  ;;  %v911_v14 = vadd.f32 %v910_v3, %v821_v1 }
 0x1f9   : > { %v914_v8 = vpop.f32.mrf.mxu1 }
 0x1fa   : > { %v827_v9 = vpop.f32.mrf.mxu0  ;;  %v915_v20 = vadd.f32 %v914_v8, %v825_v4 }
 0x1fb   : > { %v916_v18 = vpop.f32.mrf.mxu1 }
 0x1fc   : > { %v917_v25 = vadd.f32 %v916_v18, %v827_v9 }
 0x202   : > { %v1014_v13 = vpop.f32.mrf.mxu0 }
 0x203   : > { %v1025_v15 = vadd.f32 %v1014_v13, %v909_v11 }
 0x204   : > { %v1016_v19 = vpop.f32.mrf.mxu0 }
 0x205   : > { %v1041_v21 = vmul.f32 %v1034_v12, %v1025_v15  ;;  %v1026_v22 = vadd.f32 %v1016_v19, %v911_v14  ;;  %v1225_v19 = vld [vmem:[#allocation9 + $0xf8] sm:$0xff] }
 0x206   : > { %v1020_v24 = vpop.f32.mrf.mxu0  ;;  %1366 = vmatprep.subr.mxu0 %v1225_v19 }
 0x207   : > { %v1057_v26 = vadd.f32 %v1050_v16, %v1041_v21  ;;  %v1042_v27 = vmul.f32 %v1038_v17, %v1026_v22  ;;  %v1027_v28 = vadd.f32 %v1020_v24, %v915_v20  ;;  %v1224_v20 = vld [vmem:[#allocation9 + $0xf0] sm:$0xff]  ;;  %v1270_v21 = vld [vmem:[#allocation9 + $0x238] sm:$0xff]  ;;  %v1223_v22 = vld [vmem:[#allocation9 + $0xe8] sm:$0xff] }
 0x208   : > { %v1022_v29 = vpop.f32.mrf.mxu0  ;;  %1292 = vmatprep.subr.mxu1 %v1270_v21  ;;  %v1222_v24 = vld [vmem:[#allocation9 + $0xe0] sm:$0xff]  ;;  %1367 = vmatpush1.msra.mxu0 %v1224_v20 }
 0x209   : > { %v1061_v30 = vmax.f32 %v1057_v26, 0.0  ;;  %v1058_v31 = vadd.f32 %v1054_v23, %v1042_v27  ;;  %v1043_v32 = vmul.f32 %v1034_v12, %v1027_v28  ;;  %v1028_v33 = vadd.f32 %v1022_v29, %v917_v25  ;;  %v1268_v25 = vld [vmem:[#allocation9 + $0x228] sm:$0xff]  ;;  %v1267_v26 = vld [vmem:[#allocation9 + $0x220] sm:$0xff]  ;;  %1368 = vmatprep.subr.mxu0 %v1223_v22  ;;  %v1221_v27 = vld [vmem:[#allocation9 + $0xd8] sm:$0xff] }
 0x20a   : > { %v1266_v28 = vld [vmem:[#allocation9 + $0x218] sm:$0xff]  ;;  %1369 = vmatpush1.msra.mxu0 %v1222_v24  ;;  %v1220_v29 = vld [vmem:[#allocation9 + $0xd0] sm:$0xff]  ;;  %v1240_v24 = vld [vmem:[#allocation9 + $0x148] sm:$0xff] }
 0x20b   : > { %v1067_v34 = vrot.slane %v1061_v30, 1  ;;  %v1062_v35 = vmax.f32 %v1058_v31, 0.0  ;;  %v1059_v36 = vadd.f32 %v1050_v16, %v1043_v32  ;;  %v1044_v37 = vmul.f32 %v1038_v17, %v1028_v33  ;;  %v1219_v31 = vld [vmem:[#allocation9 + $0xc8] sm:$0xff]  ;;  %1370 = vmatprep.subr.mxu0 %v1221_v27  ;;  %v1218_v33 = vld [vmem:[#allocation9 + $0xc0] sm:$0xff]  ;;  %v1241_v22 = vld [vmem:[#allocation9 + $0x150] sm:$0xff] }
 0x20c   : > { %v1264_v32 = vld [vmem:[#allocation9 + $0x208] sm:$0xff]  ;;  %1371 = vmatpush1.msra.mxu0 %v1220_v29  ;;  %v1239_v29 = vld [vmem:[#allocation9 + $0x140] sm:$0xff] }
 0x20d   : > { %v1071_v38 = vmax.f32 %v1061_v30, %v1067_v34  ;;  %v1068_v39 = vrot.slane %v1062_v35, 1  ;;  %v1063_v40 = vmax.f32 %v1059_v36, 0.0  ;;  %v1060_v41 = vadd.f32 %v1054_v23, %v1044_v37  ;;  %v1269_v23 = vld [vmem:[#allocation9 + $0x230] sm:$0xff]  ;;  %v1217_v34 = vld [vmem:[#allocation9 + $0xb8] sm:$0xff]  ;;  %1372 = vmatprep.subr.mxu0 %v1219_v31 }
 0x20e   : > { %1293 = vmatpush1.msra.mxu1 %v1269_v23  ;;  %v1265_v30 = vld [vmem:[#allocation9 + $0x210] sm:$0xff]  ;;  %v1262_v37 = vld [vmem:[#allocation9 + $0x1f8] sm:$0xff]  ;;  %1373 = vmatpush1.msra.mxu0 %v1218_v33  ;;  %v1194_v23 = vld [vmem:[#allocation9] sm:$0xff] }
 0x20f   : > { %v1083_v42 = vrot.slane %v1071_v38, 1  ;;  %v1087_v43 = vrot.slane %v1071_v38, 2  ;;  %v1072_v44 = vmax.f32 %v1062_v35, %v1068_v39  ;;  %v1075_v45 = vrot.slane %v1063_v40, 1  ;;  %1294 = vmatprep.subr.mxu1 %v1268_v25  ;;  %v1263_v35 = vld [vmem:[#allocation9 + $0x200] sm:$0xff]  ;;  %v1216_v36 = vld [vmem:[#allocation9 + $0xb0] sm:$0xff]  ;;  %1374 = vmatprep.subr.mxu0 %v1217_v34 }
 0x210   : > { %v1064_v46 = vmax.f32 %v1060_v41, 0.0  ;;  %v1091_v47 = vrot.slane %v1071_v38, 3  ;;  %1295 = vmatpush1.msra.mxu1 %v1267_v26  ;;  %v1261_v39 = vld [vmem:[#allocation9 + $0x1f0] sm:$0xff]  ;;  %v1260_v41 = vld [vmem:[#allocation9 + $0x1e8] sm:$0xff]  ;;  %1375 = vmatpush1.msra.mxu0 %v1216_v36  ;;  %v1230_v34 = vld [vmem:[#allocation9 + $0x120] sm:$0xff] }
 0x211   : > { %v1114_v48 = vsel %vm1113_vm6, %v1071_v38, %v1083_v42  ;;  %v1084_v49 = vrot.slane %v1072_v44, 1  ;;  %v1088_v50 = vrot.slane %v1072_v44, 2  ;;  %v1079_v51 = vmax.f32 %v1063_v40, %v1075_v45  ;;  %1296 = vmatprep.subr.mxu1 %v1266_v28  ;;  %v1215_v38 = vld [vmem:[#allocation9 + $0xa8] sm:$0xff]  ;;  %v1214_v40 = vld [vmem:[#allocation9 + $0xa0] sm:$0xff]  ;;  %v1213_v42 = vld [vmem:[#allocation9 + $0x98] sm:$0xff] }
 0x212   : > { %v1076_v52 = vrot.slane %v1064_v46, 1  ;;  %v1117_v53 = vsel %vm1116_vm7, %v1114_v48, %v1087_v43  ;;  %v1092_v59 = vrot.slane %v1072_v44, 3  ;;  %1297 = vmatpush1.msra.mxu1 %v1265_v30  ;;  %v1259_v43 = vld [vmem:[#allocation9 + $0x1e0] sm:$0xff]  ;;  %1376 = vmatprep.subr.mxu0 %v1215_v38  ;;  %v1258_v45 = vld [vmem:[#allocation9 + $0x1d8] sm:$0xff]  ;;  %v1232_v30 = vld [vmem:[#allocation9 + $0x130] sm:$0xff] }
 0x213   : > { %v1115_v54 = vsel %vm1113_vm6, %v1072_v44, %v1084_v49  ;;  %v1120_v55 = vsel %vm1119_vm8, %v1117_v53, %v1091_v47  ;;  %v1097_v57 = vrot.slane %v1079_v51, 4  ;;  %v1101_v58 = vrot.slane %v1079_v51, 5  ;;  %1298 = vmatprep.subr.mxu1 %v1264_v32  ;;  %v1212_v44 = vld [vmem:[#allocation9 + $0x90] sm:$0xff]  ;;  %1377 = vmatpush1.msra.mxu0 %v1214_v40  ;;  %v1210_v48 = vld [vmem:[#allocation9 + $0x80] sm:$0xff]  ;;  %v1256_v49 = vld [vmem:[#allocation9 + $0x1c8] sm:$0xff] }
 0x214   : > { %v1080_v56 = vmax.f32 %v1064_v46, %v1076_v52  ;;  %v1118_v60 = vsel %vm1116_vm7, %v1115_v54, %v1088_v50  ;;  %v1105_v61 = vrot.slane %v1079_v51, 6  ;;  %v1109_v2 = vrot.slane %v1079_v51, 7  ;;  %1299 = vmatpush1.msra.mxu1 %v1263_v35  ;;  %v1211_v46 = vld [vmem:[#allocation9 + $0x88] sm:$0xff]  ;;  %v1257_v47 = vld [vmem:[#allocation9 + $0x1d0] sm:$0xff]  ;;  %1378 = vmatprep.subr.mxu0 %v1213_v42  ;;  %v1209_v50 = vld [vmem:[#allocation9 + $0x78] sm:$0xff] }
 0x215   : > { %v1123_v62 = vsel %vm1122_vm9, %v1120_v55, %v1097_v57  ;;  %v1121_v4 = vsel %vm1119_vm8, %v1118_v60, %v1092_v59  ;;  %1300 = vmatprep.subr.mxu1 %v1262_v37  ;;  %1379 = vmatpush1.msra.mxu0 %v1212_v44  ;;  %v1255_v51 = vld [vmem:[#allocation9 + $0x1c0] sm:$0xff]  ;;  %v1208_v52 = vld [vmem:[#allocation9 + $0x70] sm:$0xff]  ;;  %v1254_v53 = vld [vmem:[#allocation9 + $0x1b8] sm:$0xff] }
 0x216   : > { %v1098_v63 = vrot.slane %v1080_v56, 4  ;;  %v1102_v1 = vrot.slane %v1080_v56, 5  ;;  %v1126_v3 = vsel %vm1125_vm10, %v1123_v62, %v1101_v58  ;;  %v1106_v8 = vrot.slane %v1080_v56, 6  ;;  %1301 = vmatpush1.msra.mxu1 %v1261_v39  ;;  %1380 = vmatprep.subr.mxu0 %v1211_v46  ;;  %v1207_v54 = vld [vmem:[#allocation9 + $0x68] sm:$0xff]  ;;  %v1253_v55 = vld [vmem:[#allocation9 + $0x1b0] sm:$0xff]  ;;  %v1205_v58 = vld [vmem:[#allocation9 + $0x58] sm:$0xff] }
 0x217   : > { %v1128_v6 = vsel %vm746_vm2, %v1126_v3, %v1105_v61  ;;  %v1110_v11 = vrot.slane %v1080_v56, 7  ;;  %1302 = vmatprep.subr.mxu1 %v1260_v41  ;;  %1381 = vmatpush1.msra.mxu0 %v1210_v48  ;;  %v1206_v56 = vld [vmem:[#allocation9 + $0x60] sm:$0xff]  ;;  %v1252_v57 = vld [vmem:[#allocation9 + $0x1a8] sm:$0xff]  ;;  %v1204_v60 = vld [vmem:[#allocation9 + $0x50] sm:$0xff] }
 0x218   : > { %v1124_v9 = vsel %vm1122_vm9, %v1121_v4, %v1098_v63  ;;  %v1131_v10 = vsel %vm1130_vm11, %v1128_v6, %v1109_v2  ;;  %1303 = vmatpush1.msra.mxu1 %v1259_v43  ;;  %1382 = vmatprep.subr.mxu0 %v1209_v50  ;;  %v1251_v59 = vld [vmem:[#allocation9 + $0x1a0] sm:$0xff]  ;;  %v1250_v61 = vld [vmem:[#allocation9 + $0x198] sm:$0xff]  ;;  %v1203_v62 = vld [vmem:[#allocation9 + $0x48] sm:$0xff] }
 0x219   : > { %v1127_v12 = vsel %vm1125_vm10, %v1124_v9, %v1102_v1  ;;  %1134 = vrot.lane.b32.xlu0 %v1131_v10, %s4212_s21  ;;  %1304 = vmatprep.subr.mxu1 %v1258_v45  ;;  %v1249_v63 = vld [vmem:[#allocation9 + $0x190] sm:$0xff]  ;;  %v1202_v1 = vld [vmem:[#allocation9 + $0x40] sm:$0xff]  ;;  %v1248_v2 = vld [vmem:[#allocation9 + $0x188] sm:$0xff] }
 0x21a   : > { %v1129_v13 = vsel %vm746_vm2, %v1127_v12, %v1106_v8  ;;  %1305 = vmatpush1.msra.mxu1 %v1257_v47  ;;  %1383 = vmatpush1.msra.mxu0 %v1208_v52  ;;  %v1201_v3 = vld [vmem:[#allocation9 + $0x38] sm:$0xff]  ;;  %v1247_v4 = vld [vmem:[#allocation9 + $0x180] sm:$0xff]  ;;  %v1200_v6 = vld [vmem:[#allocation9 + $0x30] sm:$0xff] }
 0x21b   : > { %v1132_v14 = vsel %vm1130_vm11, %v1129_v13, %v1110_v11  ;;  %1306 = vmatprep.subr.mxu1 %v1256_v49  ;;  %1384 = vmatprep.subr.mxu0 %v1207_v54  ;;  %v1246_v8 = vld [vmem:[#allocation9 + $0x178] sm:$0xff]  ;;  %v1199_v9 = vld [vmem:[#allocation9 + $0x28] sm:$0xff]  ;;  %v1198_v11 = vld [vmem:[#allocation9 + $0x20] sm:$0xff] }
 0x21c   : > { %1139 = vrot.lane.b32.xlu1 %v1132_v14, %s4212_s21  ;;  %1307 = vmatpush1.msra.mxu1 %v1255_v51  ;;  %v1244_v12 = vld [vmem:[#allocation9 + $0x168] sm:$0xff]  ;;  %v1197_v13 = vld [vmem:[#allocation9 + $0x18] sm:$0xff]  ;;  %v1277_v33 = vld [vmem:[#allocation9 + $0x270] sm:$0xff] }
 0x21d   : > { %1308 = vmatprep.subr.mxu1 %v1254_v53  ;;  %1385 = vmatpush1.msra.mxu0 %v1206_v56  ;;  %v1233_v28 = vld [vmem:[#allocation9 + $0x138] sm:$0xff]  ;;  %v1276_v35 = vld [vmem:[#allocation9 + $0x268] sm:$0xff]  ;;  %v1275_v37 = vld [vmem:[#allocation9 + $0x260] sm:$0xff] }
 0x21e   : > { %1309 = vmatpush1.msra.mxu1 %v1253_v55  ;;  %1386 = vmatprep.subr.mxu0 %v1205_v58  ;;  %v1278_v32 = vld [vmem:[#allocation9 + $0x278] sm:$0xff]  ;;  %v1228_v38 = vld [vmem:[#allocation9 + $0x110] sm:$0xff]  ;;  %v1227_v42 = vld [vmem:[#allocation9 + $0x108] sm:$0xff] }
 0x21f   : > { %1310 = vmatprep.subr.mxu1 %v1252_v57  ;;  %1387 = vmatpush1.msra.mxu0 %v1204_v60  ;;  %v1229_v36 = vld [vmem:[#allocation9 + $0x118] sm:$0xff]  ;;  %v1273_v45 = vld [vmem:[#allocation9 + $0x250] sm:$0xff]  ;;  %v1226_v46 = vld [vmem:[#allocation9 + $0x100] sm:$0xff] }
 0x220   : > { %1311 = vmatpush1.msra.mxu1 %v1251_v59  ;;  %1388 = vmatprep.subr.mxu0 %v1203_v62  ;;  %v1274_v41 = vld [vmem:[#allocation9 + $0x258] sm:$0xff]  ;;  %v1272_v47 = vld [vmem:[#allocation9 + $0x248] sm:$0xff]  ;;  %v1271_v50 = vld [vmem:[#allocation9 + $0x240] sm:$0xff] }
 0x221   : > { %1312 = vmatprep.subr.mxu1 %v1250_v61  ;;  %1389 = vmatpush1.msra.mxu0 %v1202_v1  ;;  %v1473_v53 = vld [vmem:[#allocation9 + $0x378] sm:$0xff] }
 0x222   : > { %1313 = vmatpush1.msra.mxu1 %v1249_v63  ;;  %1390 = vmatprep.subr.mxu0 %v1201_v3 }
 0x223   : > { %1314 = vmatprep.subr.mxu1 %v1248_v2  ;;  %1391 = vmatpush1.msra.mxu0 %v1200_v6 }
 0x224   : > { %1315 = vmatpush1.msra.mxu1 %v1247_v4  ;;  %1392 = vmatprep.subr.mxu0 %v1199_v9 }
 0x225   : > { %1316 = vmatprep.subr.mxu1 %v1246_v8  ;;  %1393 = vmatpush1.msra.mxu0 %v1198_v11  ;;  %v1472_v8 = vld [vmem:[#allocation9 + $0x370] sm:$0xff]  ;;  %v1471_v11 = vld [vmem:[#allocation9 + $0x368] sm:$0xff] }
 0x226   : > { %1394 = vmatprep.subr.mxu0 %v1197_v13  ;;  %v1470_v13 = vld [vmem:[#allocation9 + $0x360] sm:$0xff] }
 0x28b   : > { %v1135_v15 = vpop.permute.xlu0 %1134 }
 0x28c   : > { %v4583_v16 = vmax.f32 %v1131_v10, %v1135_v15  ;;  %v1245_v10 = vld [vmem:[#allocation9 + $0x170] sm:$0xff] }
 0x28d   : > { %1317 = vmatpush1.msra.mxu1 %v1245_v10  ;;  %v1196_v15 = vld [vmem:[#allocation9 + $0x10] sm:$0xff] }
 0x28e   : > { %v1140_v17 = vpop.permute.xlu1 %1139  ;;  %1147 = vrot.lane.b32.xlu1 %v4583_v16, %s4213_s25  ;;  %1144 = vrot.lane.b32.xlu0 %v4583_v16, %s4212_s21 }
 0x28f   : > { %v1142_v18 = vmax.f32 %v1132_v14, %v1140_v17  ;;  %v1243_v14 = vld [vmem:[#allocation9 + $0x160] sm:$0xff]  ;;  %v1242_v17 = vld [vmem:[#allocation9 + $0x158] sm:$0xff]  ;;  %1318 = vmatprep.subr.mxu1 %v1244_v12  ;;  %1395 = vmatpush1.msra.mxu0 %v1196_v15  ;;  %v1468_v15 = vld [vmem:[#allocation9 + $0x350] sm:$0xff] }
 0x290   : > { %1319 = vmatpush1.msra.mxu1 %v1243_v14  ;;  %v1469_v14 = vld [vmem:[#allocation9 + $0x358] sm:$0xff] }
 0x291   : > { %1320 = vmatprep.subr.mxu1 %v1242_v17  ;;  %v1467_v17 = vld [vmem:[#allocation9 + $0x348] sm:$0xff] }
 0x292   : > { %1154 = vrot.lane.b32.xlu1 %v1142_v18, %s4214_s20  ;;  %1150 = vrot.lane.b32.xlu0 %v4583_v16, %s4215_s17 }
 0x293   : > { %1321 = vmatpush1.msra.mxu1 %v1241_v22  ;;  %v1462_v22 = vld [vmem:[#allocation9 + $0x320] sm:$0xff] }
 0x294   : > { %1322 = vmatprep.subr.mxu1 %v1240_v24  ;;  %v1460_v24 = vld [vmem:[#allocation9 + $0x310] sm:$0xff] }
 0x295   : > { %1323 = vmatpush1.msra.mxu1 %v1239_v29  ;;  %v1455_v29 = vld [vmem:[#allocation9 + $0x2e8] sm:$0xff] }
 0x296   : > { %1160 = vrot.lane.b32.xlu1 %v1142_v18, %s4216_s0  ;;  %1157 = vrot.lane.b32.xlu0 %v1142_v18, %s4217_s9 }
 0x297   : > { %1348 = vmatprep.subr.mxu1 %v1278_v32  ;;  %v1452_v32 = vld [vmem:[#allocation9 + $0x2d0] sm:$0xff] }
 0x298   : > { %1349 = vmatpush2.msra.mxu1 %v1277_v33  ;;  %v1450_v33 = vld [vmem:[#allocation9 + $0x2c0] sm:$0xff] }
 0x299   : > { %1350 = vmatprep.subr.mxu1 %v1276_v35  ;;  %v1448_v35 = vld [vmem:[#allocation9 + $0x2b0] sm:$0xff] }
 0x29a   : > { %1163 = vrot.lane.b32.xlu0 %v1142_v18, %s4218_s10  ;;  %v1195_v18 = vld [vmem:[#allocation9 + $0x8] sm:$0xff]  ;;  %1351 = vmatpush2.msra.mxu1 %v1275_v37  ;;  %v1446_v37 = vld [vmem:[#allocation9 + $0x2a0] sm:$0xff] }
 0x29b   : > { %1396 = vmatprep.subr.mxu0 %v1195_v18  ;;  %1352 = vmatprep.subr.mxu1 %v1274_v41  ;;  %v1466_v18 = vld [vmem:[#allocation9 + $0x340] sm:$0xff] }
 0x29c   : > { %1397 = vmatpush1.msra.mxu0 %v1194_v23  ;;  %1353 = vmatpush2.msra.mxu1 %v1273_v45  ;;  %v1461_v23 = vld [vmem:[#allocation9 + $0x318] sm:$0xff]  ;;  %v1442_v41 = vld [vmem:[#allocation9 + $0x280] sm:$0xff] }
 0x29d   : > { %1422 = vmatprep.subr.mxu0 %v1233_v28  ;;  %1354 = vmatprep.subr.mxu1 %v1272_v47  ;;  %v1456_v28 = vld [vmem:[#allocation9 + $0x2f0] sm:$0xff]  ;;  %v1478_v45 = vld [vmem:[#allocation9 + $0x3a0] sm:$0xff] }
 0x29e   : > { %1423 = vmatpush2.msra.mxu0 %v1232_v30  ;;  %1355 = vmatpush2.msra.mxu1 %v1271_v50  ;;  %v1454_v30 = vld [vmem:[#allocation9 + $0x2e0] sm:$0xff]  ;;  %v1475_v50 = vld [vmem:[#allocation9 + $0x388] sm:$0xff] }
 0x29f   : > { %1495 = vmatprep.subr.mxu1 %v1473_v53  ;;  %v1474_v53 = vld [vmem:[#allocation9 + $0x380] sm:$0xff] }
 0x300   : > { %v1148_v19 = vpop.permute.xlu1 %1147  ;;  %v1145_v20 = vpop.permute.xlu0 %1144 }
 0x301   : > { %v1167_v21 = vsel %vm1166_vm14, %v4583_v16, %v1145_v20  ;;  %v1231_v16 = vld [vmem:[#allocation9 + $0x128] sm:$0xff]  ;;  %v1464_v20 = vld [vmem:[#allocation9 + $0x330] sm:$0xff] }
 0x302   : > { %v1168_v26 = vsel %vm658_vm12, %v1167_v21, %v1148_v19  ;;  %1424 = vmatprep.subr.mxu0 %v1231_v16  ;;  %v1465_v19 = vld [vmem:[#allocation9 + $0x338] sm:$0xff]  ;;  %v1463_v21 = vld [vmem:[#allocation9 + $0x328] sm:$0xff] }
 0x303   : > { %1425 = vmatpush2.msra.mxu0 %v1230_v34  ;;  %v1451_v16 = vld [vmem:[#allocation9 + $0x2c8] sm:$0xff]  ;;  %v1449_v34 = vld [vmem:[#allocation9 + $0x2b8] sm:$0xff] }
 0x304   : > { %v1155_v25 = vpop.permute.xlu1 %1154  ;;  %v1151_v27 = vpop.permute.xlu0 %1150  ;;  %1426 = vmatprep.subr.mxu0 %v1229_v36  ;;  %v1447_v36 = vld [vmem:[#allocation9 + $0x2a8] sm:$0xff] }
 0x305   : > { %v1170_v31 = vsel %vm4902_vm15, %v1168_v26, %v1151_v27  ;;  %1427 = vmatpush2.msra.mxu0 %v1228_v38  ;;  %vm1190_vm15 = vcmask 122880   ;;  %v1458_v26 = vld [vmem:[#allocation9 + $0x300] sm:$0xff]  ;;  %v1457_v27 = vld [vmem:[#allocation9 + $0x2f8] sm:$0xff] }
 0x306   : > { %v1172_v39 = vsel %vm1171_vm0, %v1170_v31, %v1155_v25  ;;  %1428 = vmatprep.subr.mxu0 %v1227_v42  ;;  %v1459_v25 = vld [vmem:[#allocation9 + $0x308] sm:$0xff]  ;;  %v1453_v31 = vld [vmem:[#allocation9 + $0x2d8] sm:$0xff] }
 0x307   : > { %1429 = vmatpush2.msra.mxu0 %v1226_v46  ;;  %v1445_v38 = vld [vmem:[#allocation9 + $0x298] sm:$0xff] }
 0x308   : > { %v1158_v40 = vpop.permute.xlu0 %1157  ;;  %v1161_v43 = vpop.permute.xlu1 %1160  ;;  %v1481_v42 = vld [vmem:[#allocation9 + $0x3b8] sm:$0xff] }
 0x309   : > { %v1174_v44 = vsel %vm4901_vm1, %v1172_v39, %v1158_v40  ;;  %vm1188_vm1 = vcmask 1040512   ;;  %v1444_v39 = vld [vmem:[#allocation9 + $0x290] sm:$0xff]  ;;  %v1443_v40 = vld [vmem:[#allocation9 + $0x288] sm:$0xff] }
 0x30a   : > { %v1176_v48 = vsel %vm1175_vm3, %v1174_v44, %v1161_v43  ;;  %v1480_v43 = vld [vmem:[#allocation9 + $0x3b0] sm:$0xff]  ;;  %v1479_v44 = vld [vmem:[#allocation9 + $0x3a8] sm:$0xff] }
 0x30c   : > { %v1164_v49 = vpop.permute.xlu0 %1163 }
 0x30d   : > { %v1178_v51 = vsel %vm1177_vm4, %v1176_v48, %v1164_v49  ;;  %v1477_v48 = vld [vmem:[#allocation9 + $0x398] sm:$0xff]  ;;  %v1476_v49 = vld [vmem:[#allocation9 + $0x390] sm:$0xff] }
 0x30e   : > { %v1180_v52 = vrot.slane %v1178_v51, 7 }
 0x310   : > { %1181 = vrot.lane.b32.xlu1 %v1180_v52, %s4218_s10 }
 0x382   : > { %v1182_v54 = vpop.permute.xlu1 %1181 }
 0x383   : > { %1185 = vst.msk [vmem:[#allocation3] sm:$0xfe] %vm1184_vm5, %v1182_v54  ;;  %vm1657_vm5 = vcmask 258049  }
 0x384   : > { %1187 = vst.msk [vmem:[#allocation3 + $0x8] sm:$0xfe] %vm1186_vm13, %v1182_v54  ;;  %vm4219_vm13 = vmmov 0  }
 0x385   : > { %1189 = vst.msk [vmem:[#allocation3 + $0x10] sm:$0x1] %vm1188_vm1, %v1182_v54  ;;  %vm1655_vm1 = vcmask 1044737  }
 0x386   : > { %1191 = vst.msk [vmem:[#allocation3 + $0x18] sm:$0x1] %vm1190_vm15, %v1182_v54  ;;  %vm664_vm15 = vcmask 521216  }
 0x387   : > { %665 = vst.msk [vmem:[#allocation4 + $0x8] sm:$0x3f] %vm664_vm15, %v4208_v0  ;;  %vm4940_vm15 = vcmask 392192  }
 0x38a   : > { %v1192_v56 = vld [vmem:[#allocation3] sm:$0xff] }
 0x38b   : > { %v1193_v55 = vld [vmem:[#allocation3 + $0x8] sm:$0xff]  ;;  %v1234_v60 = vld [vmem:[#allocation3] sm:$0xfe] }
 0x38c   : > { %v1235_v57 = vld [vmem:[#allocation3 + $0x8] sm:$0xfe]  ;;  %3543 = vmatprep.mubr.msk.f32.mxu0 %vm658_vm12, %v1193_v55  ;;  %v1236_v62 = vld [vmem:[#allocation3 + $0x10] sm:$0x1]  ;;  %v1283_v63 = vrot.slane %v1234_v60, 1 }
 0x38d   : > { %v1237_v58 = vld [vmem:[#allocation3 + $0x18] sm:$0x1]  ;;  %v1286_v59 = vrot.slane %v1235_v57, 1  ;;  %1431 = vmatmul.mubr.f32.vlgmr.msra.gmra.mxu0 %v1192_v56  ;;  %v1438_v1 = vld [vmem:[#allocation3 + $0x8] sm:$0xfc]  ;;  %v1284_v2 = vrot.slane %v1236_v62, 1 }
 0x38e   : > { %v1287_v61 = vrot.slane %v1237_v58, 1  ;;  %v1440_v3 = vld [vmem:[#allocation3 + $0x18] sm:$0x3]  ;;  %v1489_v4 = vrot.slane %v1438_v1, 2  ;;  %v1437_v46 = vld [vmem:[#allocation3] sm:$0xfc] }
 0x38f   : > { %v1490_v9 = vrot.slane %v1440_v3, 2  ;;  %v1285_v10 = vsel %vm1130_vm11, %v1283_v63, %v1284_v2  ;;  %v1439_v47 = vld [vmem:[#allocation3 + $0x10] sm:$0x3]  ;;  %v1486_v51 = vrot.slane %v1437_v46, 2  ;;  %v1568_v57 = vld [vmem:[%s4879_s5] sm:$0x3] }
 0x390   : > { %v1288_v6 = vsel %vm1130_vm11, %v1286_v59, %v1287_v61  ;;  %v1487_v52 = vrot.slane %v1439_v47, 2  ;;  %v1582_v59 = vld [vmem:[%s4880_s6] sm:$0x3]  ;;  %v1573_v61 = vrot.slane %v1568_v57, %v4551_v5 }
 0x391   : > { %3542 = vmatprep.mubr.msk.f32.mxu1 %vm658_vm12, %v1288_v6  ;;  %v1491_v12 = vsel %vm746_vm2, %v1489_v4, %v1490_v9  ;;  %v1587_v3 = vrot.slane %v1582_v59, %v4551_v5  ;;  %v1577_v4 = vrot.slane %v1568_v57, %v4556_v7  ;;  %v1686_v46 = vld [vmem:[#allocation10 + $0xc8] sm:$0xff] }
 0x392   : > { %1357 = vmatmul.mubr.f32.vlgmr.msra.gmra.mxu1 %v1285_v10  ;;  %v1488_v54 = vsel %vm746_vm2, %v1486_v51, %v1487_v52  ;;  %v1591_v10 = vrot.slane %v1582_v59, %v4556_v7  ;;  %v1736_v51 = vld [vmem:[#allocation10 + $0x240] sm:$0xff]  ;;  %v1684_v52 = vld [vmem:[#allocation10 + $0xb8] sm:$0xff]  ;;  %v1733_v57 = vld [vmem:[#allocation10 + $0x228] sm:$0xff] }
 0x393   : > { %1496 = vmatpush1.msra.mxu1 %v1472_v8  ;;  %3544 = vmatprep.mubr.msk.f32.mxu1 %vm658_vm12, %v1491_v12  ;;  %v1732_v59 = vld [vmem:[#allocation10 + $0x220] sm:$0xff] }
 0x394   : > { %1497 = vmatprep.subr.mxu1 %v1471_v11 }
 0x395   : > { %1498 = vmatpush1.msra.mxu1 %v1470_v13 }
 0x396   : > { %1499 = vmatprep.subr.mxu1 %v1469_v14 }
 0x397   : > { %1500 = vmatpush1.msra.mxu1 %v1468_v15 }
 0x398   : > { %1501 = vmatprep.subr.mxu1 %v1467_v17 }
 0x399   : > { %1502 = vmatpush1.msra.mxu1 %v1466_v18 }
 0x39a   : > { %1503 = vmatprep.subr.mxu1 %v1465_v19 }
 0x39b   : > { %1504 = vmatpush1.msra.mxu1 %v1464_v20 }
 0x39c   : > { %1505 = vmatprep.subr.mxu1 %v1463_v21 }
 0x39d   : > { %1506 = vmatpush1.msra.mxu1 %v1462_v22 }
 0x39e   : > { %1507 = vmatprep.subr.mxu1 %v1461_v23 }
 0x39f   : > { %1508 = vmatpush1.msra.mxu1 %v1460_v24 }
 0x3a0   : > { %1509 = vmatprep.subr.mxu1 %v1459_v25 }
 0x3a1   : > { %1510 = vmatpush1.msra.mxu1 %v1458_v26 }
 0x3a2   : > { %1511 = vmatprep.subr.mxu1 %v1457_v27 }
 0x3a3   : > { %1512 = vmatpush1.msra.mxu1 %v1456_v28 }
 0x3a4   : > { %1513 = vmatprep.subr.mxu1 %v1455_v29 }
 0x3a5   : > { %1514 = vmatpush1.msra.mxu1 %v1454_v30 }
 0x3a6   : > { %1515 = vmatprep.subr.mxu1 %v1453_v31 }
 0x3a7   : > { %1516 = vmatpush1.msra.mxu1 %v1452_v32 }
 0x3a8   : > { %1517 = vmatprep.subr.mxu1 %v1451_v16  ;;  %v1692_v16 = vld [vmem:[#allocation10 + $0xf8] sm:$0xff] }
 0x3a9   : > { %1518 = vmatpush1.msra.mxu1 %v1450_v33  ;;  %v1743_v33 = vld [vmem:[#allocation10 + $0x278] sm:$0xff] }
 0x3aa   : > { %1519 = vmatprep.subr.mxu1 %v1449_v34  ;;  %v1691_v34 = vld [vmem:[#allocation10 + $0xf0] sm:$0xff]  ;;  %1767 = vmatprep.subr.mxu0 %v1743_v33 }
 0x3ab   : > { %1520 = vmatpush1.msra.mxu1 %v1448_v35  ;;  %v1742_v35 = vld [vmem:[#allocation10 + $0x270] sm:$0xff] }
 0x3ac   : > { %1521 = vmatprep.subr.mxu1 %v1447_v36  ;;  %v1690_v36 = vld [vmem:[#allocation10 + $0xe8] sm:$0xff]  ;;  %1768 = vmatpush1.msra.mxu0 %v1742_v35  ;;  %v1663_v33 = vld [vmem:[#allocation10 + $0x10] sm:$0xff] }
 0x3ad   : > { %1522 = vmatpush1.msra.mxu1 %v1446_v37  ;;  %v1741_v37 = vld [vmem:[#allocation10 + $0x268] sm:$0xff] }
 0x3ae   : > { %1523 = vmatprep.subr.mxu1 %v1445_v38  ;;  %v1689_v38 = vld [vmem:[#allocation10 + $0xe0] sm:$0xff]  ;;  %1769 = vmatprep.subr.mxu0 %v1741_v37  ;;  %v1662_v35 = vld [vmem:[#allocation10 + $0x8] sm:$0xff] }
 0x3af   : > { %1524 = vmatpush1.msra.mxu1 %v1444_v39  ;;  %v1740_v39 = vld [vmem:[#allocation10 + $0x260] sm:$0xff] }
 0x3b0   : > { %1525 = vmatprep.subr.mxu1 %v1443_v40  ;;  %v1688_v40 = vld [vmem:[#allocation10 + $0xd8] sm:$0xff]  ;;  %1770 = vmatpush1.msra.mxu0 %v1740_v39  ;;  %v1661_v37 = vld [vmem:[#allocation10] sm:$0xff] }
 0x3b1   : > { %1526 = vmatpush1.msra.mxu1 %v1442_v41  ;;  %v1708_v39 = vld [vmem:[#allocation10 + $0x178] sm:$0xff] }
 0x3b2   : > { %1551 = vmatprep.subr.mxu1 %v1481_v42  ;;  %v1739_v42 = vld [vmem:[#allocation10 + $0x258] sm:$0xff] }
 0x3b3   : > { %1552 = vmatpush2.msra.mxu1 %v1480_v43  ;;  %v1687_v43 = vld [vmem:[#allocation10 + $0xd0] sm:$0xff]  ;;  %1771 = vmatprep.subr.mxu0 %v1739_v42 }
 0x3b4   : > { %1553 = vmatprep.subr.mxu1 %v1479_v44  ;;  %v1758_v42 = vld [vmem:[#allocation10 + $0x2f0] sm:$0xff] }
 0x3b5   : > { %1554 = vmatpush2.msra.mxu1 %v1478_v45  ;;  %v1738_v45 = vld [vmem:[#allocation10 + $0x250] sm:$0xff] }
 0x3b6   : > { %1555 = vmatprep.subr.mxu1 %v1477_v48  ;;  %v1737_v48 = vld [vmem:[#allocation10 + $0x248] sm:$0xff]  ;;  %1772 = vmatpush1.msra.mxu0 %v1738_v45 }
 0x3b7   : > { %1556 = vmatpush2.msra.mxu1 %v1476_v49  ;;  %1773 = vmatprep.subr.mxu0 %v1737_v48  ;;  %v1757_v45 = vld [vmem:[#allocation10 + $0x2e8] sm:$0xff]  ;;  %v1704_v48 = vld [vmem:[#allocation10 + $0x158] sm:$0xff] }
 0x3b8   : > { %1557 = vmatprep.subr.mxu1 %v1475_v50  ;;  %v1685_v50 = vld [vmem:[#allocation10 + $0xc0] sm:$0xff]  ;;  %1774 = vmatpush1.msra.mxu0 %v1736_v51  ;;  %v1754_v51 = vld [vmem:[#allocation10 + $0x2d0] sm:$0xff] }
 0x3b9   : > { %1558 = vmatpush2.msra.mxu1 %v1474_v53  ;;  %v1735_v53 = vld [vmem:[#allocation10 + $0x238] sm:$0xff] }
 0x3ba   : > { %1560 = vmatmul.mubr.f32.vlgmr.msra.gmra.mxu1 %v1488_v54  ;;  %1841 = vmatprep.subr.mxu1 %v1692_v16  ;;  %v1683_v54 = vld [vmem:[#allocation10 + $0xb0] sm:$0xff]  ;;  %v1715_v16 = vld [vmem:[#allocation10 + $0x198] sm:$0xff] }
 0x3bb   : > { %1842 = vmatpush1.msra.mxu1 %v1691_v34  ;;  %1775 = vmatprep.subr.mxu0 %v1735_v53  ;;  %v1714_v34 = vld [vmem:[#allocation10 + $0x190] sm:$0xff]  ;;  %v1753_v53 = vld [vmem:[#allocation10 + $0x2c8] sm:$0xff] }
 0x3bc   : > { %1843 = vmatprep.subr.mxu1 %v1690_v36  ;;  %v1713_v36 = vld [vmem:[#allocation10 + $0x188] sm:$0xff] }
 0x3bd   : > { %1844 = vmatpush1.msra.mxu1 %v1689_v38  ;;  %v1712_v38 = vld [vmem:[#allocation10 + $0x180] sm:$0xff] }
 0x3be   : > { %1845 = vmatprep.subr.mxu1 %v1688_v40  ;;  %v1759_v40 = vld [vmem:[#allocation10 + $0x2f8] sm:$0xff] }
 0x3bf   : > { %1846 = vmatpush1.msra.mxu1 %v1687_v43  ;;  %v1706_v43 = vld [vmem:[#allocation10 + $0x168] sm:$0xff] }
 0x3c0   : > { %1847 = vmatprep.subr.mxu1 %v1686_v46  ;;  %v1705_v46 = vld [vmem:[#allocation10 + $0x160] sm:$0xff] }
 0x3c1   : > { %1848 = vmatpush1.msra.mxu1 %v1685_v50  ;;  %v1703_v50 = vld [vmem:[#allocation10 + $0x150] sm:$0xff] }
 0x3c2   : > { %1849 = vmatprep.subr.mxu1 %v1684_v52  ;;  %v1702_v52 = vld [vmem:[#allocation10 + $0x148] sm:$0xff] }
 0x3c3   : > { %1850 = vmatpush1.msra.mxu1 %v1683_v54  ;;  %v1701_v54 = vld [vmem:[#allocation10 + $0x140] sm:$0xff] }
 0x44d   : > { %v1432_v56 = vpop.f32.mrf.mxu0 }
 0x44f   : > { %v1434_v62 = vpop.f32.mrf.mxu0 }
 0x452   : > { %v1358_v55 = vpop.f32.mrf.mxu1 }
 0x453   : > { %v1433_v60 = vadd.f32 %v1432_v56, %v1358_v55  ;;  %v1734_v55 = vld [vmem:[#allocation10 + $0x230] sm:$0xff]  ;;  %v1682_v56 = vld [vmem:[#allocation10 + $0xa8] sm:$0xff] }
 0x454   : > { %v1360_v58 = vpop.f32.mrf.mxu1  ;;  %1776 = vmatpush1.msra.mxu0 %v1734_v55  ;;  %1851 = vmatprep.subr.mxu1 %v1682_v56  ;;  %v1752_v55 = vld [vmem:[#allocation10 + $0x2c0] sm:$0xff]  ;;  %v1700_v56 = vld [vmem:[#allocation10 + $0x138] sm:$0xff] }
 0x455   : > { %v1435_v1 = vadd.f32 %v1434_v62, %v1360_v58  ;;  %v1681_v58 = vld [vmem:[#allocation10 + $0xa0] sm:$0xff]  ;;  %v1679_v62 = vld [vmem:[#allocation10 + $0x90] sm:$0xff]  ;;  %1777 = vmatprep.subr.mxu0 %v1733_v57  ;;  %v1751_v57 = vld [vmem:[#allocation10 + $0x2b8] sm:$0xff] }
 0x456   : > { %1852 = vmatpush1.msra.mxu1 %v1681_v58  ;;  %1778 = vmatpush1.msra.mxu0 %v1732_v59  ;;  %v1699_v58 = vld [vmem:[#allocation10 + $0x130] sm:$0xff] }
 0x457   : > { %v1750_v59 = vld [vmem:[#allocation10 + $0x2b0] sm:$0xff] }
 0x47a   : > { %v1561_v63 = vpop.f32.mrf.mxu1 }
 0x47b   : > { %v1566_v2 = vadd.f32 %v1561_v63, %v1433_v60  ;;  %v1680_v60 = vld [vmem:[#allocation10 + $0x98] sm:$0xff]  ;;  %v1730_v63 = vld [vmem:[#allocation10 + $0x210] sm:$0xff] }
 0x47c   : > { %v1563_v6 = vpop.f32.mrf.mxu1  ;;  %1853 = vmatprep.subr.mxu1 %v1680_v60  ;;  %v1698_v60 = vld [vmem:[#allocation10 + $0x128] sm:$0xff] }
 0x47d   : > { %v1580_v8 = vmul.f32 %v1573_v61, %v1566_v2  ;;  %v1567_v9 = vadd.f32 %v1563_v6, %v1435_v1  ;;  %v1731_v61 = vld [vmem:[#allocation10 + $0x218] sm:$0xff]  ;;  %v1678_v1 = vld [vmem:[#allocation10 + $0x88] sm:$0xff]  ;;  %1854 = vmatpush1.msra.mxu1 %v1679_v62  ;;  %v1697_v62 = vld [vmem:[#allocation10 + $0x120] sm:$0xff] }
 0x47e   : > { %v1729_v2 = vld [vmem:[#allocation10 + $0x208] sm:$0xff]  ;;  %1779 = vmatprep.subr.mxu0 %v1731_v61  ;;  %v1676_v6 = vld [vmem:[#allocation10 + $0x78] sm:$0xff]  ;;  %1855 = vmatprep.subr.mxu1 %v1678_v1 }
 0x47f   : > { %v1594_v11 = vadd.f32 %v1587_v3, %v1580_v8  ;;  %v1581_v12 = vmul.f32 %v1577_v4, %v1567_v9  ;;  %v1677_v3 = vld [vmem:[#allocation10 + $0x80] sm:$0xff]  ;;  %1780 = vmatpush1.msra.mxu0 %v1730_v63  ;;  %v1727_v8 = vld [vmem:[#allocation10 + $0x1f8] sm:$0xff]  ;;  %v1675_v9 = vld [vmem:[#allocation10 + $0x70] sm:$0xff] }
 0x480   : > { %v1728_v4 = vld [vmem:[#allocation10 + $0x200] sm:$0xff]  ;;  %1781 = vmatprep.subr.mxu0 %v1729_v2  ;;  %1856 = vmatpush1.msra.mxu1 %v1677_v3  ;;  %v1749_v61 = vld [vmem:[#allocation10 + $0x2a8] sm:$0xff]  ;;  %v1696_v1 = vld [vmem:[#allocation10 + $0x118] sm:$0xff] }
 0x481   : > { %v1596_v13 = vmax.f32 %v1594_v11, 0.0  ;;  %v1595_v14 = vadd.f32 %v1591_v10, %v1581_v12  ;;  %v1726_v10 = vld [vmem:[#allocation10 + $0x1f0] sm:$0xff]  ;;  %v1674_v11 = vld [vmem:[#allocation10 + $0x68] sm:$0xff]  ;;  %1782 = vmatpush1.msra.mxu0 %v1728_v4  ;;  %1857 = vmatprep.subr.mxu1 %v1676_v6  ;;  %v1748_v63 = vld [vmem:[#allocation10 + $0x2a0] sm:$0xff] }
 0x482   : > { %v1725_v12 = vld [vmem:[#allocation10 + $0x1e8] sm:$0xff]  ;;  %1783 = vmatprep.subr.mxu0 %v1727_v8  ;;  %1858 = vmatpush1.msra.mxu1 %v1675_v9  ;;  %v1747_v2 = vld [vmem:[#allocation10 + $0x298] sm:$0xff]  ;;  %v1695_v3 = vld [vmem:[#allocation10 + $0x110] sm:$0xff] }
 0x483   : > { %v1600_v15 = vrot.slane %v1596_v13, 1  ;;  %v1597_v17 = vmax.f32 %v1595_v14, 0.0  ;;  %v1724_v14 = vld [vmem:[#allocation10 + $0x1e0] sm:$0xff]  ;;  %1784 = vmatpush1.msra.mxu0 %v1726_v10  ;;  %1859 = vmatprep.subr.mxu1 %v1674_v11  ;;  %v1746_v6 = vld [vmem:[#allocation10 + $0x290] sm:$0xff]  ;;  %v1694_v8 = vld [vmem:[#allocation10 + $0x108] sm:$0xff] }
 0x484   : > { %1785 = vmatprep.subr.mxu0 %v1725_v12  ;;  %v1745_v10 = vld [vmem:[#allocation10 + $0x288] sm:$0xff]  ;;  %v1693_v11 = vld [vmem:[#allocation10 + $0x100] sm:$0xff] }
 0x485   : > { %v1604_v18 = vmax.f32 %v1596_v13, %v1600_v15  ;;  %v1601_v19 = vrot.slane %v1597_v17, 1  ;;  %v1673_v13 = vld [vmem:[#allocation10 + $0x60] sm:$0xff]  ;;  %v1672_v15 = vld [vmem:[#allocation10 + $0x58] sm:$0xff]  ;;  %1786 = vmatpush1.msra.mxu0 %v1724_v14 }
 0x486   : > { %1860 = vmatpush1.msra.mxu1 %v1673_v13  ;;  %v1744_v14 = vld [vmem:[#allocation10 + $0x280] sm:$0xff] }
 0x487   : > { %v1605_v20 = vmax.f32 %v1597_v17, %v1601_v19  ;;  %v1608_v21 = vrot.slane %v1604_v18, 1  ;;  %v1612_v22 = vrot.slane %v1604_v18, 2  ;;  %v1616_v23 = vrot.slane %v1604_v18, 3  ;;  %v1723_v17 = vld [vmem:[#allocation10 + $0x1d8] sm:$0xff]  ;;  %v1722_v19 = vld [vmem:[#allocation10 + $0x1d0] sm:$0xff]  ;;  %1861 = vmatprep.subr.mxu1 %v1672_v15 }
 0x488   : > { %1787 = vmatprep.subr.mxu0 %v1723_v17 }
 0x489   : > { %v1620_v24 = vsel %vm1113_vm6, %v1604_v18, %v1608_v21  ;;  %v1609_v25 = vrot.slane %v1605_v20, 1  ;;  %v1613_v26 = vrot.slane %v1605_v20, 2  ;;  %v1617_v29 = vrot.slane %v1605_v20, 3  ;;  %v1671_v18 = vld [vmem:[#allocation10 + $0x50] sm:$0xff]  ;;  %v1721_v21 = vld [vmem:[#allocation10 + $0x1c8] sm:$0xff]  ;;  %1788 = vmatpush1.msra.mxu0 %v1722_v19 }
 0x48a   : > { %v1622_v27 = vsel %vm1116_vm7, %v1620_v24, %v1612_v22  ;;  %v1669_v22 = vld [vmem:[#allocation10 + $0x40] sm:$0xff]  ;;  %1862 = vmatpush1.msra.mxu1 %v1671_v18  ;;  %v1668_v24 = vld [vmem:[#allocation10 + $0x38] sm:$0xff]  ;;  %1789 = vmatprep.subr.mxu0 %v1721_v21 }
 0x48b   : > { %v1624_v28 = vsel %vm1119_vm8, %v1622_v27, %v1616_v23  ;;  %v1621_v30 = vsel %vm1113_vm6, %v1605_v20, %v1609_v25  ;;  %v1670_v20 = vld [vmem:[#allocation10 + $0x48] sm:$0xff]  ;;  %v1720_v23 = vld [vmem:[#allocation10 + $0x1c0] sm:$0xff]  ;;  %v1719_v25 = vld [vmem:[#allocation10 + $0x1b8] sm:$0xff] }
 0x48c   : > { %1627 = vrot.lane.b32.xlu0 %v1624_v28, %s4213_s25  ;;  %v1623_v31 = vsel %vm1116_vm7, %v1621_v30, %v1613_v26  ;;  %1863 = vmatprep.subr.mxu1 %v1670_v20  ;;  %v1667_v26 = vld [vmem:[#allocation10 + $0x30] sm:$0xff]  ;;  %v1665_v30 = vld [vmem:[#allocation10 + $0x20] sm:$0xff]  ;;  %v1946_v18 = vld [vmem:[#allocation10 + $0x3f8] sm:$0xff] }
 0x48d   : > { %v1625_v32 = vsel %vm1119_vm8, %v1623_v31, %v1617_v29  ;;  %1864 = vmatpush1.msra.mxu1 %v1669_v22  ;;  %v1718_v27 = vld [vmem:[#allocation10 + $0x1b0] sm:$0xff]  ;;  %1790 = vmatpush1.msra.mxu0 %v1720_v23  ;;  %v1717_v29 = vld [vmem:[#allocation10 + $0x1a8] sm:$0xff]  ;;  %v1716_v31 = vld [vmem:[#allocation10 + $0x1a0] sm:$0xff] }
 0x48e   : > { %1632 = vrot.lane.b32.xlu1 %v1625_v32, %s4213_s25  ;;  %1865 = vmatprep.subr.mxu1 %v1668_v24 }
 0x48f   : > { %1791 = vmatprep.subr.mxu0 %v1719_v25  ;;  %1866 = vmatpush1.msra.mxu1 %v1667_v26 }
 0x490   : > { %1792 = vmatpush1.msra.mxu0 %v1718_v27  ;;  %v1945_v27 = vld [vmem:[#allocation10 + $0x3f0] sm:$0xff] }
 0x491   : > { %1793 = vmatprep.subr.mxu0 %v1717_v29 }
 0x492   : > { %1794 = vmatpush1.msra.mxu0 %v1716_v31  ;;  %v1942_v31 = vld [vmem:[#allocation10 + $0x3d8] sm:$0xff] }
 0x493   : > { %1795 = vmatprep.subr.mxu0 %v1715_v16  ;;  %v1940_v16 = vld [vmem:[#allocation10 + $0x3c8] sm:$0xff] }
 0x494   : > { %1796 = vmatpush1.msra.mxu0 %v1714_v34  ;;  %v1938_v34 = vld [vmem:[#allocation10 + $0x3b8] sm:$0xff] }
 0x495   : > { %1797 = vmatprep.subr.mxu0 %v1713_v36  ;;  %v1936_v36 = vld [vmem:[#allocation10 + $0x3a8] sm:$0xff] }
 0x496   : > { %1798 = vmatpush1.msra.mxu0 %v1712_v38  ;;  %v1934_v38 = vld [vmem:[#allocation10 + $0x398] sm:$0xff] }
 0x497   : > { %1815 = vmatprep.subr.mxu0 %v1759_v40  ;;  %v1932_v40 = vld [vmem:[#allocation10 + $0x388] sm:$0xff] }
 0x498   : > { %1816 = vmatpush2.msra.mxu0 %v1758_v42  ;;  %v1930_v42 = vld [vmem:[#allocation10 + $0x378] sm:$0xff] }
 0x499   : > { %1817 = vmatprep.subr.mxu0 %v1757_v45  ;;  %v1928_v45 = vld [vmem:[#allocation10 + $0x368] sm:$0xff] }
 0x4fe   : > { %v1628_v41 = vpop.permute.xlu0 %1627 }
 0x4ff   : > { %v4631_v44 = vmax.f32 %v1624_v28, %v1628_v41  ;;  %v1666_v28 = vld [vmem:[#allocation10 + $0x28] sm:$0xff]  ;;  %v1707_v41 = vld [vmem:[#allocation10 + $0x170] sm:$0xff] }
 0x500   : > { %v1633_v47 = vpop.permute.xlu1 %1632  ;;  %1867 = vmatprep.subr.mxu1 %v1666_v28  ;;  %v1944_v28 = vld [vmem:[#allocation10 + $0x3e8] sm:$0xff] }
 0x501   : > { %v1635_v49 = vmax.f32 %v1625_v32, %v1633_v47  ;;  %1637 = vrot.lane.b32.xlu0 %v4631_v44, %s4213_s25  ;;  %v1664_v32 = vld [vmem:[#allocation10 + $0x18] sm:$0xff]  ;;  %1868 = vmatpush1.msra.mxu1 %v1665_v30  ;;  %v1756_v47 = vld [vmem:[#allocation10 + $0x2e0] sm:$0xff] }
 0x502   : > { %1869 = vmatprep.subr.mxu1 %v1664_v32  ;;  %1818 = vmatpush2.msra.mxu0 %v1756_v47  ;;  %v1943_v30 = vld [vmem:[#allocation10 + $0x3e0] sm:$0xff]  ;;  %v1941_v32 = vld [vmem:[#allocation10 + $0x3d0] sm:$0xff]  ;;  %v1926_v47 = vld [vmem:[#allocation10 + $0x358] sm:$0xff] }
 0x503   : > { %1641 = vrot.lane.b32.xlu1 %v1635_v49, %s4214_s20  ;;  %1870 = vmatpush1.msra.mxu1 %v1663_v33  ;;  %v1939_v33 = vld [vmem:[#allocation10 + $0x3c0] sm:$0xff] }
 0x504   : > { %1871 = vmatprep.subr.mxu1 %v1662_v35  ;;  %v1937_v35 = vld [vmem:[#allocation10 + $0x3b0] sm:$0xff] }
 0x505   : > { %1644 = vrot.lane.b32.xlu0 %v1635_v49, %s4216_s0  ;;  %1872 = vmatpush1.msra.mxu1 %v1661_v37  ;;  %v1755_v49 = vld [vmem:[#allocation10 + $0x2d8] sm:$0xff]  ;;  %v1935_v37 = vld [vmem:[#allocation10 + $0x3a0] sm:$0xff] }
 0x506   : > { %1889 = vmatprep.subr.mxu1 %v1708_v39  ;;  %1819 = vmatprep.subr.mxu0 %v1755_v49  ;;  %v1933_v39 = vld [vmem:[#allocation10 + $0x390] sm:$0xff]  ;;  %v1924_v49 = vld [vmem:[#allocation10 + $0x348] sm:$0xff] }
 0x507   : > { %1890 = vmatpush2.msra.mxu1 %v1707_v41  ;;  %1820 = vmatpush2.msra.mxu0 %v1754_v51  ;;  %v1931_v41 = vld [vmem:[#allocation10 + $0x380] sm:$0xff]  ;;  %v1922_v51 = vld [vmem:[#allocation10 + $0x338] sm:$0xff] }
 0x508   : > { %1891 = vmatprep.subr.mxu1 %v1706_v43  ;;  %1821 = vmatprep.subr.mxu0 %v1753_v53  ;;  %v1929_v43 = vld [vmem:[#allocation10 + $0x370] sm:$0xff]  ;;  %v1920_v53 = vld [vmem:[#allocation10 + $0x328] sm:$0xff] }
 0x509   : > { %1892 = vmatpush2.msra.mxu1 %v1705_v46  ;;  %1822 = vmatpush2.msra.mxu0 %v1752_v55  ;;  %v1927_v46 = vld [vmem:[#allocation10 + $0x360] sm:$0xff]  ;;  %v1918_v55 = vld [vmem:[#allocation10 + $0x318] sm:$0xff] }
 0x50a   : > { %1893 = vmatprep.subr.mxu1 %v1704_v48  ;;  %1823 = vmatprep.subr.mxu0 %v1751_v57  ;;  %v1925_v48 = vld [vmem:[#allocation10 + $0x350] sm:$0xff]  ;;  %v1916_v57 = vld [vmem:[#allocation10 + $0x308] sm:$0xff] }
 0x50b   : > { %1894 = vmatpush2.msra.mxu1 %v1703_v50  ;;  %1824 = vmatpush2.msra.mxu0 %v1750_v59  ;;  %v1923_v50 = vld [vmem:[#allocation10 + $0x340] sm:$0xff]  ;;  %v1962_v59 = vld [vmem:[#allocation10 + $0x478] sm:$0xff] }
 0x50c   : > { %1895 = vmatprep.subr.mxu1 %v1702_v52  ;;  %1825 = vmatprep.subr.mxu0 %v1749_v61  ;;  %v1921_v52 = vld [vmem:[#allocation10 + $0x330] sm:$0xff]  ;;  %v1960_v61 = vld [vmem:[#allocation10 + $0x468] sm:$0xff] }
 0x50d   : > { %1896 = vmatpush2.msra.mxu1 %v1701_v54  ;;  %1826 = vmatpush2.msra.mxu0 %v1748_v63  ;;  %v1919_v54 = vld [vmem:[#allocation10 + $0x320] sm:$0xff]  ;;  %v1958_v63 = vld [vmem:[#allocation10 + $0x458] sm:$0xff] }
 0x50e   : > { %1897 = vmatprep.subr.mxu1 %v1700_v56  ;;  %1827 = vmatprep.subr.mxu0 %v1747_v2  ;;  %v1917_v56 = vld [vmem:[#allocation10 + $0x310] sm:$0xff]  ;;  %v1956_v2 = vld [vmem:[#allocation10 + $0x448] sm:$0xff] }
 0x50f   : > { %1898 = vmatpush2.msra.mxu1 %v1699_v58  ;;  %1828 = vmatpush2.msra.mxu0 %v1746_v6  ;;  %v1915_v58 = vld [vmem:[#allocation10 + $0x300] sm:$0xff]  ;;  %v1953_v6 = vld [vmem:[#allocation10 + $0x430] sm:$0xff] }
 0x510   : > { %1899 = vmatprep.subr.mxu1 %v1698_v60  ;;  %1829 = vmatprep.subr.mxu0 %v1745_v10  ;;  %v1961_v60 = vld [vmem:[#allocation10 + $0x470] sm:$0xff]  ;;  %v1950_v10 = vld [vmem:[#allocation10 + $0x418] sm:$0xff] }
 0x511   : > { %1900 = vmatpush2.msra.mxu1 %v1697_v62  ;;  %1830 = vmatpush2.msra.mxu0 %v1744_v14  ;;  %v1959_v62 = vld [vmem:[#allocation10 + $0x460] sm:$0xff] }
 0x512   : > { %1901 = vmatprep.subr.mxu1 %v1696_v1  ;;  %1970 = vmatprep.subr.mxu0 %v1946_v18  ;;  %v1957_v1 = vld [vmem:[#allocation10 + $0x450] sm:$0xff]  ;;  %v1947_v14 = vld [vmem:[#allocation10 + $0x400] sm:$0xff] }
 0x513   : > { %1902 = vmatpush2.msra.mxu1 %v1695_v3  ;;  %v1955_v3 = vld [vmem:[#allocation10 + $0x440] sm:$0xff] }
 0x514   : > { %1903 = vmatprep.subr.mxu1 %v1694_v8  ;;  %v1952_v8 = vld [vmem:[#allocation10 + $0x428] sm:$0xff] }
 0x515   : > { %1904 = vmatpush2.msra.mxu1 %v1693_v11  ;;  %v1949_v11 = vld [vmem:[#allocation10 + $0x410] sm:$0xff] }
 0x516   : > { %3630 = vmatprep.subr.mxu1 %v4208_v0 }
 0x573   : > { %v1638_v4 = vpop.permute.xlu0 %1637 }
 0x574   : > { %v1647_v9 = vsel %vm658_vm12, %v4631_v44, %v1638_v4  ;;  %v1954_v4 = vld [vmem:[#allocation10 + $0x438] sm:$0xff] }
 0x575   : > { %v1642_v12 = vpop.permute.xlu1 %1641 }
 0x576   : > { %v1648_v13 = vsel %vm1171_vm0, %v1647_v9, %v1642_v12  ;;  %v1951_v9 = vld [vmem:[#allocation10 + $0x420] sm:$0xff]  ;;  %v1948_v12 = vld [vmem:[#allocation10 + $0x408] sm:$0xff] }
 0x577   : > { %v1645_v15 = vpop.permute.xlu0 %1644 }
 0x578   : > { %v1649_v17 = vsel %vm1175_vm3, %v1648_v13, %v1645_v15 }
 0x579   : > { %v1651_v44 = vrot.slane %v1649_v17, 7 }
 0x57b   : > { %1652 = vrot.lane.b32.xlu1 %v1651_v44, %s4216_s0  ;;  %v2043_v44 = vld [vmem:[#allocation12] sm:$0x3] }
 0x5ed   : > { %v1653_v19 = vpop.permute.xlu1 %1652 }
 0x5ee   : > { %1656 = vst.msk [vmem:[#allocation4] sm:$0x1e] %vm1655_vm1, %v1653_v19  ;;  %vm4941_vm1 = vcmask 654336  }
 0x5ef   : > { %1658 = vst.msk [vmem:[#allocation4 + $0x8] sm:$0x1e] %vm1657_vm5, %v1653_v19  ;;  %vm4942_vm5 = vmmov %vm4940_vm15 }
 0x5f5   : > { %v1659_v21 = vld [vmem:[#allocation4] sm:$0xf] }
 0x5f6   : > { %v1660_v20 = vld [vmem:[#allocation4 + $0x8] sm:$0xf]  ;;  %v1709_v24 = vld [vmem:[#allocation4] sm:$0x1e] }
 0x5f7   : > { %v1710_v22 = vld [vmem:[#allocation4 + $0x8] sm:$0x1e]  ;;  %3546 = vmatprep.mubr.msk.f32.mxu1 %vm1171_vm0, %v1660_v20  ;;  %v1762_v26 = vrot.slane %v1709_v24, 1  ;;  %v1912_v13 = vld [vmem:[#allocation4] sm:$0x3c] }
 0x5f8   : > { %v1763_v23 = vrot.slane %v1710_v22, 1  ;;  %v1913_v25 = vld [vmem:[#allocation4 + $0x8] sm:$0x3c]  ;;  %1906 = vmatmul.mubr.f32.vlgmr.msra.gmra.mxu1 %v1659_v21  ;;  %v1965_v15 = vrot.slane %v1912_v13, 2  ;;  %v2057_v20 = vld [vmem:[#allocation13] sm:$0x3]  ;;  %v2048_v22 = vrot.slane %v2043_v44, %v4551_v5 }
 0x5f9   : > { %v1966_v29 = vrot.slane %v1913_v25, 2  ;;  %3646 = vmatprep.mubr.msk.f32.mxu1 %vm4219_vm13, %v4208_v0 }
 0x5fa   : > { %3545 = vmatprep.mubr.msk.f32.mxu0 %vm1171_vm0, %v1763_v23 }
 0x5fb   : > { %1832 = vmatmul.mubr.f32.vlgmr.msra.gmra.mxu0 %v1762_v26 }
 0x5fc   : > { %1971 = vmatpush1.msra.mxu0 %v1945_v27  ;;  %3547 = vmatprep.mubr.msk.f32.mxu0 %vm1171_vm0, %v1966_v29  ;;  %v2062_v27 = vrot.slane %v2057_v20, %v4551_v5 }
 0x5fd   : > { %1972 = vmatprep.subr.mxu0 %v1944_v28  ;;  %v2052_v28 = vrot.slane %v2043_v44, %v4556_v7 }
 0x5fe   : > { %1973 = vmatpush1.msra.mxu0 %v1943_v30 }
 0x5ff   : > { %1974 = vmatprep.subr.mxu0 %v1942_v31 }
 0x600   : > { %1975 = vmatpush1.msra.mxu0 %v1941_v32  ;;  %v2066_v32 = vrot.slane %v2057_v20, %v4556_v7 }
 0x601   : > { %1976 = vmatprep.subr.mxu0 %v1940_v16 }
 0x602   : > { %1977 = vmatpush1.msra.mxu0 %v1939_v33 }
 0x603   : > { %1978 = vmatprep.subr.mxu0 %v1938_v34 }
 0x604   : > { %1979 = vmatpush1.msra.mxu0 %v1937_v35 }
 0x605   : > { %1980 = vmatprep.subr.mxu0 %v1936_v36  ;;  %v2111_v36 = vld [vmem:[#allocation15 + $0x38] sm:$0xff] }
 0x606   : > { %1981 = vmatpush1.msra.mxu0 %v1935_v37  ;;  %v2110_v37 = vld [vmem:[#allocation15 + $0x30] sm:$0xff]  ;;  %3631 = vmatpush3.msra.mxu1 %v2111_v36 }
 0x607   : > { %1982 = vmatprep.subr.mxu0 %v1934_v38  ;;  %3632 = vmatprep.subr.mxu1 %v4208_v0 }
 0x608   : > { %1983 = vmatpush1.msra.mxu0 %v1933_v39  ;;  %3633 = vmatpush3.msra.mxu1 %v2110_v37 }
 0x609   : > { %1984 = vmatprep.subr.mxu0 %v1932_v40  ;;  %v2109_v40 = vld [vmem:[#allocation15 + $0x28] sm:$0xff]  ;;  %3634 = vmatprep.subr.mxu1 %v4208_v0 }
 0x60a   : > { %1985 = vmatpush1.msra.mxu0 %v1931_v41  ;;  %3635 = vmatpush3.msra.mxu1 %v2109_v40 }
 0x60b   : > { %1986 = vmatprep.subr.mxu0 %v1930_v42  ;;  %v2108_v42 = vld [vmem:[#allocation15 + $0x20] sm:$0xff]  ;;  %3636 = vmatprep.subr.mxu1 %v4208_v0 }
 0x60c   : > { %1987 = vmatpush1.msra.mxu0 %v1929_v43  ;;  %3637 = vmatpush3.msra.mxu1 %v2108_v42 }
 0x60d   : > { %1988 = vmatprep.subr.mxu0 %v1928_v45  ;;  %v2107_v45 = vld [vmem:[#allocation15 + $0x18] sm:$0xff]  ;;  %3638 = vmatprep.subr.mxu1 %v4208_v0 }
 0x60e   : > { %1989 = vmatpush1.msra.mxu0 %v1927_v46  ;;  %3639 = vmatpush3.msra.mxu1 %v2107_v45 }
 0x60f   : > { %1990 = vmatprep.subr.mxu0 %v1926_v47  ;;  %3640 = vmatprep.subr.mxu1 %v4208_v0 }
 0x610   : > { %1991 = vmatpush1.msra.mxu0 %v1925_v48  ;;  %v2106_v48 = vld [vmem:[#allocation15 + $0x10] sm:$0xff] }
 0x611   : > { %1992 = vmatprep.subr.mxu0 %v1924_v49  ;;  %3641 = vmatpush3.msra.mxu1 %v2106_v48 }
 0x612   : > { %1993 = vmatpush1.msra.mxu0 %v1923_v50  ;;  %v2105_v50 = vld [vmem:[#allocation15 + $0x8] sm:$0xff]  ;;  %3642 = vmatprep.subr.mxu1 %v4208_v0 }
 0x613   : > { %1994 = vmatprep.subr.mxu0 %v1922_v51  ;;  %3643 = vmatpush3.msra.mxu1 %v2105_v50  ;;  %v2104_v51 = vld [vmem:[#allocation15] sm:$0xff] }
 0x614   : > { %1995 = vmatpush1.msra.mxu0 %v1921_v52  ;;  %3644 = vmatprep.subr.mxu1 %v4208_v0 }
 0x615   : > { %1996 = vmatprep.subr.mxu0 %v1920_v53  ;;  %3645 = vmatpush3.msra.mxu1 %v2104_v51 }
 0x616   : > { %1997 = vmatpush1.msra.mxu0 %v1919_v54  ;;  %3649 = vmatprep.subr.mxu1 %v4208_v0 }
 0x617   : > { %1998 = vmatprep.subr.mxu0 %v1918_v55 }
 0x618   : > { %1999 = vmatpush1.msra.mxu0 %v1917_v56 }
 0x619   : > { %2000 = vmatprep.subr.mxu0 %v1916_v57 }
 0x61a   : > { %2001 = vmatpush1.msra.mxu0 %v1915_v58 }
 0x61b   : > { %2018 = vmatprep.subr.mxu0 %v1962_v59  ;;  %v2292_v59 = vld [vmem:[#allocation16 + $0x18] sm:$0xff] }
 0x61c   : > { %2019 = vmatpush2.msra.mxu0 %v1961_v60  ;;  %v3548_v60 = vld [vmem:[%s4885_s11] ss:$0 sm:$0xff] }
 0x61d   : > { %2020 = vmatprep.subr.mxu0 %v1960_v61 }
 0x61e   : > { %2021 = vmatpush2.msra.mxu0 %v1959_v62 }
 0x61f   : > { %2022 = vmatprep.subr.mxu0 %v1958_v63 }
 0x620   : > { %2023 = vmatpush2.msra.mxu0 %v1957_v1 }
 0x621   : > { %2024 = vmatprep.subr.mxu0 %v1956_v2  ;;  %v2291_v2 = vld [vmem:[#allocation16 + $0x10] sm:$0xff] }
 0x622   : > { %2025 = vmatpush2.msra.mxu0 %v1955_v3  ;;  %v2290_v3 = vld [vmem:[#allocation16 + $0x8] sm:$0xff] }
 0x623   : > { %2026 = vmatprep.subr.mxu0 %v1954_v4  ;;  %v2289_v4 = vld [vmem:[#allocation16] sm:$0xff] }
 0x624   : > { %2027 = vmatpush2.msra.mxu0 %v1953_v6 }
 0x625   : > { %2028 = vmatprep.subr.mxu0 %v1952_v8 }
 0x626   : > { %2029 = vmatpush2.msra.mxu0 %v1951_v9 }
 0x627   : > { %2030 = vmatprep.subr.mxu0 %v1950_v10 }
 0x628   : > { %2031 = vmatpush2.msra.mxu0 %v1949_v11 }
 0x629   : > { %2032 = vmatprep.subr.mxu0 %v1948_v12 }
 0x62a   : > { %2033 = vmatpush2.msra.mxu0 %v1947_v14 }
 0x62b   : > { %2035 = vmatmul.mubr.f32.vlgmr.msra.gmra.mxu0 %v1965_v15  ;;  %3668 = vmatprep.subr.mxu0 %v4208_v0 }
 0x62c   : > { %3676 = vmatprep.mubr.msk.f32.mxu0 %vm4219_vm13, %v4208_v0  ;;  %3669 = vmatpush3.msra.mxu0 %v2292_v59 }
 0x62d   : > { %3670 = vmatprep.subr.mxu0 %v4208_v0 }
 0x62e   : > { %3671 = vmatpush3.msra.mxu0 %v2291_v2 }
 0x62f   : > { %3672 = vmatprep.subr.mxu0 %v4208_v0 }
 0x630   : > { %3673 = vmatpush3.msra.mxu0 %v2290_v3 }
 0x631   : > { %3674 = vmatprep.subr.mxu0 %v4208_v0 }
 0x632   : > { %3675 = vmatpush3.msra.mxu0 %v2289_v4 }
 0x633   : > { %3679 = vmatprep.subr.mxu0 %v4208_v0 }
 0x6b8   : > { %v1907_v18 = vpop.f32.mrf.mxu1 }
 0x6ba   : > { %v1909_v23 = vpop.f32.mrf.mxu1 }
 0x6bb   : > { %v1833_v17 = vpop.f32.mrf.mxu0 }
 0x6bc   : > { %v1908_v21 = vadd.f32 %v1907_v18, %v1833_v17 }
 0x6bd   : > { %v1835_v19 = vpop.f32.mrf.mxu0 }
 0x6be   : > { %v1910_v25 = vadd.f32 %v1909_v23, %v1835_v19 }
 0x6eb   : > { %v2036_v24 = vpop.f32.mrf.mxu0 }
 0x6ec   : > { %v2041_v26 = vadd.f32 %v2036_v24, %v1908_v21  ;;  %v3551_v24 = vld [vmem:[#allocation18] ss:$0 sm:$0xff] }
 0x6ed   : > { %v2038_v29 = vpop.f32.mrf.mxu0 }
 0x6ee   : > { %v2055_v30 = vmul.f32 %v2048_v22, %v2041_v26  ;;  %v2042_v31 = vadd.f32 %v2038_v29, %v1910_v25 }
 0x6f0   : > { %v2069_v16 = vadd.f32 %v2062_v27, %v2055_v30  ;;  %v2056_v33 = vmul.f32 %v2052_v28, %v2042_v31 }
 0x6f2   : > { %v2071_v34 = vmax.f32 %v2069_v16, 0.0  ;;  %v2070_v35 = vadd.f32 %v2066_v32, %v2056_v33 }
 0x6f4   : > { %v2075_v38 = vrot.slane %v2071_v34, 1  ;;  %v2072_v39 = vmax.f32 %v2070_v35, 0.0 }
 0x6f6   : > { %v2076_v5 = vrot.slane %v2072_v39, 1  ;;  %v2079_v41 = vmax.f32 %v2071_v34, %v2075_v38  ;;  %v4739_v38 = vld [vmem:[%s4888_s14] sm:$0xff] }
 0x6f8   : > { %v2083_v7 = vrot.slane %v2079_v41, 1  ;;  %v2080_v43 = vmax.f32 %v2072_v39, %v2076_v5 }
 0x6fa   : > { %v2087_v46 = vsel %vm1113_vm6, %v2079_v41, %v2083_v7  ;;  %v2084_v47 = vrot.slane %v2080_v43, 1 }
 0x6fb   : > { %2090 = vrot.lane.b32.xlu1 %v2087_v46, %s4214_s20 }
 0x6fc   : > { %v2088_v49 = vsel %vm1113_vm6, %v2080_v43, %v2084_v47 }
 0x6fd   : > { %2095 = vrot.lane.b32.xlu0 %v2088_v49, %s4214_s20 }
 0x76d   : > { %v2091_v54 = vpop.permute.xlu1 %2090 }
 0x76e   : > { %v2093_v55 = vmax.f32 %v2087_v46, %v2091_v54 }
 0x76f   : > { %v2096_v52 = vpop.permute.xlu0 %2095 }
 0x770   : > { %v2098_v53 = vmax.f32 %v2088_v49, %v2096_v52 }
 0x772   : > { %2100 = vrot.lane.b32.xlu0 %v2098_v53, %s4214_s20 }
 0x7e4   : > { %v2101_v56 = vpop.permute.xlu0 %2100 }
 0x7e5   : > { %v2103_v57 = vsel %vm1171_vm0, %v2093_v55, %v2101_v56 }
 0x7e6   : > { %2193 = vrot.lane.b32.xlu1 %v2103_v57, %s4214_s20  ;;  %3647 = vmatmul.mubr.msk.f32.vlgmr.msra.gmra.mxu1 %vm1171_vm0, %v2103_v57 }
 0x7e7   : > { %3650 = vmatpush3.msra.mxu1 %v2111_v36  ;;  %3665 = vmatprep.mubr.msk.f32.mxu1 %vm4219_vm13, %v4208_v0  ;;  %v4731_v36 = vld [vmem:[%s4888_s14 + $0x8] sm:$0xff] }
 0x7e8   : > { %3651 = vmatprep.subr.mxu1 %v4208_v0 }
 0x7e9   : > { %3652 = vmatpush3.msra.mxu1 %v2110_v37 }
 0x7ea   : > { %3653 = vmatprep.subr.mxu1 %v4208_v0 }
 0x7eb   : > { %3654 = vmatpush3.msra.mxu1 %v2109_v40 }
 0x7ec   : > { %3655 = vmatprep.subr.mxu1 %v4208_v0 }
 0x7ed   : > { %3656 = vmatpush3.msra.mxu1 %v2108_v42 }
 0x7ee   : > { %3657 = vmatprep.subr.mxu1 %v4208_v0 }
 0x7ef   : > { %3658 = vmatpush3.msra.mxu1 %v2107_v45 }
 0x7f0   : > { %3659 = vmatprep.subr.mxu1 %v4208_v0 }
 0x7f1   : > { %3660 = vmatpush3.msra.mxu1 %v2106_v48 }
 0x7f2   : > { %3661 = vmatprep.subr.mxu1 %v4208_v0 }
 0x7f3   : > { %3662 = vmatpush3.msra.mxu1 %v2105_v50 }
 0x7f4   : > { %3663 = vmatprep.subr.mxu1 %v4208_v0 }
 0x7f5   : > { %3664 = vmatpush3.msra.mxu1 %v2104_v51 }
 0x7f6   : > { %3690 = vmatprep.subr.mxu1 %v4208_v0 }
 0x858   : > { %v2194_v58 = vpop.permute.xlu1 %2193 }
 0x859   : > { %3666 = vmatmul.mubr.msk.f32.vlgmr.msra.gmra.mxu1 %vm1171_vm0, %v2194_v58 }
 0x85a   : > { %3698 = vmatprep.mubr.msk.f32.mxu1 %vm4219_vm13, %v4208_v0  ;;  %3691 = vmatpush3.msra.mxu1 %v2292_v59 }
 0x85b   : > { %3692 = vmatprep.subr.mxu1 %v4208_v0 }
 0x85c   : > { %3693 = vmatpush3.msra.mxu1 %v2291_v2 }
 0x85d   : > { %3694 = vmatprep.subr.mxu1 %v4208_v0 }
 0x85e   : > { %3695 = vmatpush3.msra.mxu1 %v2290_v3 }
 0x85f   : > { %3696 = vmatprep.subr.mxu1 %v4208_v0 }
 0x860   : > { %3697 = vmatpush3.msra.mxu1 %v2289_v4 }
 0x861   : > { %3712 = vmatprep.subr.mxu1 %v4208_v0 }
 0x8a6   : > { %v2188_v61 = vpop.f32.mrf.mxu1 }
 0x8a7   : > { %v2189_v62 = vadd.f32 %v3548_v60, %v2188_v61 }
 0x8a8   : > { %v3648_v63 = vpop.f32.mrf.mxu1 }
 0x8a9   : > { %v2192_v1 = vmax.f32 %v2189_v62, 0.0 }
 0x8ab   : > { %2274 = vrot.lane.b32.xlu0 %v2192_v1, %s4214_s20 }
 0x919   : > { %v2263_v6 = vpop.f32.mrf.mxu1 }
 0x91a   : > { %v2264_v8 = vadd.f32 %v3548_v60, %v2263_v6 }
 0x91b   : > { %v3667_v9 = vpop.f32.mrf.mxu1 }
 0x91c   : > { %v2267_v10 = vmax.f32 %v2264_v8, 0.0 }
 0x91d   : > { %v2275_v11 = vpop.permute.xlu0 %2274 }
 0x91e   : > { %2269 = vrot.lane.b32.xlu1 %v2267_v10, %s4214_s20  ;;  %v2277_v12 = vsel %vm1171_vm0, %v2275_v11, %v2267_v10 }
 0x91f   : > { %v2279_v13 = vrot.slane %v2277_v12, 7  ;;  %v2284_v44 = vrot.slane %v2277_v12, 6 }
 0x990   : > { %v2270_v14 = vpop.permute.xlu1 %2269 }
 0x991   : > { %v2272_v15 = vsel %vm1171_vm0, %v2192_v1, %v2270_v14 }
 0x992   : > { %v2282_v17 = vrot.slane %v2272_v15, 7  ;;  %v2286_v18 = vsel %vm1113_vm6, %v2272_v15, %v2279_v13  ;;  %v3556_v13 = vld [vmem:[%s4939_s18] ss:$0 sm:$0xff] }
 0x994   : > { %v2287_v19 = vsel %vm1116_vm7, %v2286_v18, %v2282_v17 }
 0x995   : > { %v2288_v20 = vsel %vm1119_vm8, %v2287_v19, %v2284_v44 }
 0x996   : > { %2449 = vrot.lane.b32.xlu1 %v2288_v20, %s4214_s20  ;;  %2374 = vrot.lane.b32.xlu0 %v2288_v20, %s4213_s25 }
 0x997   : > { %3677 = vmatmul.mubr.msk.f32.vlgmr.msra.gmra.mxu0 %vm658_vm12, %v2288_v20 }
 0x998   : > { %3680 = vmatpush3.msra.mxu0 %v2292_v59  ;;  %3687 = vmatprep.mubr.msk.f32.mxu0 %vm4219_vm13, %v4208_v0 }
 0x999   : > { %3681 = vmatprep.subr.mxu0 %v4208_v0 }
 0x99a   : > { %2524 = vrot.lane.b32.xlu0 %v2288_v20, %s4216_s0  ;;  %3682 = vmatpush3.msra.mxu0 %v2291_v2 }
 0x99b   : > { %3683 = vmatprep.subr.mxu0 %v4208_v0 }
 0x99c   : > { %3684 = vmatpush3.msra.mxu0 %v2290_v3 }
 0x99d   : > { %3685 = vmatprep.subr.mxu0 %v4208_v0 }
 0x99e   : > { %3686 = vmatpush3.msra.mxu0 %v2289_v4 }
 0x99f   : > { %3701 = vmatprep.subr.mxu0 %v4208_v0 }
 0xa08   : > { %v2450_v21 = vpop.permute.xlu1 %2449  ;;  %v2375_v22 = vpop.permute.xlu0 %2374 }
 0xa09   : > { %3688 = vmatmul.mubr.msk.f32.vlgmr.msra.gmra.mxu0 %vm658_vm12, %v2375_v22  ;;  %3699 = vmatmul.mubr.msk.f32.vlgmr.msra.gmra.mxu1 %vm658_vm12, %v2450_v21 }
 0xa0a   : > { %3702 = vmatpush3.msra.mxu0 %v2292_v59  ;;  %3709 = vmatprep.mubr.msk.f32.mxu0 %vm4219_vm13, %v4208_v0 }
 0xa0b   : > { %3703 = vmatprep.subr.mxu0 %v4208_v0  ;;  %3716 = vmatprep.mubr.msk.f32.mxu1 %vm4219_vm13, %v4208_v0 }
 0xa0c   : > { %3704 = vmatpush3.msra.mxu0 %v2291_v2  ;;  %v2525_v23 = vpop.permute.xlu0 %2524  ;;  %3713 = vmatpush3.msra.mxu1 %v4731_v36 }
 0xa0d   : > { %3705 = vmatprep.subr.mxu0 %v4208_v0  ;;  %3714 = vmatprep.subr.mxu1 %v4208_v0 }
 0xa0e   : > { %3706 = vmatpush3.msra.mxu0 %v2290_v3  ;;  %3715 = vmatpush3.msra.mxu1 %v4739_v38 }
 0xa0f   : > { %3707 = vmatprep.subr.mxu0 %v4208_v0  ;;  %3719 = vmatprep.subr.mxu1 %v4208_v0 }
 0xa10   : > { %3708 = vmatpush3.msra.mxu0 %v2289_v4 }
 0xa11   : > { %3710 = vmatmul.mubr.msk.f32.vlgmr.msra.gmra.mxu0 %vm658_vm12, %v2525_v23  ;;  %3726 = vmatprep.subr.mxu0 %v4208_v0 }
 0xa12   : > { %3730 = vmatprep.mubr.msk.f32.mxu0 %vm4219_vm13, %v4208_v0  ;;  %3727 = vmatpush3.msra.mxu0 %v4731_v36 }
 0xa13   : > { %3728 = vmatprep.subr.mxu0 %v4208_v0 }
 0xa14   : > { %3729 = vmatpush3.msra.mxu0 %v4739_v38 }
 0xa15   : > { %3740 = vmatprep.subr.mxu0 %v4208_v0 }
 0xa57   : > { %v2369_v25 = vpop.f32.mrf.mxu0 }
 0xa58   : > { %v2370_v26 = vadd.f32 %v3551_v24, %v2369_v25 }
 0xa59   : > { %v3678_v27 = vpop.f32.mrf.mxu0 }
 0xa5a   : > { %v2373_v28 = vmax.f32 %v2370_v26, 0.0 }
 0xa5c   : > { %2615 = vrot.lane.b32.xlu1 %v2373_v28, %s4213_s25 }
 0xac9   : > { %v2444_v29 = vpop.f32.mrf.mxu0  ;;  %v2519_v30 = vpop.f32.mrf.mxu1 }
 0xaca   : > { %v2445_v31 = vadd.f32 %v3551_v24, %v2444_v29  ;;  %v2520_v32 = vadd.f32 %v3551_v24, %v2519_v30 }
 0xacb   : > { %v3689_v16 = vpop.f32.mrf.mxu0  ;;  %v3700_v33 = vpop.f32.mrf.mxu1 }
 0xacc   : > { %v2448_v34 = vmax.f32 %v2445_v31, 0.0  ;;  %v2523_v35 = vmax.f32 %v2520_v32, 0.0 }
 0xace   : > { %2600 = vrot.lane.b32.xlu0 %v2448_v34, %s4216_s0  ;;  %2618 = vrot.lane.b32.xlu1 %v2523_v35, %s4216_s0  ;;  %v2616_v41 = vpop.permute.xlu1 %2615 }
 0xacf   : > { %v2624_v45 = vsel %vm658_vm12, %v2616_v41, %v2448_v34 }
 0xad1   : > { %v2594_v37 = vpop.f32.mrf.mxu0 }
 0xad2   : > { %v2595_v39 = vadd.f32 %v3551_v24, %v2594_v37  ;;  %2604 = vrot.lane.b32.xlu0 %v2523_v35, %s4214_s20 }
 0xad3   : > { %v3711_v40 = vpop.f32.mrf.mxu0 }
 0xad4   : > { %v2598_v5 = vmax.f32 %v2595_v39, 0.0 }
 0xad6   : > { %2621 = vrot.lane.b32.xlu1 %v2598_v5, %s4214_s20  ;;  %2608 = vrot.lane.b32.xlu0 %v2598_v5, %s4213_s25 }
 0xb40   : > { %v2601_v42 = vpop.permute.xlu0 %2600  ;;  %v2619_v7 = vpop.permute.xlu1 %2618 }
 0xb41   : > { %v2611_v46 = vsel %vm658_vm12, %v2373_v28, %v2601_v42  ;;  %v2625_v47 = vsel %vm1171_vm0, %v2624_v45, %v2619_v7 }
 0xb44   : > { %v2605_v43 = vpop.permute.xlu0 %2604 }
 0xb45   : > { %v2612_v48 = vsel %vm1171_vm0, %v2611_v46, %v2605_v43 }
 0xb48   : > { %v2622_v49 = vpop.permute.xlu1 %2621  ;;  %v2609_v50 = vpop.permute.xlu0 %2608 }
 0xb49   : > { %v2626_v51 = vsel %vm1175_vm3, %v2625_v47, %v2622_v49  ;;  %v2613_v52 = vsel %vm1175_vm3, %v2612_v48, %v2609_v50 }
 0xb4a   : > { %v2628_v53 = vrot.slane %v2626_v51, 7  ;;  %v2631_v54 = vrot.slane %v2613_v52, 7  ;;  %v2633_v55 = vrot.slane %v2626_v51, 6  ;;  %v2635_v57 = vrot.slane %v2613_v52, 6 }
 0xb4b   : > { %v2637_v59 = vrot.slane %v2626_v51, 5  ;;  %v2639_v61 = vrot.slane %v2613_v52, 5  ;;  %v2641_v63 = vrot.slane %v2626_v51, 4 }
 0xb4c   : > { %v2643_v56 = vsel %vm1113_vm6, %v2613_v52, %v2628_v53 }
 0xb4d   : > { %v2644_v58 = vsel %vm1116_vm7, %v2643_v56, %v2631_v54 }
 0xb4e   : > { %v2645_v60 = vsel %vm1119_vm8, %v2644_v58, %v2633_v55 }
 0xb4f   : > { %v2646_v62 = vsel %vm1122_vm9, %v2645_v60, %v2635_v57 }
 0xb50   : > { %v2647_v1 = vsel %vm1125_vm10, %v2646_v62, %v2637_v59 }
 0xb51   : > { %v2648_v2 = vsel %vm746_vm2, %v2647_v1, %v2639_v61 }
 0xb52   : > { %v2649_v3 = vsel %vm1130_vm11, %v2648_v2, %v2641_v63 }
 0xb53   : > { %2806 = vrot.lane.b32.xlu0 %v2649_v3, %s4213_s25  ;;  %2732 = vrot.lane.b32.xlu1 %v2649_v3, %s4212_s21 }
 0xb54   : > { %3717 = vmatmul.mubr.msk.f32.vlgmr.msra.gmra.mxu1 %vm1166_vm14, %v2649_v3 }
 0xb55   : > { %3720 = vmatpush3.msra.mxu1 %v4731_v36  ;;  %3723 = vmatprep.mubr.msk.f32.mxu1 %vm4219_vm13, %v4208_v0 }
 0xb56   : > { %3721 = vmatprep.subr.mxu1 %v4208_v0 }
 0xb57   : > { %2954 = vrot.lane.b32.xlu0 %v2649_v3, %s4214_s20  ;;  %2880 = vrot.lane.b32.xlu1 %v2649_v3, %s4215_s17 }
 0xb58   : > { %3722 = vmatpush3.msra.mxu1 %v4739_v38 }
 0xb59   : > { %3733 = vmatprep.subr.mxu1 %v4208_v0 }
 0xb5b   : > { %3102 = vrot.lane.b32.xlu0 %v2649_v3, %s4216_s0  ;;  %3028 = vrot.lane.b32.xlu1 %v2649_v3, %s4217_s9 }
 0xb5f   : > { %3176 = vrot.lane.b32.xlu1 %v2649_v3, %s4218_s10 }
 0xbc5   : > { %v2807_v4 = vpop.permute.xlu0 %2806  ;;  %v2733_v6 = vpop.permute.xlu1 %2732 }
 0xbc6   : > { %3724 = vmatmul.mubr.msk.f32.vlgmr.msra.gmra.mxu1 %vm1166_vm14, %v2733_v6  ;;  %3731 = vmatmul.mubr.msk.f32.vlgmr.msra.gmra.mxu0 %vm1166_vm14, %v2807_v4 }
 0xbc7   : > { %3734 = vmatpush3.msra.mxu1 %v4731_v36  ;;  %3741 = vmatpush3.msra.mxu0 %v4731_v36 }
 0xbc8   : > { %3735 = vmatprep.subr.mxu1 %v4208_v0  ;;  %3742 = vmatprep.subr.mxu0 %v4208_v0 }
 0xbc9   : > { %3743 = vmatpush3.msra.mxu0 %v4739_v38  ;;  %3744 = vmatprep.mubr.msk.f32.mxu0 %vm4219_vm13, %v4208_v0  ;;  %v2955_v8 = vpop.permute.xlu0 %2954  ;;  %v2881_v9 = vpop.permute.xlu1 %2880 }
 0xbca   : > { %3736 = vmatpush3.msra.mxu1 %v4739_v38  ;;  %3737 = vmatprep.mubr.msk.f32.mxu1 %vm4219_vm13, %v4208_v0 }
 0xbcb   : > { %3738 = vmatmul.mubr.msk.f32.vlgmr.msra.gmra.mxu1 %vm1166_vm14, %v2881_v9  ;;  %3745 = vmatmul.mubr.msk.f32.vlgmr.msra.gmra.mxu0 %vm1166_vm14, %v2955_v8 }
 0xbcc   : > { %3747 = vmatprep.subr.mxu1 %v4208_v0  ;;  %3754 = vmatprep.subr.mxu0 %v4208_v0 }
 0xbcd   : > { %3748 = vmatpush3.msra.mxu1 %v4731_v36  ;;  %3755 = vmatpush3.msra.mxu0 %v4731_v36  ;;  %v3029_v10 = vpop.permute.xlu1 %3028  ;;  %v3103_v11 = vpop.permute.xlu0 %3102 }
 0xbce   : > { %3749 = vmatprep.subr.mxu1 %v4208_v0  ;;  %3756 = vmatprep.subr.mxu0 %v4208_v0 }
 0xbcf   : > { %3757 = vmatpush3.msra.mxu0 %v4739_v38  ;;  %3758 = vmatprep.mubr.msk.f32.mxu0 %vm4219_vm13, %v4208_v0 }
 0xbd0   : > { %3750 = vmatpush3.msra.mxu1 %v4739_v38  ;;  %3751 = vmatprep.mubr.msk.f32.mxu1 %vm4219_vm13, %v4208_v0 }
 0xbd1   : > { %3752 = vmatmul.mubr.msk.f32.vlgmr.msra.gmra.mxu1 %vm1166_vm14, %v3029_v10  ;;  %3759 = vmatmul.mubr.msk.f32.vlgmr.msra.gmra.mxu0 %vm1166_vm14, %v3103_v11  ;;  %v3177_v12 = vpop.permute.xlu1 %3176 }
 0xbd2   : > { %3761 = vmatprep.subr.mxu1 %v4208_v0  ;;  %3765 = vmatprep.mubr.msk.f32.mxu1 %vm4219_vm13, %v4208_v0  ;;  %vm4943_vm13 = vmmov %vm4941_vm1 }
 0xbd3   : > { %3762 = vmatpush3.msra.mxu1 %v4731_v36 }
 0xbd4   : > { %3763 = vmatprep.subr.mxu1 %v4208_v0 }
 0xbd5   : > { %3764 = vmatpush3.msra.mxu1 %v4739_v38 }
 0xbd6   : > { %3766 = vmatmul.mubr.msk.f32.vlgmr.msra.gmra.mxu1 %vm1166_vm14, %v3177_v12 }
 0xc14   : > { %v2728_v14 = vpop.f32.mrf.mxu1 }
 0xc15   : > { %v2729_v15 = vadd.f32 %v3556_v13, %v2728_v14 }
 0xc16   : > { %v3718_v17 = vpop.f32.mrf.mxu1 }
 0xc17   : > { %3286 = vrot.lane.b32.xlu1 %v2729_v15, %s4212_s21 }
 0xc86   : > { %v2802_v18 = vpop.f32.mrf.mxu1  ;;  %v2876_v44 = vpop.f32.mrf.mxu0 }
 0xc87   : > { %v2803_v19 = vadd.f32 %v3556_v13, %v2802_v18  ;;  %v2877_v20 = vadd.f32 %v3556_v13, %v2876_v44 }
 0xc88   : > { %v3732_v21 = vpop.f32.mrf.mxu0  ;;  %v3725_v22 = vpop.f32.mrf.mxu1 }
 0xc89   : > { %3289 = vrot.lane.b32.xlu1 %v2877_v20, %s4218_s10  ;;  %3251 = vrot.lane.b32.xlu0 %v2803_v19, %s4218_s10  ;;  %v3287_v36 = vpop.permute.xlu1 %3286 }
 0xc8a   : > { %v3307_v43 = vsel %vm1166_vm14, %v3287_v36, %v2803_v19 }
 0xc8b   : > { %v2950_v0 = vpop.f32.mrf.mxu1  ;;  %v3024_v23 = vpop.f32.mrf.mxu0 }
 0xc8c   : > { %v2951_v24 = vadd.f32 %v3556_v13, %v2950_v0  ;;  %v3025_v27 = vadd.f32 %v3556_v13, %v3024_v23 }
 0xc8d   : > { %v3739_v25 = vpop.f32.mrf.mxu1  ;;  %v3746_v26 = vpop.f32.mrf.mxu0  ;;  %3255 = vrot.lane.b32.xlu0 %v2877_v20, %s4216_s0 }
 0xc8e   : > { %3292 = vrot.lane.b32.xlu1 %v2951_v24, %s4216_s0 }
 0xc91   : > { %v3098_v28 = vpop.f32.mrf.mxu1  ;;  %v3172_v29 = vpop.f32.mrf.mxu0  ;;  %3259 = vrot.lane.b32.xlu0 %v2951_v24, %s4217_s9 }
 0xc92   : > { %3295 = vrot.lane.b32.xlu1 %v3025_v27, %s4217_s9  ;;  %v3099_v32 = vadd.f32 %v3556_v13, %v3098_v28  ;;  %v3173_v33 = vadd.f32 %v3556_v13, %v3172_v29 }
 0xc93   : > { %v3753_v30 = vpop.f32.mrf.mxu1  ;;  %v3760_v31 = vpop.f32.mrf.mxu0 }
 0xc95   : > { %3263 = vrot.lane.b32.xlu0 %v3025_v27, %s4214_s20 }
 0xc96   : > { %v3246_v16 = vpop.f32.mrf.mxu1  ;;  %3298 = vrot.lane.b32.xlu1 %v3099_v32, %s4214_s20  ;;  %s4944_s20 = sld [smem:[#allocation32_spill]] }
 0xc97   : > { %v3247_v35 = vadd.f32 %v3556_v13, %v3246_v16 }
 0xc98   : > { %v3767_v34 = vpop.f32.mrf.mxu1 }
 0xc99   : > { %3267 = vrot.lane.b32.xlu0 %v3099_v32, %s4215_s17 }
 0xc9a   : > { %3301 = vrot.lane.b32.xlu1 %v3173_v33, %s4215_s17 }
 0xc9d   : > { %3271 = vrot.lane.b32.xlu0 %v3173_v33, %s4213_s25 }
 0xc9e   : > { %3304 = vrot.lane.b32.xlu1 %v3247_v35, %s4213_s25 }
 0xca1   : > { %3275 = vrot.lane.b32.xlu0 %v3247_v35, %s4212_s21  ;;  %s3567_s21 = sshll.u32 %s4950_s27, 4 }
 0xca2   : > { %s651_s17 = scalar_lea.vmem %s4944_s20, %s3567_s21 }
 0xcfb   : > { %v3290_v37 = vpop.permute.xlu1 %3289  ;;  %v3252_v38 = vpop.permute.xlu0 %3251 }
 0xcfc   : > { %v3308_v46 = vsel %vm658_vm12, %v3307_v43, %v3290_v37  ;;  %v3278_v49 = vsel %vm1166_vm14, %v2729_v15, %v3252_v38 }
 0xcff   : > { %v3256_v39 = vpop.permute.xlu0 %3255 }
 0xd00   : > { %v3293_v40 = vpop.permute.xlu1 %3292  ;;  %v3279_v51 = vsel %vm658_vm12, %v3278_v49, %v3256_v39 }
 0xd01   : > { %v3309_v48 = vsel %vm4940_vm15, %v3308_v46, %v3293_v40 }
 0xd03   : > { %v3260_v5 = vpop.permute.xlu0 %3259 }
 0xd04   : > { %v3296_v41 = vpop.permute.xlu1 %3295  ;;  %v3280_v54 = vsel %vm4942_vm5, %v3279_v51, %v3260_v5 }
 0xd05   : > { %v3310_v50 = vsel %vm1171_vm0, %v3309_v48, %v3296_v41 }
 0xd07   : > { %v3264_v42 = vpop.permute.xlu0 %3263 }
 0xd08   : > { %v3299_v7 = vpop.permute.xlu1 %3298  ;;  %v3281_v57 = vsel %vm1171_vm0, %v3280_v54, %v3264_v42 }
 0xd09   : > { %v3311_v52 = vsel %vm4941_vm1, %v3310_v50, %v3299_v7 }
 0xd0b   : > { %v3268_v45 = vpop.permute.xlu0 %3267 }
 0xd0c   : > { %v3302_v47 = vpop.permute.xlu1 %3301  ;;  %v3282_v59 = vsel %vm4943_vm13, %v3281_v57, %v3268_v45 }
 0xd0d   : > { %v3312_v55 = vsel %vm1175_vm3, %v3311_v52, %v3302_v47 }
 0xd0f   : > { %v3272_v53 = vpop.permute.xlu0 %3271 }
 0xd10   : > { %v3305_v56 = vpop.permute.xlu1 %3304  ;;  %v3283_v60 = vsel %vm1175_vm3, %v3282_v59, %v3272_v53 }
 0xd11   : > { %v3313_v58 = vsel %vm1177_vm4, %v3312_v55, %v3305_v56 }
 0xd12   : > { %v3315_v62 = vrot.slane %v3313_v58, 7  ;;  %v3332_v1 = vrot.slane %v3313_v58, 3  ;;  %v3320_v4 = vrot.slane %v3313_v58, 6  ;;  %v3336_v9 = vrot.slane %v3313_v58, 2 }
 0xd13   : > { %v3276_v61 = vpop.permute.xlu0 %3275  ;;  %v3324_v13 = vrot.slane %v3313_v58, 5  ;;  %v3340_v18 = vrot.slane %v3313_v58, 1  ;;  %v3328_v21 = vrot.slane %v3313_v58, 4 }
 0xd14   : > { %v3284_v63 = vsel %vm1177_vm4, %v3283_v60, %v3276_v61 }
 0xd15   : > { %v3318_v2 = vrot.slane %v3284_v63, 7  ;;  %v3330_v3 = vrot.slane %v3284_v63, 4  ;;  %v3334_v6 = vrot.slane %v3284_v63, 3  ;;  %v3344_v8 = vsel %vm1113_vm6, %v3284_v63, %v3315_v62 }
 0xd16   : > { %v3322_v10 = vrot.slane %v3284_v63, 6  ;;  %v3338_v14 = vrot.slane %v3284_v63, 2  ;;  %v3326_v44 = vrot.slane %v3284_v63, 5  ;;  %v3342_v22 = vrot.slane %v3284_v63, 1 }
 0xd17   : > { %v3345_v11 = vsel %vm1116_vm7, %v3344_v8, %v3318_v2  ;;  %v3351_v12 = vsel %vm1113_vm6, %v3330_v3, %v3332_v1 }
 0xd18   : > { %v3346_v15 = vsel %vm1119_vm8, %v3345_v11, %v3320_v4  ;;  %v3352_v17 = vsel %vm1116_vm7, %v3351_v12, %v3334_v6 }
 0xd19   : > { %v3347_v19 = vsel %vm1122_vm9, %v3346_v15, %v3322_v10  ;;  %v3353_v20 = vsel %vm1119_vm8, %v3352_v17, %v3336_v9 }
 0xd1a   : > { %v3348_v0 = vsel %vm1125_vm10, %v3347_v19, %v3324_v13  ;;  %v3354_v23 = vsel %vm1122_vm9, %v3353_v20, %v3338_v14 }
 0xd1b   : > { %v3349_v24 = vsel %vm746_vm2, %v3348_v0, %v3326_v44  ;;  %v3355_v25 = vsel %vm1125_vm10, %v3354_v23, %v3340_v18 }
 0xd1c   : > { %v3350_v26 = vsel %vm1130_vm11, %v3349_v24, %v3328_v21  ;;  %v3356_v27 = vsel %vm746_vm2, %v3355_v25, %v3342_v22 }
 0xd1d   : > { %v3357_v28 = vsel %vm1130_vm11, %v3356_v27, %v3313_v58  ;;  %3358 = vst [vmem:[%s651_s17] sm:$0xff] %v3350_v26 }
 0xd1e   : > { %3359 = vst [vmem:[%s651_s17 + $0x8] sm:$0xff] %v3357_v28 }
 0xd1f PF: > { %p30_p0 = scmp.ge.s32.totalorder %s4435_s19, 4   ;;  %s4945_s21 = smov %s4185_s22 }
 0xd20   : > { %s4946_s22 = smov %s4189_s23  ;;  %s4947_s23 = smov %s4447_s29 }
 0xd21   : > { %s4948_s24 = smov %s4435_s19  ;;  %32 = sbr.rel (!%p30_p0) target bundleno = 17 (0x11), region = 164 }
 0xd26   :  { %3381 = vsyncpa [#allocation6], 1 }
 0xd27   :  { %3383 = vsyncpa [#allocation6 + $0x1], 1 }
 0xd28   :  { %3384 = vsyncpa [#allocation8], 1 }
 0xd29   :  { %3385 = vsyncpa [#allocation11], 1 }
 0xd2a   :  { %3386 = vsyncpa [#allocation14], 1 }
 0xd2b   :  { %3387 = vsyncpa [#allocation17], 1 }

</bundles_post_ra>
